<compile_context>
chip_gen: v6e
topology: v6e:2x2x1
jax: 0.10.0
libtpu: 0.0.40
codegen_flags: <defaults>
</compile_context>

<pallas_src>
import jax
import jax.numpy as jnp
from jax import lax
from jax.experimental import pallas as pl
from jax.experimental.pallas import tpu as pltpu
import numpy as np

# ----- hyperparameters (mirroring the PyTorch module) -----
N_EMBD = 60
N_HEAD = 6
HEAD_SIZE = N_EMBD // N_HEAD      # 10
N_LAYER = 2
BLOCK_SIZE = 256
VOCAB_SIZE = 65                   # synthetic vocab (len(sorted(set(data))))
VOCAB_PAD = 128                   # lane-dense logits width (sliced back to 65 in wrapper)
HIDDEN = 4 * N_EMBD               # 240
LN_EPS = 1e-5
NEG_INF = -1e30                   # finite mask bias (safe with bf16/f32 exp)


def _layernorm(x, g, b):
    mu = jnp.mean(x, axis=-1, keepdims=True)
    xc = x - mu
    var = jnp.mean(xc * xc, axis=-1, keepdims=True)
    return xc * lax.rsqrt(var + LN_EPS) * g + b


def _mm(a, b):
    """a @ b on the MXU, f32 accumulation."""
    return lax.dot_general(a, b, (((1,), (0,)), ((), ())),
                           preferred_element_type=jnp.float32)


def _mm_tb(a, b):
    """a @ b.T (contract last dims of both) on the MXU, f32 accumulation."""
    return lax.dot_general(a, b, (((1,), (1,)), ((), ())),
                           preferred_element_type=jnp.float32)


def _softmax_rows(x):
    m = jnp.max(x, axis=-1, keepdims=True)
    e = jnp.exp(x - m)
    return e * pl.reciprocal(jnp.sum(e, axis=-1, keepdims=True), approx=True)


def bigram_lm_kernel(idx_ref, tok_ref, pos_ref,
                     ln1g_ref, ln1b_ref,
                     wqh_ref, bqh_ref, wkh_ref, bkh_ref, wvh_ref, bvh_ref,
                     wph_ref, bp_ref,
                     ln2g_ref, ln2b_ref,
                     w1_ref, b1_ref, w2_ref, b2_ref,
                     wlm_ref, blm_ref,
                     out_ref):
    T = out_ref.shape[1]
    bf16 = jnp.bfloat16

    # causal additive bias (0 keep / -1e30 drop), built once per grid step
    row = lax.broadcasted_iota(jnp.int32, (T, T), 0)
    col = lax.broadcasted_iota(jnp.int32, (T, T), 1)
    mask_bias = jnp.where(col <= row, 0.0, NEG_INF).astype(jnp.float32)

    # token embedding via one-hot matmul (MXU-friendly gather) + positional embedding
    ids = idx_ref[0, :, :]                                             # (T, 1) int32
    onehot = (ids == lax.broadcasted_iota(jnp.int32, (T, VOCAB_SIZE), 1)
              ).astype(bf16)                                           # (T, V)
    x = _mm(onehot, tok_ref[...]) + pos_ref[...]                       # (T, C) f32

    for l in range(N_LAYER):                                           # static (2)
        # ---- multi-head causal self-attention (pre-LN, residual) ----
        h_in = _layernorm(x, ln1g_ref[l, :, :], ln1b_ref[l, :, :])
        h_b = h_in.astype(bf16)
        sa = jnp.zeros((T, N_EMBD), jnp.float32)
        for h in range(N_HEAD):                                        # static (6)
            q = _mm(h_b, wqh_ref[l, h, :, :]) + bqh_ref[l, h, :, :]    # scale pre-folded
            k = _mm(h_b, wkh_ref[l, h, :, :]) + bkh_ref[l, h, :, :]
            v = _mm(h_b, wvh_ref[l, h, :, :]) + bvh_ref[l, h, :, :]
            wei = _mm_tb(q.astype(bf16), k.astype(bf16)) + mask_bias   # (T, T) f32
            wei = _softmax_rows(wei)
            # TODO(synk): attention dropout is identity in eval mode.
            ho = _mm(wei.astype(bf16), v.astype(bf16))                 # (T, HS)
            sa = sa + _mm(ho.astype(bf16), wph_ref[l, h, :, :])        # accumulate proj
        x = x + sa + bp_ref[l, :, :]
        # TODO(synk): projection dropout is identity in eval mode.

        # ---- feed-forward (Linear -> ReLU -> Linear), residual ----
        f_in = _layernorm(x, ln2g_ref[l, :, :], ln2b_ref[l, :, :]).astype(bf16)
        hdd = jnp.maximum(_mm(f_in, w1_ref[l, :, :]) + b1_ref[l, :, :], 0.0)
        ff = _mm(hdd.astype(bf16), w2_ref[l, :, :]) + b2_ref[l, :, :]
        # TODO(synk): FFN dropout is identity in eval mode.
        x = x + ff

    # ---- lm_head (lane-dense: 128-padded vocab) ----
    logits = _mm(x.astype(bf16), wlm_ref[...]) + blm_ref[...]          # (T, 128) f32
    out_ref[0, :, :] = logits


def _prep_params(p, T):
    """Reshape to head-major layouts, fold attention scale, pad vocab, cast matmul weights to bf16."""
    bf16, f32 = jnp.bfloat16, jnp.float32
    L, C, H, HS = N_LAYER, N_EMBD, N_HEAD, HEAD_SIZE
    scale = HS ** -0.5

    def head_major_w(w):   # (L, C, C) -> (L, H, C, HS)
        return w.reshape(L, C, H, HS).transpose(0, 2, 1, 3)

    def head_major_b(b):   # (L, C) -> (L, H, 1, HS)
        return b.reshape(L, H, 1, HS)

    wqh = (head_major_w(p['wq']) * scale).astype(bf16)
    bqh = (head_major_b(p['bq']) * scale).astype(f32)
    wkh = head_major_w(p['wk']).astype(bf16)
    bkh = head_major_b(p['bk']).astype(f32)
    wvh = head_major_w(p['wv']).astype(bf16)
    bvh = head_major_b(p['bv']).astype(f32)
    wph = p['wp'].reshape(L, H, HS, C).astype(bf16)
    bp = p['bp'].reshape(L, 1, C).astype(f32)

    wlm = jnp.zeros((C, VOCAB_PAD), f32).at[:, :VOCAB_SIZE].set(p['wlm']).astype(bf16)
    blm = jnp.zeros((1, VOCAB_PAD), f32).at[:, :VOCAB_SIZE].set(p['blm'])

    return (p['tok'].astype(bf16),
            p['pos'][:T].astype(f32),
            p['ln1g'].reshape(L, 1, C).astype(f32), p['ln1b'].reshape(L, 1, C).astype(f32),
            wqh, bqh, wkh, bkh, wvh, bvh,
            wph, bp,
            p['ln2g'].reshape(L, 1, C).astype(f32), p['ln2b'].reshape(L, 1, C).astype(f32),
            p['w1'].astype(bf16), p['b1'].reshape(L, 1, HIDDEN).astype(f32),
            p['w2'].astype(bf16), p['b2'].reshape(L, 1, C).astype(f32),
            wlm, blm)


def bigram_lm_forward(idx, p):
    B, T = idx.shape
    params = _prep_params(p, T)
    idx3 = idx.astype(jnp.int32).reshape(B, T, 1)

    # idx/out are blocked per batch element; weights get full-shape blocks with a
    # constant index_map so they stay resident in VMEM across grid steps.
    in_specs = [pl.BlockSpec((1, T, 1), lambda b: (b, 0, 0))]
    for a in params:
        in_specs.append(pl.BlockSpec(a.shape, lambda b, n=a.ndim: (0,) * n))

    out = pl.pallas_call(
        bigram_lm_kernel,
        out_shape=jax.ShapeDtypeStruct((B, T, VOCAB_PAD), jnp.float32),
        grid=(B,),
        in_specs=in_specs,
        out_specs=pl.BlockSpec((1, T, VOCAB_PAD), lambda b: (b, 0, 0)),
        compiler_params=pltpu.CompilerParams(
            dimension_semantics=("parallel",)),
    )(idx3, *params)
    return out[:, :, :VOCAB_SIZE]


def init_params(key):
    ks = jax.random.split(key, 16)
    s = 0.02
    f32 = jnp.float32
    return {
        'tok':  jax.random.normal(ks[0], (VOCAB_SIZE, N_EMBD), f32) * s,
        'pos':  jax.random.normal(ks[1], (BLOCK_SIZE, N_EMBD), f32) * s,
        'ln1g': jnp.ones((N_LAYER, N_EMBD), f32),
        'ln1b': jnp.zeros((N_LAYER, N_EMBD), f32),
        'wq':   jax.random.normal(ks[2], (N_LAYER, N_EMBD, N_EMBD), f32) * s,
        'bq':   jax.random.normal(ks[3], (N_LAYER, N_EMBD), f32) * s,
        'wk':   jax.random.normal(ks[4], (N_LAYER, N_EMBD, N_EMBD), f32) * s,
        'bk':   jax.random.normal(ks[5], (N_LAYER, N_EMBD), f32) * s,
        'wv':   jax.random.normal(ks[6], (N_LAYER, N_EMBD, N_EMBD), f32) * s,
        'bv':   jax.random.normal(ks[7], (N_LAYER, N_EMBD), f32) * s,
        'wp':   jax.random.normal(ks[8], (N_LAYER, N_EMBD, N_EMBD), f32) * s,
        'bp':   jax.random.normal(ks[9], (N_LAYER, N_EMBD), f32) * s,
        'ln2g': jnp.ones((N_LAYER, N_EMBD), f32),
        'ln2b': jnp.zeros((N_LAYER, N_EMBD), f32),
        'w1':   jax.random.normal(ks[10], (N_LAYER, N_EMBD, HIDDEN), f32) * s,
        'b1':   jax.random.normal(ks[11], (N_LAYER, HIDDEN), f32) * s,
        'w2':   jax.random.normal(ks[12], (N_LAYER, HIDDEN, N_EMBD), f32) * s,
        'b2':   jax.random.normal(ks[13], (N_LAYER, N_EMBD), f32) * s,
        'wlm':  jax.random.normal(ks[14], (N_EMBD, VOCAB_SIZE), f32) * s,
        'blm':  jax.random.normal(ks[15], (1, VOCAB_SIZE), f32) * s,
    }


def reference_forward(idx, p):
    """Pure-JAX f32 reference of the same forward pass (eval mode)."""
    B, T = idx.shape
    x = p['tok'][idx] + p['pos'][:T][None]
    causal = (jnp.arange(T)[None, :] <= jnp.arange(T)[:, None])

    def ln(z, g, b):
        mu = z.mean(-1, keepdims=True)
        var = ((z - mu) ** 2).mean(-1, keepdims=True)
        return (z - mu) / jnp.sqrt(var + LN_EPS) * g + b

    for l in range(N_LAYER):
        h_in = ln(x, p['ln1g'][l], p['ln1b'][l])
        q = h_in @ p['wq'][l] + p['bq'][l]
        k = h_in @ p['wk'][l] + p['bk'][l]
        v = h_in @ p['wv'][l] + p['bv'][l]
        outs = []
        for h in range(N_HEAD):
            sl = slice(h * HEAD_SIZE, (h + 1) * HEAD_SIZE)
            qh, kh, vh = q[..., sl], k[..., sl], v[..., sl]
            wei = jnp.einsum('btd,bsd->bts', qh, kh) * HEAD_SIZE ** -0.5
            wei = jnp.where(causal[None], wei, -jnp.inf)
            wei = jax.nn.softmax(wei, axis=-1)
            outs.append(jnp.einsum('bts,bsd->btd', wei, vh))
        x = x + (jnp.concatenate(outs, -1) @ p['wp'][l] + p['bp'][l])
        f_in = ln(x, p['ln2g'][l], p['ln2b'][l])
        x = x + (jax.nn.relu(f_in @ p['w1'][l] + p['b1'][l]) @ p['w2'][l] + p['b2'][l])
    return x @ p['wlm'] + p['blm'][0]


if __name__ == "__main__":
    B, T = 2, 16  # T <= block_size (256)
    key = jax.random.PRNGKey(0)
    k_idx, k_par = jax.random.split(key)
    idx = jax.random.randint(k_idx, (B, T), 0, VOCAB_SIZE, dtype=jnp.int32)
    params = init_params(k_par)

    logits = bigram_lm_forward(idx, params)
    logits = jax.block_until_ready(logits)

    ref = jax.block_until_ready(reference_forward(idx, params))
    np.testing.assert_allclose(np.asarray(logits), np.asarray(ref),
                               atol=2e-2, rtol=2e-2)
    assert logits.shape == (B, T, VOCAB_SIZE)
    print("KERNEL_OK")
</pallas_src>

<mosaic_0001>
module attributes {stable_mosaic.version = 11 : i64} {
  func.func @bigram_lm_kernel(%arg0: i32, %arg1: memref<1x16x1xi32, #tpu.memory_space<vmem>>, %arg2: memref<65x60xbf16, #tpu.memory_space<vmem>>, %arg3: memref<16x60xf32, #tpu.memory_space<vmem>>, %arg4: memref<2x1x60xf32, #tpu.memory_space<vmem>>, %arg5: memref<2x1x60xf32, #tpu.memory_space<vmem>>, %arg6: memref<2x6x60x10xbf16, #tpu.memory_space<vmem>>, %arg7: memref<2x6x1x10xf32, #tpu.memory_space<vmem>>, %arg8: memref<2x6x60x10xbf16, #tpu.memory_space<vmem>>, %arg9: memref<2x6x1x10xf32, #tpu.memory_space<vmem>>, %arg10: memref<2x6x60x10xbf16, #tpu.memory_space<vmem>>, %arg11: memref<2x6x1x10xf32, #tpu.memory_space<vmem>>, %arg12: memref<2x6x10x60xbf16, #tpu.memory_space<vmem>>, %arg13: memref<2x1x60xf32, #tpu.memory_space<vmem>>, %arg14: memref<2x1x60xf32, #tpu.memory_space<vmem>>, %arg15: memref<2x1x60xf32, #tpu.memory_space<vmem>>, %arg16: memref<2x60x240xbf16, #tpu.memory_space<vmem>>, %arg17: memref<2x1x240xf32, #tpu.memory_space<vmem>>, %arg18: memref<2x240x60xbf16, #tpu.memory_space<vmem>>, %arg19: memref<2x1x60xf32, #tpu.memory_space<vmem>>, %arg20: memref<60x128xbf16, #tpu.memory_space<vmem>>, %arg21: memref<1x128xf32, #tpu.memory_space<vmem>>, %arg22: memref<1x16x128xf32, #tpu.memory_space<vmem>>) attributes {dimension_semantics = [#tpu.dimension_semantics<parallel>], iteration_bounds = array<i64: 2>, scalar_prefetch = 0 : i64, scratch_operands = 0 : i64, tpu.core_type = #tpu.core_type<tc>, window_params = [{transform_indices = @transform_0, window_bounds = array<i64: 1, 16, 1>}, {pipeline_mode = #tpu.pipeline_mode<synchronous>, transform_indices = @transform_1, window_bounds = array<i64: 65, 60>}, {pipeline_mode = #tpu.pipeline_mode<synchronous>, transform_indices = @transform_2, window_bounds = array<i64: 16, 60>}, {pipeline_mode = #tpu.pipeline_mode<synchronous>, transform_indices = @transform_3, window_bounds = array<i64: 2, 1, 60>}, {pipeline_mode = #tpu.pipeline_mode<synchronous>, transform_indices = @transform_4, window_bounds = array<i64: 2, 1, 60>}, {pipeline_mode = #tpu.pipeline_mode<synchronous>, transform_indices = @transform_5, window_bounds = array<i64: 2, 6, 60, 10>}, {pipeline_mode = #tpu.pipeline_mode<synchronous>, transform_indices = @transform_6, window_bounds = array<i64: 2, 6, 1, 10>}, {pipeline_mode = #tpu.pipeline_mode<synchronous>, transform_indices = @transform_7, window_bounds = array<i64: 2, 6, 60, 10>}, {pipeline_mode = #tpu.pipeline_mode<synchronous>, transform_indices = @transform_8, window_bounds = array<i64: 2, 6, 1, 10>}, {pipeline_mode = #tpu.pipeline_mode<synchronous>, transform_indices = @transform_9, window_bounds = array<i64: 2, 6, 60, 10>}, {pipeline_mode = #tpu.pipeline_mode<synchronous>, transform_indices = @transform_10, window_bounds = array<i64: 2, 6, 1, 10>}, {pipeline_mode = #tpu.pipeline_mode<synchronous>, transform_indices = @transform_11, window_bounds = array<i64: 2, 6, 10, 60>}, {pipeline_mode = #tpu.pipeline_mode<synchronous>, transform_indices = @transform_12, window_bounds = array<i64: 2, 1, 60>}, {pipeline_mode = #tpu.pipeline_mode<synchronous>, transform_indices = @transform_13, window_bounds = array<i64: 2, 1, 60>}, {pipeline_mode = #tpu.pipeline_mode<synchronous>, transform_indices = @transform_14, window_bounds = array<i64: 2, 1, 60>}, {pipeline_mode = #tpu.pipeline_mode<synchronous>, transform_indices = @transform_15, window_bounds = array<i64: 2, 60, 240>}, {pipeline_mode = #tpu.pipeline_mode<synchronous>, transform_indices = @transform_16, window_bounds = array<i64: 2, 1, 240>}, {pipeline_mode = #tpu.pipeline_mode<synchronous>, transform_indices = @transform_17, window_bounds = array<i64: 2, 240, 60>}, {pipeline_mode = #tpu.pipeline_mode<synchronous>, transform_indices = @transform_18, window_bounds = array<i64: 2, 1, 60>}, {pipeline_mode = #tpu.pipeline_mode<synchronous>, transform_indices = @transform_19, window_bounds = array<i64: 60, 128>}, {pipeline_mode = #tpu.pipeline_mode<synchronous>, transform_indices = @transform_20, window_bounds = array<i64: 1, 128>}, {transform_indices = @transform_21, window_bounds = array<i64: 1, 16, 128>}]} {
    %0 = tpu.iota {dimensions = array<i32: 0>} : vector<16x16xi32>
    %1 = tpu.iota {dimensions = array<i32: 1>} : vector<16x16xi32>
    %2 = arith.cmpi sle, %1, %0 : vector<16x16xi32>
    %cst = arith.constant 0.000000e+00 : f32
    %cst_0 = arith.constant -1.000000e+30 : f32
    %3 = vector.broadcast %cst : f32 to vector<16x16xf32>
    %4 = vector.broadcast %cst_0 : f32 to vector<16x16xf32>
    %5 = arith.select %2, %3, %4 : vector<16x16xi1>, vector<16x16xf32>
    %c0 = arith.constant 0 : index
    %c0_1 = arith.constant 0 : index
    %c0_2 = arith.constant 0 : index
    %6 = vector.load %arg1[%c0, %c0_1, %c0_2] : memref<1x16x1xi32, #tpu.memory_space<vmem>>, vector<1x16x1xi32>
    %7 = vector.shape_cast %6 : vector<1x16x1xi32> to vector<16x1xi32>
    %8 = tpu.iota {dimensions = array<i32: 1>} : vector<16x65xi32>
    %9 = vector.broadcast %7 : vector<16x1xi32> to vector<16x65xi32>
    %10 = arith.cmpi eq, %9, %8 : vector<16x65xi32>
    %11 = arith.extui %10 : vector<16x65xi1> to vector<16x65xi32>
    %12 = arith.sitofp %11 : vector<16x65xi32> to vector<16x65xf32>
    %13 = arith.truncf %12 : vector<16x65xf32> to vector<16x65xbf16>
    %c0_3 = arith.constant 0 : index
    %c0_4 = arith.constant 0 : index
    %14 = vector.load %arg2[%c0_3, %c0_4] : memref<65x60xbf16, #tpu.memory_space<vmem>>, vector<65x60xbf16>
    %cst_5 = arith.constant dense<0.000000e+00> : vector<16x60xf32>
    %15 = tpu.matmul %13, %14, %cst_5 {dimension_numbers = #tpu.dot_dimension_numbers<[1], [0], [0], [1], [0, 0, 1, 1], [], []>} : vector<16x65xbf16>, vector<65x60xbf16>, vector<16x60xf32> -> vector<16x60xf32>
    %c0_6 = arith.constant 0 : index
    %c0_7 = arith.constant 0 : index
    %16 = vector.load %arg3[%c0_6, %c0_7] : memref<16x60xf32, #tpu.memory_space<vmem>>, vector<16x60xf32>
    %17 = arith.addf %15, %16 : vector<16x60xf32>
    %c0_8 = arith.constant 0 : index
    %c0_9 = arith.constant 0 : index
    %c0_10 = arith.constant 0 : index
    %18 = vector.load %arg4[%c0_8, %c0_9, %c0_10] : memref<2x1x60xf32, #tpu.memory_space<vmem>>, vector<1x1x60xf32>
    %19 = vector.shape_cast %18 : vector<1x1x60xf32> to vector<1x60xf32>
    %c0_11 = arith.constant 0 : index
    %c0_12 = arith.constant 0 : index
    %c0_13 = arith.constant 0 : index
    %20 = vector.load %arg5[%c0_11, %c0_12, %c0_13] : memref<2x1x60xf32, #tpu.memory_space<vmem>>, vector<1x1x60xf32>
    %21 = vector.shape_cast %20 : vector<1x1x60xf32> to vector<1x60xf32>
    %cst_14 = arith.constant dense<0.000000e+00> : vector<16xf32>
    %22 = vector.multi_reduction <add>, %17, %cst_14 [1] : vector<16x60xf32> to vector<16xf32>
    %23 = vector.shape_cast %22 : vector<16xf32> to vector<16x1xf32>
    %cst_15 = arith.constant 6.000000e+01 : f32
    %24 = vector.broadcast %cst_15 : f32 to vector<16x1xf32>
    %25 = arith.divf %23, %24 : vector<16x1xf32>
    %26 = vector.broadcast %25 : vector<16x1xf32> to vector<16x60xf32>
    %27 = arith.subf %17, %26 : vector<16x60xf32>
    %28 = arith.mulf %27, %27 : vector<16x60xf32>
    %cst_16 = arith.constant dense<0.000000e+00> : vector<16xf32>
    %29 = vector.multi_reduction <add>, %28, %cst_16 [1] : vector<16x60xf32> to vector<16xf32>
    %30 = vector.shape_cast %29 : vector<16xf32> to vector<16x1xf32>
    %cst_17 = arith.constant 6.000000e+01 : f32
    %31 = vector.broadcast %cst_17 : f32 to vector<16x1xf32>
    %32 = arith.divf %30, %31 : vector<16x1xf32>
    %cst_18 = arith.constant 9.99999974E-6 : f32
    %33 = vector.broadcast %cst_18 : f32 to vector<16x1xf32>
    %34 = arith.addf %32, %33 : vector<16x1xf32>
    %35 = math.rsqrt %34 : vector<16x1xf32>
    %36 = vector.broadcast %35 : vector<16x1xf32> to vector<16x60xf32>
    %37 = arith.mulf %27, %36 : vector<16x60xf32>
    %38 = vector.broadcast %19 : vector<1x60xf32> to vector<16x60xf32>
    %39 = arith.mulf %37, %38 : vector<16x60xf32>
    %40 = vector.broadcast %21 : vector<1x60xf32> to vector<16x60xf32>
    %41 = arith.addf %39, %40 : vector<16x60xf32>
    %42 = arith.truncf %41 : vector<16x60xf32> to vector<16x60xbf16>
    %cst_19 = arith.constant 0.000000e+00 : f32
    %43 = vector.broadcast %cst_19 : f32 to vector<16x60xf32>
    %c0_20 = arith.constant 0 : index
    %c0_21 = arith.constant 0 : index
    %c0_22 = arith.constant 0 : index
    %c0_23 = arith.constant 0 : index
    %44 = vector.load %arg6[%c0_20, %c0_21, %c0_22, %c0_23] : memref<2x6x60x10xbf16, #tpu.memory_space<vmem>>, vector<1x1x60x10xbf16>
    %45 = vector.shape_cast %44 : vector<1x1x60x10xbf16> to vector<60x10xbf16>
    %cst_24 = arith.constant dense<0.000000e+00> : vector<16x10xf32>
    %46 = tpu.matmul %42, %45, %cst_24 {dimension_numbers = #tpu.dot_dimension_numbers<[1], [0], [0], [1], [0, 0, 1, 1], [], []>} : vector<16x60xbf16>, vector<60x10xbf16>, vector<16x10xf32> -> vector<16x10xf32>
    %c0_25 = arith.constant 0 : index
    %c0_26 = arith.constant 0 : index
    %c0_27 = arith.constant 0 : index
    %c0_28 = arith.constant 0 : index
    %47 = vector.load %arg7[%c0_25, %c0_26, %c0_27, %c0_28] : memref<2x6x1x10xf32, #tpu.memory_space<vmem>>, vector<1x1x1x10xf32>
    %48 = vector.shape_cast %47 : vector<1x1x1x10xf32> to vector<1x10xf32>
    %49 = vector.broadcast %48 : vector<1x10xf32> to vector<16x10xf32>
    %50 = arith.addf %46, %49 : vector<16x10xf32>
    %c0_29 = arith.constant 0 : index
    %c0_30 = arith.constant 0 : index
    %c0_31 = arith.constant 0 : index
    %c0_32 = arith.constant 0 : index
    %51 = vector.load %arg8[%c0_29, %c0_30, %c0_31, %c0_32] : memref<2x6x60x10xbf16, #tpu.memory_space<vmem>>, vector<1x1x60x10xbf16>
    %52 = vector.shape_cast %51 : vector<1x1x60x10xbf16> to vector<60x10xbf16>
    %cst_33 = arith.constant dense<0.000000e+00> : vector<16x10xf32>
    %53 = tpu.matmul %42, %52, %cst_33 {dimension_numbers = #tpu.dot_dimension_numbers<[1], [0], [0], [1], [0, 0, 1, 1], [], []>} : vector<16x60xbf16>, vector<60x10xbf16>, vector<16x10xf32> -> vector<16x10xf32>
    %c0_34 = arith.constant 0 : index
    %c0_35 = arith.constant 0 : index
    %c0_36 = arith.constant 0 : index
    %c0_37 = arith.constant 0 : index
    %54 = vector.load %arg9[%c0_34, %c0_35, %c0_36, %c0_37] : memref<2x6x1x10xf32, #tpu.memory_space<vmem>>, vector<1x1x1x10xf32>
    %55 = vector.shape_cast %54 : vector<1x1x1x10xf32> to vector<1x10xf32>
    %56 = vector.broadcast %55 : vector<1x10xf32> to vector<16x10xf32>
    %57 = arith.addf %53, %56 : vector<16x10xf32>
    %c0_38 = arith.constant 0 : index
    %c0_39 = arith.constant 0 : index
    %c0_40 = arith.constant 0 : index
    %c0_41 = arith.constant 0 : index
    %58 = vector.load %arg10[%c0_38, %c0_39, %c0_40, %c0_41] : memref<2x6x60x10xbf16, #tpu.memory_space<vmem>>, vector<1x1x60x10xbf16>
    %59 = vector.shape_cast %58 : vector<1x1x60x10xbf16> to vector<60x10xbf16>
    %cst_42 = arith.constant dense<0.000000e+00> : vector<16x10xf32>
    %60 = tpu.matmul %42, %59, %cst_42 {dimension_numbers = #tpu.dot_dimension_numbers<[1], [0], [0], [1], [0, 0, 1, 1], [], []>} : vector<16x60xbf16>, vector<60x10xbf16>, vector<16x10xf32> -> vector<16x10xf32>
    %c0_43 = arith.constant 0 : index
    %c0_44 = arith.constant 0 : index
    %c0_45 = arith.constant 0 : index
    %c0_46 = arith.constant 0 : index
    %61 = vector.load %arg11[%c0_43, %c0_44, %c0_45, %c0_46] : memref<2x6x1x10xf32, #tpu.memory_space<vmem>>, vector<1x1x1x10xf32>
    %62 = vector.shape_cast %61 : vector<1x1x1x10xf32> to vector<1x10xf32>
    %63 = vector.broadcast %62 : vector<1x10xf32> to vector<16x10xf32>
    %64 = arith.addf %60, %63 : vector<16x10xf32>
    %65 = arith.truncf %50 : vector<16x10xf32> to vector<16x10xbf16>
    %66 = arith.truncf %57 : vector<16x10xf32> to vector<16x10xbf16>
    %cst_47 = arith.constant dense<0.000000e+00> : vector<16x16xf32>
    %67 = tpu.matmul %65, %66, %cst_47 {dimension_numbers = #tpu.dot_dimension_numbers<[1], [1], [0], [0], [0, 0, 1, 0], [], []>} : vector<16x10xbf16>, vector<16x10xbf16>, vector<16x16xf32> -> vector<16x16xf32>
    %68 = arith.addf %67, %5 : vector<16x16xf32>
    %cst_48 = arith.constant dense<0xFF800000> : vector<16xf32>
    %69 = vector.multi_reduction <maximumf>, %68, %cst_48 [1] : vector<16x16xf32> to vector<16xf32>
    %70 = vector.shape_cast %69 : vector<16xf32> to vector<16x1xf32>
    %71 = vector.broadcast %70 : vector<16x1xf32> to vector<16x16xf32>
    %72 = arith.subf %68, %71 : vector<16x16xf32>
    %73 = math.exp %72 : vector<16x16xf32>
    %cst_49 = arith.constant dense<0.000000e+00> : vector<16xf32>
    %74 = vector.multi_reduction <add>, %73, %cst_49 [1] : vector<16x16xf32> to vector<16xf32>
    %75 = vector.shape_cast %74 : vector<16xf32> to vector<16x1xf32>
    %76 = tpu.reciprocal %75 {approx = true} : vector<16x1xf32> -> vector<16x1xf32>
    %77 = vector.broadcast %76 : vector<16x1xf32> to vector<16x16xf32>
    %78 = arith.mulf %73, %77 : vector<16x16xf32>
    %79 = arith.truncf %78 : vector<16x16xf32> to vector<16x16xbf16>
    %80 = arith.truncf %64 : vector<16x10xf32> to vector<16x10xbf16>
    %cst_50 = arith.constant dense<0.000000e+00> : vector<16x10xf32>
    %81 = tpu.matmul %79, %80, %cst_50 {dimension_numbers = #tpu.dot_dimension_numbers<[1], [0], [0], [1], [0, 0, 1, 1], [], []>} : vector<16x16xbf16>, vector<16x10xbf16>, vector<16x10xf32> -> vector<16x10xf32>
    %82 = arith.truncf %81 : vector<16x10xf32> to vector<16x10xbf16>
    %c0_51 = arith.constant 0 : index
    %c0_52 = arith.constant 0 : index
    %c0_53 = arith.constant 0 : index
    %c0_54 = arith.constant 0 : index
    %83 = vector.load %arg12[%c0_51, %c0_52, %c0_53, %c0_54] : memref<2x6x10x60xbf16, #tpu.memory_space<vmem>>, vector<1x1x10x60xbf16>
    %84 = vector.shape_cast %83 : vector<1x1x10x60xbf16> to vector<10x60xbf16>
    %cst_55 = arith.constant dense<0.000000e+00> : vector<16x60xf32>
    %85 = tpu.matmul %82, %84, %cst_55 {dimension_numbers = #tpu.dot_dimension_numbers<[1], [0], [0], [1], [0, 0, 1, 1], [], []>} : vector<16x10xbf16>, vector<10x60xbf16>, vector<16x60xf32> -> vector<16x60xf32>
    %86 = arith.addf %43, %85 : vector<16x60xf32>
    %c0_56 = arith.constant 0 : index
    %c1 = arith.constant 1 : index
    %c0_57 = arith.constant 0 : index
    %c0_58 = arith.constant 0 : index
    %87 = vector.load %arg6[%c0_56, %c1, %c0_57, %c0_58] : memref<2x6x60x10xbf16, #tpu.memory_space<vmem>>, vector<1x1x60x10xbf16>
    %88 = vector.shape_cast %87 : vector<1x1x60x10xbf16> to vector<60x10xbf16>
    %cst_59 = arith.constant dense<0.000000e+00> : vector<16x10xf32>
    %89 = tpu.matmul %42, %88, %cst_59 {dimension_numbers = #tpu.dot_dimension_numbers<[1], [0], [0], [1], [0, 0, 1, 1], [], []>} : vector<16x60xbf16>, vector<60x10xbf16>, vector<16x10xf32> -> vector<16x10xf32>
    %c0_60 = arith.constant 0 : index
    %c1_61 = arith.constant 1 : index
    %c0_62 = arith.constant 0 : index
    %c0_63 = arith.constant 0 : index
    %90 = vector.load %arg7[%c0_60, %c1_61, %c0_62, %c0_63] : memref<2x6x1x10xf32, #tpu.memory_space<vmem>>, vector<1x1x1x10xf32>
    %91 = vector.shape_cast %90 : vector<1x1x1x10xf32> to vector<1x10xf32>
    %92 = vector.broadcast %91 : vector<1x10xf32> to vector<16x10xf32>
    %93 = arith.addf %89, %92 : vector<16x10xf32>
    %c0_64 = arith.constant 0 : index
    %c1_65 = arith.constant 1 : index
    %c0_66 = arith.constant 0 : index
    %c0_67 = arith.constant 0 : index
    %94 = vector.load %arg8[%c0_64, %c1_65, %c0_66, %c0_67] : memref<2x6x60x10xbf16, #tpu.memory_space<vmem>>, vector<1x1x60x10xbf16>
    %95 = vector.shape_cast %94 : vector<1x1x60x10xbf16> to vector<60x10xbf16>
    %cst_68 = arith.constant dense<0.000000e+00> : vector<16x10xf32>
    %96 = tpu.matmul %42, %95, %cst_68 {dimension_numbers = #tpu.dot_dimension_numbers<[1], [0], [0], [1], [0, 0, 1, 1], [], []>} : vector<16x60xbf16>, vector<60x10xbf16>, vector<16x10xf32> -> vector<16x10xf32>
    %c0_69 = arith.constant 0 : index
    %c1_70 = arith.constant 1 : index
    %c0_71 = arith.constant 0 : index
    %c0_72 = arith.constant 0 : index
    %97 = vector.load %arg9[%c0_69, %c1_70, %c0_71, %c0_72] : memref<2x6x1x10xf32, #tpu.memory_space<vmem>>, vector<1x1x1x10xf32>
    %98 = vector.shape_cast %97 : vector<1x1x1x10xf32> to vector<1x10xf32>
    %99 = vector.broadcast %98 : vector<1x10xf32> to vector<16x10xf32>
    %100 = arith.addf %96, %99 : vector<16x10xf32>
    %c0_73 = arith.constant 0 : index
    %c1_74 = arith.constant 1 : index
    %c0_75 = arith.constant 0 : index
    %c0_76 = arith.constant 0 : index
    %101 = vector.load %arg10[%c0_73, %c1_74, %c0_75, %c0_76] : memref<2x6x60x10xbf16, #tpu.memory_space<vmem>>, vector<1x1x60x10xbf16>
    %102 = vector.shape_cast %101 : vector<1x1x60x10xbf16> to vector<60x10xbf16>
    %cst_77 = arith.constant dense<0.000000e+00> : vector<16x10xf32>
    %103 = tpu.matmul %42, %102, %cst_77 {dimension_numbers = #tpu.dot_dimension_numbers<[1], [0], [0], [1], [0, 0, 1, 1], [], []>} : vector<16x60xbf16>, vector<60x10xbf16>, vector<16x10xf32> -> vector<16x10xf32>
    %c0_78 = arith.constant 0 : index
    %c1_79 = arith.constant 1 : index
    %c0_80 = arith.constant 0 : index
    %c0_81 = arith.constant 0 : index
    %104 = vector.load %arg11[%c0_78, %c1_79, %c0_80, %c0_81] : memref<2x6x1x10xf32, #tpu.memory_space<vmem>>, vector<1x1x1x10xf32>
    %105 = vector.shape_cast %104 : vector<1x1x1x10xf32> to vector<1x10xf32>
    %106 = vector.broadcast %105 : vector<1x10xf32> to vector<16x10xf32>
    %107 = arith.addf %103, %106 : vector<16x10xf32>
    %108 = arith.truncf %93 : vector<16x10xf32> to vector<16x10xbf16>
    %109 = arith.truncf %100 : vector<16x10xf32> to vector<16x10xbf16>
    %cst_82 = arith.constant dense<0.000000e+00> : vector<16x16xf32>
    %110 = tpu.matmul %108, %109, %cst_82 {dimension_numbers = #tpu.dot_dimension_numbers<[1], [1], [0], [0], [0, 0, 1, 0], [], []>} : vector<16x10xbf16>, vector<16x10xbf16>, vector<16x16xf32> -> vector<16x16xf32>
    %111 = arith.addf %110, %5 : vector<16x16xf32>
    %cst_83 = arith.constant dense<0xFF800000> : vector<16xf32>
    %112 = vector.multi_reduction <maximumf>, %111, %cst_83 [1] : vector<16x16xf32> to vector<16xf32>
    %113 = vector.shape_cast %112 : vector<16xf32> to vector<16x1xf32>
    %114 = vector.broadcast %113 : vector<16x1xf32> to vector<16x16xf32>
    %115 = arith.subf %111, %114 : vector<16x16xf32>
    %116 = math.exp %115 : vector<16x16xf32>
    %cst_84 = arith.constant dense<0.000000e+00> : vector<16xf32>
    %117 = vector.multi_reduction <add>, %116, %cst_84 [1] : vector<16x16xf32> to vector<16xf32>
    %118 = vector.shape_cast %117 : vector<16xf32> to vector<16x1xf32>
    %119 = tpu.reciprocal %118 {approx = true} : vector<16x1xf32> -> vector<16x1xf32>
    %120 = vector.broadcast %119 : vector<16x1xf32> to vector<16x16xf32>
    %121 = arith.mulf %116, %120 : vector<16x16xf32>
    %122 = arith.truncf %121 : vector<16x16xf32> to vector<16x16xbf16>
    %123 = arith.truncf %107 : vector<16x10xf32> to vector<16x10xbf16>
    %cst_85 = arith.constant dense<0.000000e+00> : vector<16x10xf32>
    %124 = tpu.matmul %122, %123, %cst_85 {dimension_numbers = #tpu.dot_dimension_numbers<[1], [0], [0], [1], [0, 0, 1, 1], [], []>} : vector<16x16xbf16>, vector<16x10xbf16>, vector<16x10xf32> -> vector<16x10xf32>
    %125 = arith.truncf %124 : vector<16x10xf32> to vector<16x10xbf16>
    %c0_86 = arith.constant 0 : index
    %c1_87 = arith.constant 1 : index
    %c0_88 = arith.constant 0 : index
    %c0_89 = arith.constant 0 : index
    %126 = vector.load %arg12[%c0_86, %c1_87, %c0_88, %c0_89] : memref<2x6x10x60xbf16, #tpu.memory_space<vmem>>, vector<1x1x10x60xbf16>
    %127 = vector.shape_cast %126 : vector<1x1x10x60xbf16> to vector<10x60xbf16>
    %cst_90 = arith.constant dense<0.000000e+00> : vector<16x60xf32>
    %128 = tpu.matmul %125, %127, %cst_90 {dimension_numbers = #tpu.dot_dimension_numbers<[1], [0], [0], [1], [0, 0, 1, 1], [], []>} : vector<16x10xbf16>, vector<10x60xbf16>, vector<16x60xf32> -> vector<16x60xf32>
    %129 = arith.addf %86, %128 : vector<16x60xf32>
    %c0_91 = arith.constant 0 : index
    %c2 = arith.constant 2 : index
    %c0_92 = arith.constant 0 : index
    %c0_93 = arith.constant 0 : index
    %130 = vector.load %arg6[%c0_91, %c2, %c0_92, %c0_93] : memref<2x6x60x10xbf16, #tpu.memory_space<vmem>>, vector<1x1x60x10xbf16>
    %131 = vector.shape_cast %130 : vector<1x1x60x10xbf16> to vector<60x10xbf16>
    %cst_94 = arith.constant dense<0.000000e+00> : vector<16x10xf32>
    %132 = tpu.matmul %42, %131, %cst_94 {dimension_numbers = #tpu.dot_dimension_numbers<[1], [0], [0], [1], [0, 0, 1, 1], [], []>} : vector<16x60xbf16>, vector<60x10xbf16>, vector<16x10xf32> -> vector<16x10xf32>
    %c0_95 = arith.constant 0 : index
    %c2_96 = arith.constant 2 : index
    %c0_97 = arith.constant 0 : index
    %c0_98 = arith.constant 0 : index
    %133 = vector.load %arg7[%c0_95, %c2_96, %c0_97, %c0_98] : memref<2x6x1x10xf32, #tpu.memory_space<vmem>>, vector<1x1x1x10xf32>
    %134 = vector.shape_cast %133 : vector<1x1x1x10xf32> to vector<1x10xf32>
    %135 = vector.broadcast %134 : vector<1x10xf32> to vector<16x10xf32>
    %136 = arith.addf %132, %135 : vector<16x10xf32>
    %c0_99 = arith.constant 0 : index
    %c2_100 = arith.constant 2 : index
    %c0_101 = arith.constant 0 : index
    %c0_102 = arith.constant 0 : index
    %137 = vector.load %arg8[%c0_99, %c2_100, %c0_101, %c0_102] : memref<2x6x60x10xbf16, #tpu.memory_space<vmem>>, vector<1x1x60x10xbf16>
    %138 = vector.shape_cast %137 : vector<1x1x60x10xbf16> to vector<60x10xbf16>
    %cst_103 = arith.constant dense<0.000000e+00> : vector<16x10xf32>
    %139 = tpu.matmul %42, %138, %cst_103 {dimension_numbers = #tpu.dot_dimension_numbers<[1], [0], [0], [1], [0, 0, 1, 1], [], []>} : vector<16x60xbf16>, vector<60x10xbf16>, vector<16x10xf32> -> vector<16x10xf32>
    %c0_104 = arith.constant 0 : index
    %c2_105 = arith.constant 2 : index
    %c0_106 = arith.constant 0 : index
    %c0_107 = arith.constant 0 : index
    %140 = vector.load %arg9[%c0_104, %c2_105, %c0_106, %c0_107] : memref<2x6x1x10xf32, #tpu.memory_space<vmem>>, vector<1x1x1x10xf32>
    %141 = vector.shape_cast %140 : vector<1x1x1x10xf32> to vector<1x10xf32>
    %142 = vector.broadcast %141 : vector<1x10xf32> to vector<16x10xf32>
    %143 = arith.addf %139, %142 : vector<16x10xf32>
    %c0_108 = arith.constant 0 : index
    %c2_109 = arith.constant 2 : index
    %c0_110 = arith.constant 0 : index
    %c0_111 = arith.constant 0 : index
    %144 = vector.load %arg10[%c0_108, %c2_109, %c0_110, %c0_111] : memref<2x6x60x10xbf16, #tpu.memory_space<vmem>>, vector<1x1x60x10xbf16>
    %145 = vector.shape_cast %144 : vector<1x1x60x10xbf16> to vector<60x10xbf16>
    %cst_112 = arith.constant dense<0.000000e+00> : vector<16x10xf32>
    %146 = tpu.matmul %42, %145, %cst_112 {dimension_numbers = #tpu.dot_dimension_numbers<[1], [0], [0], [1], [0, 0, 1, 1], [], []>} : vector<16x60xbf16>, vector<60x10xbf16>, vector<16x10xf32> -> vector<16x10xf32>
    %c0_113 = arith.constant 0 : index
    %c2_114 = arith.constant 2 : index
    %c0_115 = arith.constant 0 : index
    %c0_116 = arith.constant 0 : index
    %147 = vector.load %arg11[%c0_113, %c2_114, %c0_115, %c0_116] : memref<2x6x1x10xf32, #tpu.memory_space<vmem>>, vector<1x1x1x10xf32>
    %148 = vector.shape_cast %147 : vector<1x1x1x10xf32> to vector<1x10xf32>
    %149 = vector.broadcast %148 : vector<1x10xf32> to vector<16x10xf32>
    %150 = arith.addf %146, %149 : vector<16x10xf32>
    %151 = arith.truncf %136 : vector<16x10xf32> to vector<16x10xbf16>
    %152 = arith.truncf %143 : vector<16x10xf32> to vector<16x10xbf16>
    %cst_117 = arith.constant dense<0.000000e+00> : vector<16x16xf32>
    %153 = tpu.matmul %151, %152, %cst_117 {dimension_numbers = #tpu.dot_dimension_numbers<[1], [1], [0], [0], [0, 0, 1, 0], [], []>} : vector<16x10xbf16>, vector<16x10xbf16>, vector<16x16xf32> -> vector<16x16xf32>
    %154 = arith.addf %153, %5 : vector<16x16xf32>
    %cst_118 = arith.constant dense<0xFF800000> : vector<16xf32>
    %155 = vector.multi_reduction <maximumf>, %154, %cst_118 [1] : vector<16x16xf32> to vector<16xf32>
    %156 = vector.shape_cast %155 : vector<16xf32> to vector<16x1xf32>
    %157 = vector.broadcast %156 : vector<16x1xf32> to vector<16x16xf32>
    %158 = arith.subf %154, %157 : vector<16x16xf32>
    %159 = math.exp %158 : vector<16x16xf32>
    %cst_119 = arith.constant dense<0.000000e+00> : vector<16xf32>
    %160 = vector.multi_reduction <add>, %159, %cst_119 [1] : vector<16x16xf32> to vector<16xf32>
    %161 = vector.shape_cast %160 : vector<16xf32> to vector<16x1xf32>
    %162 = tpu.reciprocal %161 {approx = true} : vector<16x1xf32> -> vector<16x1xf32>
    %163 = vector.broadcast %162 : vector<16x1xf32> to vector<16x16xf32>
    %164 = arith.mulf %159, %163 : vector<16x16xf32>
    %165 = arith.truncf %164 : vector<16x16xf32> to vector<16x16xbf16>
    %166 = arith.truncf %150 : vector<16x10xf32> to vector<16x10xbf16>
    %cst_120 = arith.constant dense<0.000000e+00> : vector<16x10xf32>
    %167 = tpu.matmul %165, %166, %cst_120 {dimension_numbers = #tpu.dot_dimension_numbers<[1], [0], [0], [1], [0, 0, 1, 1], [], []>} : vector<16x16xbf16>, vector<16x10xbf16>, vector<16x10xf32> -> vector<16x10xf32>
    %168 = arith.truncf %167 : vector<16x10xf32> to vector<16x10xbf16>
    %c0_121 = arith.constant 0 : index
    %c2_122 = arith.constant 2 : index
    %c0_123 = arith.constant 0 : index
    %c0_124 = arith.constant 0 : index
    %169 = vector.load %arg12[%c0_121, %c2_122, %c0_123, %c0_124] : memref<2x6x10x60xbf16, #tpu.memory_space<vmem>>, vector<1x1x10x60xbf16>
    %170 = vector.shape_cast %169 : vector<1x1x10x60xbf16> to vector<10x60xbf16>
    %cst_125 = arith.constant dense<0.000000e+00> : vector<16x60xf32>
    %171 = tpu.matmul %168, %170, %cst_125 {dimension_numbers = #tpu.dot_dimension_numbers<[1], [0], [0], [1], [0, 0, 1, 1], [], []>} : vector<16x10xbf16>, vector<10x60xbf16>, vector<16x60xf32> -> vector<16x60xf32>
    %172 = arith.addf %129, %171 : vector<16x60xf32>
    %c0_126 = arith.constant 0 : index
    %c3 = arith.constant 3 : index
    %c0_127 = arith.constant 0 : index
    %c0_128 = arith.constant 0 : index
    %173 = vector.load %arg6[%c0_126, %c3, %c0_127, %c0_128] : memref<2x6x60x10xbf16, #tpu.memory_space<vmem>>, vector<1x1x60x10xbf16>
    %174 = vector.shape_cast %173 : vector<1x1x60x10xbf16> to vector<60x10xbf16>
    %cst_129 = arith.constant dense<0.000000e+00> : vector<16x10xf32>
    %175 = tpu.matmul %42, %174, %cst_129 {dimension_numbers = #tpu.dot_dimension_numbers<[1], [0], [0], [1], [0, 0, 1, 1], [], []>} : vector<16x60xbf16>, vector<60x10xbf16>, vector<16x10xf32> -> vector<16x10xf32>
    %c0_130 = arith.constant 0 : index
    %c3_131 = arith.constant 3 : index
    %c0_132 = arith.constant 0 : index
    %c0_133 = arith.constant 0 : index
    %176 = vector.load %arg7[%c0_130, %c3_131, %c0_132, %c0_133] : memref<2x6x1x10xf32, #tpu.memory_space<vmem>>, vector<1x1x1x10xf32>
    %177 = vector.shape_cast %176 : vector<1x1x1x10xf32> to vector<1x10xf32>
    %178 = vector.broadcast %177 : vector<1x10xf32> to vector<16x10xf32>
    %179 = arith.addf %175, %178 : vector<16x10xf32>
    %c0_134 = arith.constant 0 : index
    %c3_135 = arith.constant 3 : index
    %c0_136 = arith.constant 0 : index
    %c0_137 = arith.constant 0 : index
    %180 = vector.load %arg8[%c0_134, %c3_135, %c0_136, %c0_137] : memref<2x6x60x10xbf16, #tpu.memory_space<vmem>>, vector<1x1x60x10xbf16>
    %181 = vector.shape_cast %180 : vector<1x1x60x10xbf16> to vector<60x10xbf16>
    %cst_138 = arith.constant dense<0.000000e+00> : vector<16x10xf32>
    %182 = tpu.matmul %42, %181, %cst_138 {dimension_numbers = #tpu.dot_dimension_numbers<[1], [0], [0], [1], [0, 0, 1, 1], [], []>} : vector<16x60xbf16>, vector<60x10xbf16>, vector<16x10xf32> -> vector<16x10xf32>
    %c0_139 = arith.constant 0 : index
    %c3_140 = arith.constant 3 : index
    %c0_141 = arith.constant 0 : index
    %c0_142 = arith.constant 0 : index
    %183 = vector.load %arg9[%c0_139, %c3_140, %c0_141, %c0_142] : memref<2x6x1x10xf32, #tpu.memory_space<vmem>>, vector<1x1x1x10xf32>
    %184 = vector.shape_cast %183 : vector<1x1x1x10xf32> to vector<1x10xf32>
    %185 = vector.broadcast %184 : vector<1x10xf32> to vector<16x10xf32>
    %186 = arith.addf %182, %185 : vector<16x10xf32>
    %c0_143 = arith.constant 0 : index
    %c3_144 = arith.constant 3 : index
    %c0_145 = arith.constant 0 : index
    %c0_146 = arith.constant 0 : index
    %187 = vector.load %arg10[%c0_143, %c3_144, %c0_145, %c0_146] : memref<2x6x60x10xbf16, #tpu.memory_space<vmem>>, vector<1x1x60x10xbf16>
    %188 = vector.shape_cast %187 : vector<1x1x60x10xbf16> to vector<60x10xbf16>
    %cst_147 = arith.constant dense<0.000000e+00> : vector<16x10xf32>
    %189 = tpu.matmul %42, %188, %cst_147 {dimension_numbers = #tpu.dot_dimension_numbers<[1], [0], [0], [1], [0, 0, 1, 1], [], []>} : vector<16x60xbf16>, vector<60x10xbf16>, vector<16x10xf32> -> vector<16x10xf32>
    %c0_148 = arith.constant 0 : index
    %c3_149 = arith.constant 3 : index
    %c0_150 = arith.constant 0 : index
    %c0_151 = arith.constant 0 : index
    %190 = vector.load %arg11[%c0_148, %c3_149, %c0_150, %c0_151] : memref<2x6x1x10xf32, #tpu.memory_space<vmem>>, vector<1x1x1x10xf32>
    %191 = vector.shape_cast %190 : vector<1x1x1x10xf32> to vector<1x10xf32>
    %192 = vector.broadcast %191 : vector<1x10xf32> to vector<16x10xf32>
    %193 = arith.addf %189, %192 : vector<16x10xf32>
    %194 = arith.truncf %179 : vector<16x10xf32> to vector<16x10xbf16>
    %195 = arith.truncf %186 : vector<16x10xf32> to vector<16x10xbf16>
    %cst_152 = arith.constant dense<0.000000e+00> : vector<16x16xf32>
    %196 = tpu.matmul %194, %195, %cst_152 {dimension_numbers = #tpu.dot_dimension_numbers<[1], [1], [0], [0], [0, 0, 1, 0], [], []>} : vector<16x10xbf16>, vector<16x10xbf16>, vector<16x16xf32> -> vector<16x16xf32>
    %197 = arith.addf %196, %5 : vector<16x16xf32>
    %cst_153 = arith.constant dense<0xFF800000> : vector<16xf32>
    %198 = vector.multi_reduction <maximumf>, %197, %cst_153 [1] : vector<16x16xf32> to vector<16xf32>
    %199 = vector.shape_cast %198 : vector<16xf32> to vector<16x1xf32>
    %200 = vector.broadcast %199 : vector<16x1xf32> to vector<16x16xf32>
    %201 = arith.subf %197, %200 : vector<16x16xf32>
    %202 = math.exp %201 : vector<16x16xf32>
    %cst_154 = arith.constant dense<0.000000e+00> : vector<16xf32>
    %203 = vector.multi_reduction <add>, %202, %cst_154 [1] : vector<16x16xf32> to vector<16xf32>
    %204 = vector.shape_cast %203 : vector<16xf32> to vector<16x1xf32>
    %205 = tpu.reciprocal %204 {approx = true} : vector<16x1xf32> -> vector<16x1xf32>
    %206 = vector.broadcast %205 : vector<16x1xf32> to vector<16x16xf32>
    %207 = arith.mulf %202, %206 : vector<16x16xf32>
    %208 = arith.truncf %207 : vector<16x16xf32> to vector<16x16xbf16>
    %209 = arith.truncf %193 : vector<16x10xf32> to vector<16x10xbf16>
    %cst_155 = arith.constant dense<0.000000e+00> : vector<16x10xf32>
    %210 = tpu.matmul %208, %209, %cst_155 {dimension_numbers = #tpu.dot_dimension_numbers<[1], [0], [0], [1], [0, 0, 1, 1], [], []>} : vector<16x16xbf16>, vector<16x10xbf16>, vector<16x10xf32> -> vector<16x10xf32>
    %211 = arith.truncf %210 : vector<16x10xf32> to vector<16x10xbf16>
    %c0_156 = arith.constant 0 : index
    %c3_157 = arith.constant 3 : index
    %c0_158 = arith.constant 0 : index
    %c0_159 = arith.constant 0 : index
    %212 = vector.load %arg12[%c0_156, %c3_157, %c0_158, %c0_159] : memref<2x6x10x60xbf16, #tpu.memory_space<vmem>>, vector<1x1x10x60xbf16>
    %213 = vector.shape_cast %212 : vector<1x1x10x60xbf16> to vector<10x60xbf16>
    %cst_160 = arith.constant dense<0.000000e+00> : vector<16x60xf32>
    %214 = tpu.matmul %211, %213, %cst_160 {dimension_numbers = #tpu.dot_dimension_numbers<[1], [0], [0], [1], [0, 0, 1, 1], [], []>} : vector<16x10xbf16>, vector<10x60xbf16>, vector<16x60xf32> -> vector<16x60xf32>
    %215 = arith.addf %172, %214 : vector<16x60xf32>
    %c0_161 = arith.constant 0 : index
    %c4 = arith.constant 4 : index
    %c0_162 = arith.constant 0 : index
    %c0_163 = arith.constant 0 : index
    %216 = vector.load %arg6[%c0_161, %c4, %c0_162, %c0_163] : memref<2x6x60x10xbf16, #tpu.memory_space<vmem>>, vector<1x1x60x10xbf16>
    %217 = vector.shape_cast %216 : vector<1x1x60x10xbf16> to vector<60x10xbf16>
    %cst_164 = arith.constant dense<0.000000e+00> : vector<16x10xf32>
    %218 = tpu.matmul %42, %217, %cst_164 {dimension_numbers = #tpu.dot_dimension_numbers<[1], [0], [0], [1], [0, 0, 1, 1], [], []>} : vector<16x60xbf16>, vector<60x10xbf16>, vector<16x10xf32> -> vector<16x10xf32>
    %c0_165 = arith.constant 0 : index
    %c4_166 = arith.constant 4 : index
    %c0_167 = arith.constant 0 : index
    %c0_168 = arith.constant 0 : index
    %219 = vector.load %arg7[%c0_165, %c4_166, %c0_167, %c0_168] : memref<2x6x1x10xf32, #tpu.memory_space<vmem>>, vector<1x1x1x10xf32>
    %220 = vector.shape_cast %219 : vector<1x1x1x10xf32> to vector<1x10xf32>
    %221 = vector.broadcast %220 : vector<1x10xf32> to vector<16x10xf32>
    %222 = arith.addf %218, %221 : vector<16x10xf32>
    %c0_169 = arith.constant 0 : index
    %c4_170 = arith.constant 4 : index
    %c0_171 = arith.constant 0 : index
    %c0_172 = arith.constant 0 : index
    %223 = vector.load %arg8[%c0_169, %c4_170, %c0_171, %c0_172] : memref<2x6x60x10xbf16, #tpu.memory_space<vmem>>, vector<1x1x60x10xbf16>
    %224 = vector.shape_cast %223 : vector<1x1x60x10xbf16> to vector<60x10xbf16>
    %cst_173 = arith.constant dense<0.000000e+00> : vector<16x10xf32>
    %225 = tpu.matmul %42, %224, %cst_173 {dimension_numbers = #tpu.dot_dimension_numbers<[1], [0], [0], [1], [0, 0, 1, 1], [], []>} : vector<16x60xbf16>, vector<60x10xbf16>, vector<16x10xf32> -> vector<16x10xf32>
    %c0_174 = arith.constant 0 : index
    %c4_175 = arith.constant 4 : index
    %c0_176 = arith.constant 0 : index
    %c0_177 = arith.constant 0 : index
    %226 = vector.load %arg9[%c0_174, %c4_175, %c0_176, %c0_177] : memref<2x6x1x10xf32, #tpu.memory_space<vmem>>, vector<1x1x1x10xf32>
    %227 = vector.shape_cast %226 : vector<1x1x1x10xf32> to vector<1x10xf32>
    %228 = vector.broadcast %227 : vector<1x10xf32> to vector<16x10xf32>
    %229 = arith.addf %225, %228 : vector<16x10xf32>
    %c0_178 = arith.constant 0 : index
    %c4_179 = arith.constant 4 : index
    %c0_180 = arith.constant 0 : index
    %c0_181 = arith.constant 0 : index
    %230 = vector.load %arg10[%c0_178, %c4_179, %c0_180, %c0_181] : memref<2x6x60x10xbf16, #tpu.memory_space<vmem>>, vector<1x1x60x10xbf16>
    %231 = vector.shape_cast %230 : vector<1x1x60x10xbf16> to vector<60x10xbf16>
    %cst_182 = arith.constant dense<0.000000e+00> : vector<16x10xf32>
    %232 = tpu.matmul %42, %231, %cst_182 {dimension_numbers = #tpu.dot_dimension_numbers<[1], [0], [0], [1], [0, 0, 1, 1], [], []>} : vector<16x60xbf16>, vector<60x10xbf16>, vector<16x10xf32> -> vector<16x10xf32>
    %c0_183 = arith.constant 0 : index
    %c4_184 = arith.constant 4 : index
    %c0_185 = arith.constant 0 : index
    %c0_186 = arith.constant 0 : index
    %233 = vector.load %arg11[%c0_183, %c4_184, %c0_185, %c0_186] : memref<2x6x1x10xf32, #tpu.memory_space<vmem>>, vector<1x1x1x10xf32>
    %234 = vector.shape_cast %233 : vector<1x1x1x10xf32> to vector<1x10xf32>
    %235 = vector.broadcast %234 : vector<1x10xf32> to vector<16x10xf32>
    %236 = arith.addf %232, %235 : vector<16x10xf32>
    %237 = arith.truncf %222 : vector<16x10xf32> to vector<16x10xbf16>
    %238 = arith.truncf %229 : vector<16x10xf32> to vector<16x10xbf16>
    %cst_187 = arith.constant dense<0.000000e+00> : vector<16x16xf32>
    %239 = tpu.matmul %237, %238, %cst_187 {dimension_numbers = #tpu.dot_dimension_numbers<[1], [1], [0], [0], [0, 0, 1, 0], [], []>} : vector<16x10xbf16>, vector<16x10xbf16>, vector<16x16xf32> -> vector<16x16xf32>
    %240 = arith.addf %239, %5 : vector<16x16xf32>
    %cst_188 = arith.constant dense<0xFF800000> : vector<16xf32>
    %241 = vector.multi_reduction <maximumf>, %240, %cst_188 [1] : vector<16x16xf32> to vector<16xf32>
    %242 = vector.shape_cast %241 : vector<16xf32> to vector<16x1xf32>
    %243 = vector.broadcast %242 : vector<16x1xf32> to vector<16x16xf32>
    %244 = arith.subf %240, %243 : vector<16x16xf32>
    %245 = math.exp %244 : vector<16x16xf32>
    %cst_189 = arith.constant dense<0.000000e+00> : vector<16xf32>
    %246 = vector.multi_reduction <add>, %245, %cst_189 [1] : vector<16x16xf32> to vector<16xf32>
    %247 = vector.shape_cast %246 : vector<16xf32> to vector<16x1xf32>
    %248 = tpu.reciprocal %247 {approx = true} : vector<16x1xf32> -> vector<16x1xf32>
    %249 = vector.broadcast %248 : vector<16x1xf32> to vector<16x16xf32>
    %250 = arith.mulf %245, %249 : vector<16x16xf32>
    %251 = arith.truncf %250 : vector<16x16xf32> to vector<16x16xbf16>
    %252 = arith.truncf %236 : vector<16x10xf32> to vector<16x10xbf16>
    %cst_190 = arith.constant dense<0.000000e+00> : vector<16x10xf32>
    %253 = tpu.matmul %251, %252, %cst_190 {dimension_numbers = #tpu.dot_dimension_numbers<[1], [0], [0], [1], [0, 0, 1, 1], [], []>} : vector<16x16xbf16>, vector<16x10xbf16>, vector<16x10xf32> -> vector<16x10xf32>
    %254 = arith.truncf %253 : vector<16x10xf32> to vector<16x10xbf16>
    %c0_191 = arith.constant 0 : index
    %c4_192 = arith.constant 4 : index
    %c0_193 = arith.constant 0 : index
    %c0_194 = arith.constant 0 : index
    %255 = vector.load %arg12[%c0_191, %c4_192, %c0_193, %c0_194] : memref<2x6x10x60xbf16, #tpu.memory_space<vmem>>, vector<1x1x10x60xbf16>
    %256 = vector.shape_cast %255 : vector<1x1x10x60xbf16> to vector<10x60xbf16>
    %cst_195 = arith.constant dense<0.000000e+00> : vector<16x60xf32>
    %257 = tpu.matmul %254, %256, %cst_195 {dimension_numbers = #tpu.dot_dimension_numbers<[1], [0], [0], [1], [0, 0, 1, 1], [], []>} : vector<16x10xbf16>, vector<10x60xbf16>, vector<16x60xf32> -> vector<16x60xf32>
    %258 = arith.addf %215, %257 : vector<16x60xf32>
    %c0_196 = arith.constant 0 : index
    %c5 = arith.constant 5 : index
    %c0_197 = arith.constant 0 : index
    %c0_198 = arith.constant 0 : index
    %259 = vector.load %arg6[%c0_196, %c5, %c0_197, %c0_198] : memref<2x6x60x10xbf16, #tpu.memory_space<vmem>>, vector<1x1x60x10xbf16>
    %260 = vector.shape_cast %259 : vector<1x1x60x10xbf16> to vector<60x10xbf16>
    %cst_199 = arith.constant dense<0.000000e+00> : vector<16x10xf32>
    %261 = tpu.matmul %42, %260, %cst_199 {dimension_numbers = #tpu.dot_dimension_numbers<[1], [0], [0], [1], [0, 0, 1, 1], [], []>} : vector<16x60xbf16>, vector<60x10xbf16>, vector<16x10xf32> -> vector<16x10xf32>
    %c0_200 = arith.constant 0 : index
    %c5_201 = arith.constant 5 : index
    %c0_202 = arith.constant 0 : index
    %c0_203 = arith.constant 0 : index
    %262 = vector.load %arg7[%c0_200, %c5_201, %c0_202, %c0_203] : memref<2x6x1x10xf32, #tpu.memory_space<vmem>>, vector<1x1x1x10xf32>
    %263 = vector.shape_cast %262 : vector<1x1x1x10xf32> to vector<1x10xf32>
    %264 = vector.broadcast %263 : vector<1x10xf32> to vector<16x10xf32>
    %265 = arith.addf %261, %264 : vector<16x10xf32>
    %c0_204 = arith.constant 0 : index
    %c5_205 = arith.constant 5 : index
    %c0_206 = arith.constant 0 : index
    %c0_207 = arith.constant 0 : index
    %266 = vector.load %arg8[%c0_204, %c5_205, %c0_206, %c0_207] : memref<2x6x60x10xbf16, #tpu.memory_space<vmem>>, vector<1x1x60x10xbf16>
    %267 = vector.shape_cast %266 : vector<1x1x60x10xbf16> to vector<60x10xbf16>
    %cst_208 = arith.constant dense<0.000000e+00> : vector<16x10xf32>
    %268 = tpu.matmul %42, %267, %cst_208 {dimension_numbers = #tpu.dot_dimension_numbers<[1], [0], [0], [1], [0, 0, 1, 1], [], []>} : vector<16x60xbf16>, vector<60x10xbf16>, vector<16x10xf32> -> vector<16x10xf32>
    %c0_209 = arith.constant 0 : index
    %c5_210 = arith.constant 5 : index
    %c0_211 = arith.constant 0 : index
    %c0_212 = arith.constant 0 : index
    %269 = vector.load %arg9[%c0_209, %c5_210, %c0_211, %c0_212] : memref<2x6x1x10xf32, #tpu.memory_space<vmem>>, vector<1x1x1x10xf32>
    %270 = vector.shape_cast %269 : vector<1x1x1x10xf32> to vector<1x10xf32>
    %271 = vector.broadcast %270 : vector<1x10xf32> to vector<16x10xf32>
    %272 = arith.addf %268, %271 : vector<16x10xf32>
    %c0_213 = arith.constant 0 : index
    %c5_214 = arith.constant 5 : index
    %c0_215 = arith.constant 0 : index
    %c0_216 = arith.constant 0 : index
    %273 = vector.load %arg10[%c0_213, %c5_214, %c0_215, %c0_216] : memref<2x6x60x10xbf16, #tpu.memory_space<vmem>>, vector<1x1x60x10xbf16>
    %274 = vector.shape_cast %273 : vector<1x1x60x10xbf16> to vector<60x10xbf16>
    %cst_217 = arith.constant dense<0.000000e+00> : vector<16x10xf32>
    %275 = tpu.matmul %42, %274, %cst_217 {dimension_numbers = #tpu.dot_dimension_numbers<[1], [0], [0], [1], [0, 0, 1, 1], [], []>} : vector<16x60xbf16>, vector<60x10xbf16>, vector<16x10xf32> -> vector<16x10xf32>
    %c0_218 = arith.constant 0 : index
    %c5_219 = arith.constant 5 : index
    %c0_220 = arith.constant 0 : index
    %c0_221 = arith.constant 0 : index
    %276 = vector.load %arg11[%c0_218, %c5_219, %c0_220, %c0_221] : memref<2x6x1x10xf32, #tpu.memory_space<vmem>>, vector<1x1x1x10xf32>
    %277 = vector.shape_cast %276 : vector<1x1x1x10xf32> to vector<1x10xf32>
    %278 = vector.broadcast %277 : vector<1x10xf32> to vector<16x10xf32>
    %279 = arith.addf %275, %278 : vector<16x10xf32>
    %280 = arith.truncf %265 : vector<16x10xf32> to vector<16x10xbf16>
    %281 = arith.truncf %272 : vector<16x10xf32> to vector<16x10xbf16>
    %cst_222 = arith.constant dense<0.000000e+00> : vector<16x16xf32>
    %282 = tpu.matmul %280, %281, %cst_222 {dimension_numbers = #tpu.dot_dimension_numbers<[1], [1], [0], [0], [0, 0, 1, 0], [], []>} : vector<16x10xbf16>, vector<16x10xbf16>, vector<16x16xf32> -> vector<16x16xf32>
    %283 = arith.addf %282, %5 : vector<16x16xf32>
    %cst_223 = arith.constant dense<0xFF800000> : vector<16xf32>
    %284 = vector.multi_reduction <maximumf>, %283, %cst_223 [1] : vector<16x16xf32> to vector<16xf32>
    %285 = vector.shape_cast %284 : vector<16xf32> to vector<16x1xf32>
    %286 = vector.broadcast %285 : vector<16x1xf32> to vector<16x16xf32>
    %287 = arith.subf %283, %286 : vector<16x16xf32>
    %288 = math.exp %287 : vector<16x16xf32>
    %cst_224 = arith.constant dense<0.000000e+00> : vector<16xf32>
    %289 = vector.multi_reduction <add>, %288, %cst_224 [1] : vector<16x16xf32> to vector<16xf32>
    %290 = vector.shape_cast %289 : vector<16xf32> to vector<16x1xf32>
    %291 = tpu.reciprocal %290 {approx = true} : vector<16x1xf32> -> vector<16x1xf32>
    %292 = vector.broadcast %291 : vector<16x1xf32> to vector<16x16xf32>
    %293 = arith.mulf %288, %292 : vector<16x16xf32>
    %294 = arith.truncf %293 : vector<16x16xf32> to vector<16x16xbf16>
    %295 = arith.truncf %279 : vector<16x10xf32> to vector<16x10xbf16>
    %cst_225 = arith.constant dense<0.000000e+00> : vector<16x10xf32>
    %296 = tpu.matmul %294, %295, %cst_225 {dimension_numbers = #tpu.dot_dimension_numbers<[1], [0], [0], [1], [0, 0, 1, 1], [], []>} : vector<16x16xbf16>, vector<16x10xbf16>, vector<16x10xf32> -> vector<16x10xf32>
    %297 = arith.truncf %296 : vector<16x10xf32> to vector<16x10xbf16>
    %c0_226 = arith.constant 0 : index
    %c5_227 = arith.constant 5 : index
    %c0_228 = arith.constant 0 : index
    %c0_229 = arith.constant 0 : index
    %298 = vector.load %arg12[%c0_226, %c5_227, %c0_228, %c0_229] : memref<2x6x10x60xbf16, #tpu.memory_space<vmem>>, vector<1x1x10x60xbf16>
    %299 = vector.shape_cast %298 : vector<1x1x10x60xbf16> to vector<10x60xbf16>
    %cst_230 = arith.constant dense<0.000000e+00> : vector<16x60xf32>
    %300 = tpu.matmul %297, %299, %cst_230 {dimension_numbers = #tpu.dot_dimension_numbers<[1], [0], [0], [1], [0, 0, 1, 1], [], []>} : vector<16x10xbf16>, vector<10x60xbf16>, vector<16x60xf32> -> vector<16x60xf32>
    %301 = arith.addf %258, %300 : vector<16x60xf32>
    %302 = arith.addf %17, %301 : vector<16x60xf32>
    %c0_231 = arith.constant 0 : index
    %c0_232 = arith.constant 0 : index
    %c0_233 = arith.constant 0 : index
    %303 = vector.load %arg13[%c0_231, %c0_232, %c0_233] : memref<2x1x60xf32, #tpu.memory_space<vmem>>, vector<1x1x60xf32>
    %304 = vector.shape_cast %303 : vector<1x1x60xf32> to vector<1x60xf32>
    %305 = vector.broadcast %304 : vector<1x60xf32> to vector<16x60xf32>
    %306 = arith.addf %302, %305 : vector<16x60xf32>
    %c0_234 = arith.constant 0 : index
    %c0_235 = arith.constant 0 : index
    %c0_236 = arith.constant 0 : index
    %307 = vector.load %arg14[%c0_234, %c0_235, %c0_236] : memref<2x1x60xf32, #tpu.memory_space<vmem>>, vector<1x1x60xf32>
    %308 = vector.shape_cast %307 : vector<1x1x60xf32> to vector<1x60xf32>
    %c0_237 = arith.constant 0 : index
    %c0_238 = arith.constant 0 : index
    %c0_239 = arith.constant 0 : index
    %309 = vector.load %arg15[%c0_237, %c0_238, %c0_239] : memref<2x1x60xf32, #tpu.memory_space<vmem>>, vector<1x1x60xf32>
    %310 = vector.shape_cast %309 : vector<1x1x60xf32> to vector<1x60xf32>
    %cst_240 = arith.constant dense<0.000000e+00> : vector<16xf32>
    %311 = vector.multi_reduction <add>, %306, %cst_240 [1] : vector<16x60xf32> to vector<16xf32>
    %312 = vector.shape_cast %311 : vector<16xf32> to vector<16x1xf32>
    %cst_241 = arith.constant 6.000000e+01 : f32
    %313 = vector.broadcast %cst_241 : f32 to vector<16x1xf32>
    %314 = arith.divf %312, %313 : vector<16x1xf32>
    %315 = vector.broadcast %314 : vector<16x1xf32> to vector<16x60xf32>
    %316 = arith.subf %306, %315 : vector<16x60xf32>
    %317 = arith.mulf %316, %316 : vector<16x60xf32>
    %cst_242 = arith.constant dense<0.000000e+00> : vector<16xf32>
    %318 = vector.multi_reduction <add>, %317, %cst_242 [1] : vector<16x60xf32> to vector<16xf32>
    %319 = vector.shape_cast %318 : vector<16xf32> to vector<16x1xf32>
    %cst_243 = arith.constant 6.000000e+01 : f32
    %320 = vector.broadcast %cst_243 : f32 to vector<16x1xf32>
    %321 = arith.divf %319, %320 : vector<16x1xf32>
    %cst_244 = arith.constant 9.99999974E-6 : f32
    %322 = vector.broadcast %cst_244 : f32 to vector<16x1xf32>
    %323 = arith.addf %321, %322 : vector<16x1xf32>
    %324 = math.rsqrt %323 : vector<16x1xf32>
    %325 = vector.broadcast %324 : vector<16x1xf32> to vector<16x60xf32>
    %326 = arith.mulf %316, %325 : vector<16x60xf32>
    %327 = vector.broadcast %308 : vector<1x60xf32> to vector<16x60xf32>
    %328 = arith.mulf %326, %327 : vector<16x60xf32>
    %329 = vector.broadcast %310 : vector<1x60xf32> to vector<16x60xf32>
    %330 = arith.addf %328, %329 : vector<16x60xf32>
    %331 = arith.truncf %330 : vector<16x60xf32> to vector<16x60xbf16>
    %c0_245 = arith.constant 0 : index
    %c0_246 = arith.constant 0 : index
    %c0_247 = arith.constant 0 : index
    %332 = vector.load %arg16[%c0_245, %c0_246, %c0_247] : memref<2x60x240xbf16, #tpu.memory_space<vmem>>, vector<1x60x240xbf16>
    %333 = vector.shape_cast %332 : vector<1x60x240xbf16> to vector<60x240xbf16>
    %cst_248 = arith.constant dense<0.000000e+00> : vector<16x240xf32>
    %334 = tpu.matmul %331, %333, %cst_248 {dimension_numbers = #tpu.dot_dimension_numbers<[1], [0], [0], [1], [0, 0, 1, 1], [], []>} : vector<16x60xbf16>, vector<60x240xbf16>, vector<16x240xf32> -> vector<16x240xf32>
    %c0_249 = arith.constant 0 : index
    %c0_250 = arith.constant 0 : index
    %c0_251 = arith.constant 0 : index
    %335 = vector.load %arg17[%c0_249, %c0_250, %c0_251] : memref<2x1x240xf32, #tpu.memory_space<vmem>>, vector<1x1x240xf32>
    %336 = vector.shape_cast %335 : vector<1x1x240xf32> to vector<1x240xf32>
    %337 = vector.broadcast %336 : vector<1x240xf32> to vector<16x240xf32>
    %338 = arith.addf %334, %337 : vector<16x240xf32>
    %cst_252 = arith.constant 0.000000e+00 : f32
    %339 = vector.broadcast %cst_252 : f32 to vector<16x240xf32>
    %340 = arith.maximumf %338, %339 : vector<16x240xf32>
    %341 = arith.truncf %340 : vector<16x240xf32> to vector<16x240xbf16>
    %c0_253 = arith.constant 0 : index
    %c0_254 = arith.constant 0 : index
    %c0_255 = arith.constant 0 : index
    %342 = vector.load %arg18[%c0_253, %c0_254, %c0_255] : memref<2x240x60xbf16, #tpu.memory_space<vmem>>, vector<1x240x60xbf16>
    %343 = vector.shape_cast %342 : vector<1x240x60xbf16> to vector<240x60xbf16>
    %cst_256 = arith.constant dense<0.000000e+00> : vector<16x60xf32>
    %344 = tpu.matmul %341, %343, %cst_256 {dimension_numbers = #tpu.dot_dimension_numbers<[1], [0], [0], [1], [0, 0, 1, 1], [], []>} : vector<16x240xbf16>, vector<240x60xbf16>, vector<16x60xf32> -> vector<16x60xf32>
    %c0_257 = arith.constant 0 : index
    %c0_258 = arith.constant 0 : index
    %c0_259 = arith.constant 0 : index
    %345 = vector.load %arg19[%c0_257, %c0_258, %c0_259] : memref<2x1x60xf32, #tpu.memory_space<vmem>>, vector<1x1x60xf32>
    %346 = vector.shape_cast %345 : vector<1x1x60xf32> to vector<1x60xf32>
    %347 = vector.broadcast %346 : vector<1x60xf32> to vector<16x60xf32>
    %348 = arith.addf %344, %347 : vector<16x60xf32>
    %349 = arith.addf %306, %348 : vector<16x60xf32>
    %c1_260 = arith.constant 1 : index
    %c0_261 = arith.constant 0 : index
    %c0_262 = arith.constant 0 : index
    %350 = vector.load %arg4[%c1_260, %c0_261, %c0_262] : memref<2x1x60xf32, #tpu.memory_space<vmem>>, vector<1x1x60xf32>
    %351 = vector.shape_cast %350 : vector<1x1x60xf32> to vector<1x60xf32>
    %c1_263 = arith.constant 1 : index
    %c0_264 = arith.constant 0 : index
    %c0_265 = arith.constant 0 : index
    %352 = vector.load %arg5[%c1_263, %c0_264, %c0_265] : memref<2x1x60xf32, #tpu.memory_space<vmem>>, vector<1x1x60xf32>
    %353 = vector.shape_cast %352 : vector<1x1x60xf32> to vector<1x60xf32>
    %cst_266 = arith.constant dense<0.000000e+00> : vector<16xf32>
    %354 = vector.multi_reduction <add>, %349, %cst_266 [1] : vector<16x60xf32> to vector<16xf32>
    %355 = vector.shape_cast %354 : vector<16xf32> to vector<16x1xf32>
    %cst_267 = arith.constant 6.000000e+01 : f32
    %356 = vector.broadcast %cst_267 : f32 to vector<16x1xf32>
    %357 = arith.divf %355, %356 : vector<16x1xf32>
    %358 = vector.broadcast %357 : vector<16x1xf32> to vector<16x60xf32>
    %359 = arith.subf %349, %358 : vector<16x60xf32>
    %360 = arith.mulf %359, %359 : vector<16x60xf32>
    %cst_268 = arith.constant dense<0.000000e+00> : vector<16xf32>
    %361 = vector.multi_reduction <add>, %360, %cst_268 [1] : vector<16x60xf32> to vector<16xf32>
    %362 = vector.shape_cast %361 : vector<16xf32> to vector<16x1xf32>
    %cst_269 = arith.constant 6.000000e+01 : f32
    %363 = vector.broadcast %cst_269 : f32 to vector<16x1xf32>
    %364 = arith.divf %362, %363 : vector<16x1xf32>
    %cst_270 = arith.constant 9.99999974E-6 : f32
    %365 = vector.broadcast %cst_270 : f32 to vector<16x1xf32>
    %366 = arith.addf %364, %365 : vector<16x1xf32>
    %367 = math.rsqrt %366 : vector<16x1xf32>
    %368 = vector.broadcast %367 : vector<16x1xf32> to vector<16x60xf32>
    %369 = arith.mulf %359, %368 : vector<16x60xf32>
    %370 = vector.broadcast %351 : vector<1x60xf32> to vector<16x60xf32>
    %371 = arith.mulf %369, %370 : vector<16x60xf32>
    %372 = vector.broadcast %353 : vector<1x60xf32> to vector<16x60xf32>
    %373 = arith.addf %371, %372 : vector<16x60xf32>
    %374 = arith.truncf %373 : vector<16x60xf32> to vector<16x60xbf16>
    %cst_271 = arith.constant 0.000000e+00 : f32
    %375 = vector.broadcast %cst_271 : f32 to vector<16x60xf32>
    %c1_272 = arith.constant 1 : index
    %c0_273 = arith.constant 0 : index
    %c0_274 = arith.constant 0 : index
    %c0_275 = arith.constant 0 : index
    %376 = vector.load %arg6[%c1_272, %c0_273, %c0_274, %c0_275] : memref<2x6x60x10xbf16, #tpu.memory_space<vmem>>, vector<1x1x60x10xbf16>
    %377 = vector.shape_cast %376 : vector<1x1x60x10xbf16> to vector<60x10xbf16>
    %cst_276 = arith.constant dense<0.000000e+00> : vector<16x10xf32>
    %378 = tpu.matmul %374, %377, %cst_276 {dimension_numbers = #tpu.dot_dimension_numbers<[1], [0], [0], [1], [0, 0, 1, 1], [], []>} : vector<16x60xbf16>, vector<60x10xbf16>, vector<16x10xf32> -> vector<16x10xf32>
    %c1_277 = arith.constant 1 : index
    %c0_278 = arith.constant 0 : index
    %c0_279 = arith.constant 0 : index
    %c0_280 = arith.constant 0 : index
    %379 = vector.load %arg7[%c1_277, %c0_278, %c0_279, %c0_280] : memref<2x6x1x10xf32, #tpu.memory_space<vmem>>, vector<1x1x1x10xf32>
    %380 = vector.shape_cast %379 : vector<1x1x1x10xf32> to vector<1x10xf32>
    %381 = vector.broadcast %380 : vector<1x10xf32> to vector<16x10xf32>
    %382 = arith.addf %378, %381 : vector<16x10xf32>
    %c1_281 = arith.constant 1 : index
    %c0_282 = arith.constant 0 : index
    %c0_283 = arith.constant 0 : index
    %c0_284 = arith.constant 0 : index
    %383 = vector.load %arg8[%c1_281, %c0_282, %c0_283, %c0_284] : memref<2x6x60x10xbf16, #tpu.memory_space<vmem>>, vector<1x1x60x10xbf16>
    %384 = vector.shape_cast %383 : vector<1x1x60x10xbf16> to vector<60x10xbf16>
    %cst_285 = arith.constant dense<0.000000e+00> : vector<16x10xf32>
    %385 = tpu.matmul %374, %384, %cst_285 {dimension_numbers = #tpu.dot_dimension_numbers<[1], [0], [0], [1], [0, 0, 1, 1], [], []>} : vector<16x60xbf16>, vector<60x10xbf16>, vector<16x10xf32> -> vector<16x10xf32>
    %c1_286 = arith.constant 1 : index
    %c0_287 = arith.constant 0 : index
    %c0_288 = arith.constant 0 : index
    %c0_289 = arith.constant 0 : index
    %386 = vector.load %arg9[%c1_286, %c0_287, %c0_288, %c0_289] : memref<2x6x1x10xf32, #tpu.memory_space<vmem>>, vector<1x1x1x10xf32>
    %387 = vector.shape_cast %386 : vector<1x1x1x10xf32> to vector<1x10xf32>
    %388 = vector.broadcast %387 : vector<1x10xf32> to vector<16x10xf32>
    %389 = arith.addf %385, %388 : vector<16x10xf32>
    %c1_290 = arith.constant 1 : index
    %c0_291 = arith.constant 0 : index
    %c0_292 = arith.constant 0 : index
    %c0_293 = arith.constant 0 : index
    %390 = vector.load %arg10[%c1_290, %c0_291, %c0_292, %c0_293] : memref<2x6x60x10xbf16, #tpu.memory_space<vmem>>, vector<1x1x60x10xbf16>
    %391 = vector.shape_cast %390 : vector<1x1x60x10xbf16> to vector<60x10xbf16>
    %cst_294 = arith.constant dense<0.000000e+00> : vector<16x10xf32>
    %392 = tpu.matmul %374, %391, %cst_294 {dimension_numbers = #tpu.dot_dimension_numbers<[1], [0], [0], [1], [0, 0, 1, 1], [], []>} : vector<16x60xbf16>, vector<60x10xbf16>, vector<16x10xf32> -> vector<16x10xf32>
    %c1_295 = arith.constant 1 : index
    %c0_296 = arith.constant 0 : index
    %c0_297 = arith.constant 0 : index
    %c0_298 = arith.constant 0 : index
    %393 = vector.load %arg11[%c1_295, %c0_296, %c0_297, %c0_298] : memref<2x6x1x10xf32, #tpu.memory_space<vmem>>, vector<1x1x1x10xf32>
    %394 = vector.shape_cast %393 : vector<1x1x1x10xf32> to vector<1x10xf32>
    %395 = vector.broadcast %394 : vector<1x10xf32> to vector<16x10xf32>
    %396 = arith.addf %392, %395 : vector<16x10xf32>
    %397 = arith.truncf %382 : vector<16x10xf32> to vector<16x10xbf16>
    %398 = arith.truncf %389 : vector<16x10xf32> to vector<16x10xbf16>
    %cst_299 = arith.constant dense<0.000000e+00> : vector<16x16xf32>
    %399 = tpu.matmul %397, %398, %cst_299 {dimension_numbers = #tpu.dot_dimension_numbers<[1], [1], [0], [0], [0, 0, 1, 0], [], []>} : vector<16x10xbf16>, vector<16x10xbf16>, vector<16x16xf32> -> vector<16x16xf32>
    %400 = arith.addf %399, %5 : vector<16x16xf32>
    %cst_300 = arith.constant dense<0xFF800000> : vector<16xf32>
    %401 = vector.multi_reduction <maximumf>, %400, %cst_300 [1] : vector<16x16xf32> to vector<16xf32>
    %402 = vector.shape_cast %401 : vector<16xf32> to vector<16x1xf32>
    %403 = vector.broadcast %402 : vector<16x1xf32> to vector<16x16xf32>
    %404 = arith.subf %400, %403 : vector<16x16xf32>
    %405 = math.exp %404 : vector<16x16xf32>
    %cst_301 = arith.constant dense<0.000000e+00> : vector<16xf32>
    %406 = vector.multi_reduction <add>, %405, %cst_301 [1] : vector<16x16xf32> to vector<16xf32>
    %407 = vector.shape_cast %406 : vector<16xf32> to vector<16x1xf32>
    %408 = tpu.reciprocal %407 {approx = true} : vector<16x1xf32> -> vector<16x1xf32>
    %409 = vector.broadcast %408 : vector<16x1xf32> to vector<16x16xf32>
    %410 = arith.mulf %405, %409 : vector<16x16xf32>
    %411 = arith.truncf %410 : vector<16x16xf32> to vector<16x16xbf16>
    %412 = arith.truncf %396 : vector<16x10xf32> to vector<16x10xbf16>
    %cst_302 = arith.constant dense<0.000000e+00> : vector<16x10xf32>
    %413 = tpu.matmul %411, %412, %cst_302 {dimension_numbers = #tpu.dot_dimension_numbers<[1], [0], [0], [1], [0, 0, 1, 1], [], []>} : vector<16x16xbf16>, vector<16x10xbf16>, vector<16x10xf32> -> vector<16x10xf32>
    %414 = arith.truncf %413 : vector<16x10xf32> to vector<16x10xbf16>
    %c1_303 = arith.constant 1 : index
    %c0_304 = arith.constant 0 : index
    %c0_305 = arith.constant 0 : index
    %c0_306 = arith.constant 0 : index
    %415 = vector.load %arg12[%c1_303, %c0_304, %c0_305, %c0_306] : memref<2x6x10x60xbf16, #tpu.memory_space<vmem>>, vector<1x1x10x60xbf16>
    %416 = vector.shape_cast %415 : vector<1x1x10x60xbf16> to vector<10x60xbf16>
    %cst_307 = arith.constant dense<0.000000e+00> : vector<16x60xf32>
    %417 = tpu.matmul %414, %416, %cst_307 {dimension_numbers = #tpu.dot_dimension_numbers<[1], [0], [0], [1], [0, 0, 1, 1], [], []>} : vector<16x10xbf16>, vector<10x60xbf16>, vector<16x60xf32> -> vector<16x60xf32>
    %418 = arith.addf %375, %417 : vector<16x60xf32>
    %c1_308 = arith.constant 1 : index
    %c1_309 = arith.constant 1 : index
    %c0_310 = arith.constant 0 : index
    %c0_311 = arith.constant 0 : index
    %419 = vector.load %arg6[%c1_308, %c1_309, %c0_310, %c0_311] : memref<2x6x60x10xbf16, #tpu.memory_space<vmem>>, vector<1x1x60x10xbf16>
    %420 = vector.shape_cast %419 : vector<1x1x60x10xbf16> to vector<60x10xbf16>
    %cst_312 = arith.constant dense<0.000000e+00> : vector<16x10xf32>
    %421 = tpu.matmul %374, %420, %cst_312 {dimension_numbers = #tpu.dot_dimension_numbers<[1], [0], [0], [1], [0, 0, 1, 1], [], []>} : vector<16x60xbf16>, vector<60x10xbf16>, vector<16x10xf32> -> vector<16x10xf32>
    %c1_313 = arith.constant 1 : index
    %c1_314 = arith.constant 1 : index
    %c0_315 = arith.constant 0 : index
    %c0_316 = arith.constant 0 : index
    %422 = vector.load %arg7[%c1_313, %c1_314, %c0_315, %c0_316] : memref<2x6x1x10xf32, #tpu.memory_space<vmem>>, vector<1x1x1x10xf32>
    %423 = vector.shape_cast %422 : vector<1x1x1x10xf32> to vector<1x10xf32>
    %424 = vector.broadcast %423 : vector<1x10xf32> to vector<16x10xf32>
    %425 = arith.addf %421, %424 : vector<16x10xf32>
    %c1_317 = arith.constant 1 : index
    %c1_318 = arith.constant 1 : index
    %c0_319 = arith.constant 0 : index
    %c0_320 = arith.constant 0 : index
    %426 = vector.load %arg8[%c1_317, %c1_318, %c0_319, %c0_320] : memref<2x6x60x10xbf16, #tpu.memory_space<vmem>>, vector<1x1x60x10xbf16>
    %427 = vector.shape_cast %426 : vector<1x1x60x10xbf16> to vector<60x10xbf16>
    %cst_321 = arith.constant dense<0.000000e+00> : vector<16x10xf32>
    %428 = tpu.matmul %374, %427, %cst_321 {dimension_numbers = #tpu.dot_dimension_numbers<[1], [0], [0], [1], [0, 0, 1, 1], [], []>} : vector<16x60xbf16>, vector<60x10xbf16>, vector<16x10xf32> -> vector<16x10xf32>
    %c1_322 = arith.constant 1 : index
    %c1_323 = arith.constant 1 : index
    %c0_324 = arith.constant 0 : index
    %c0_325 = arith.constant 0 : index
    %429 = vector.load %arg9[%c1_322, %c1_323, %c0_324, %c0_325] : memref<2x6x1x10xf32, #tpu.memory_space<vmem>>, vector<1x1x1x10xf32>
    %430 = vector.shape_cast %429 : vector<1x1x1x10xf32> to vector<1x10xf32>
    %431 = vector.broadcast %430 : vector<1x10xf32> to vector<16x10xf32>
    %432 = arith.addf %428, %431 : vector<16x10xf32>
    %c1_326 = arith.constant 1 : index
    %c1_327 = arith.constant 1 : index
    %c0_328 = arith.constant 0 : index
    %c0_329 = arith.constant 0 : index
    %433 = vector.load %arg10[%c1_326, %c1_327, %c0_328, %c0_329] : memref<2x6x60x10xbf16, #tpu.memory_space<vmem>>, vector<1x1x60x10xbf16>
    %434 = vector.shape_cast %433 : vector<1x1x60x10xbf16> to vector<60x10xbf16>
    %cst_330 = arith.constant dense<0.000000e+00> : vector<16x10xf32>
    %435 = tpu.matmul %374, %434, %cst_330 {dimension_numbers = #tpu.dot_dimension_numbers<[1], [0], [0], [1], [0, 0, 1, 1], [], []>} : vector<16x60xbf16>, vector<60x10xbf16>, vector<16x10xf32> -> vector<16x10xf32>
    %c1_331 = arith.constant 1 : index
    %c1_332 = arith.constant 1 : index
    %c0_333 = arith.constant 0 : index
    %c0_334 = arith.constant 0 : index
    %436 = vector.load %arg11[%c1_331, %c1_332, %c0_333, %c0_334] : memref<2x6x1x10xf32, #tpu.memory_space<vmem>>, vector<1x1x1x10xf32>
    %437 = vector.shape_cast %436 : vector<1x1x1x10xf32> to vector<1x10xf32>
    %438 = vector.broadcast %437 : vector<1x10xf32> to vector<16x10xf32>
    %439 = arith.addf %435, %438 : vector<16x10xf32>
    %440 = arith.truncf %425 : vector<16x10xf32> to vector<16x10xbf16>
    %441 = arith.truncf %432 : vector<16x10xf32> to vector<16x10xbf16>
    %cst_335 = arith.constant dense<0.000000e+00> : vector<16x16xf32>
    %442 = tpu.matmul %440, %441, %cst_335 {dimension_numbers = #tpu.dot_dimension_numbers<[1], [1], [0], [0], [0, 0, 1, 0], [], []>} : vector<16x10xbf16>, vector<16x10xbf16>, vector<16x16xf32> -> vector<16x16xf32>
    %443 = arith.addf %442, %5 : vector<16x16xf32>
    %cst_336 = arith.constant dense<0xFF800000> : vector<16xf32>
    %444 = vector.multi_reduction <maximumf>, %443, %cst_336 [1] : vector<16x16xf32> to vector<16xf32>
    %445 = vector.shape_cast %444 : vector<16xf32> to vector<16x1xf32>
    %446 = vector.broadcast %445 : vector<16x1xf32> to vector<16x16xf32>
    %447 = arith.subf %443, %446 : vector<16x16xf32>
    %448 = math.exp %447 : vector<16x16xf32>
    %cst_337 = arith.constant dense<0.000000e+00> : vector<16xf32>
    %449 = vector.multi_reduction <add>, %448, %cst_337 [1] : vector<16x16xf32> to vector<16xf32>
    %450 = vector.shape_cast %449 : vector<16xf32> to vector<16x1xf32>
    %451 = tpu.reciprocal %450 {approx = true} : vector<16x1xf32> -> vector<16x1xf32>
    %452 = vector.broadcast %451 : vector<16x1xf32> to vector<16x16xf32>
    %453 = arith.mulf %448, %452 : vector<16x16xf32>
    %454 = arith.truncf %453 : vector<16x16xf32> to vector<16x16xbf16>
    %455 = arith.truncf %439 : vector<16x10xf32> to vector<16x10xbf16>
    %cst_338 = arith.constant dense<0.000000e+00> : vector<16x10xf32>
    %456 = tpu.matmul %454, %455, %cst_338 {dimension_numbers = #tpu.dot_dimension_numbers<[1], [0], [0], [1], [0, 0, 1, 1], [], []>} : vector<16x16xbf16>, vector<16x10xbf16>, vector<16x10xf32> -> vector<16x10xf32>
    %457 = arith.truncf %456 : vector<16x10xf32> to vector<16x10xbf16>
    %c1_339 = arith.constant 1 : index
    %c1_340 = arith.constant 1 : index
    %c0_341 = arith.constant 0 : index
    %c0_342 = arith.constant 0 : index
    %458 = vector.load %arg12[%c1_339, %c1_340, %c0_341, %c0_342] : memref<2x6x10x60xbf16, #tpu.memory_space<vmem>>, vector<1x1x10x60xbf16>
    %459 = vector.shape_cast %458 : vector<1x1x10x60xbf16> to vector<10x60xbf16>
    %cst_343 = arith.constant dense<0.000000e+00> : vector<16x60xf32>
    %460 = tpu.matmul %457, %459, %cst_343 {dimension_numbers = #tpu.dot_dimension_numbers<[1], [0], [0], [1], [0, 0, 1, 1], [], []>} : vector<16x10xbf16>, vector<10x60xbf16>, vector<16x60xf32> -> vector<16x60xf32>
    %461 = arith.addf %418, %460 : vector<16x60xf32>
    %c1_344 = arith.constant 1 : index
    %c2_345 = arith.constant 2 : index
    %c0_346 = arith.constant 0 : index
    %c0_347 = arith.constant 0 : index
    %462 = vector.load %arg6[%c1_344, %c2_345, %c0_346, %c0_347] : memref<2x6x60x10xbf16, #tpu.memory_space<vmem>>, vector<1x1x60x10xbf16>
    %463 = vector.shape_cast %462 : vector<1x1x60x10xbf16> to vector<60x10xbf16>
    %cst_348 = arith.constant dense<0.000000e+00> : vector<16x10xf32>
    %464 = tpu.matmul %374, %463, %cst_348 {dimension_numbers = #tpu.dot_dimension_numbers<[1], [0], [0], [1], [0, 0, 1, 1], [], []>} : vector<16x60xbf16>, vector<60x10xbf16>, vector<16x10xf32> -> vector<16x10xf32>
    %c1_349 = arith.constant 1 : index
    %c2_350 = arith.constant 2 : index
    %c0_351 = arith.constant 0 : index
    %c0_352 = arith.constant 0 : index
    %465 = vector.load %arg7[%c1_349, %c2_350, %c0_351, %c0_352] : memref<2x6x1x10xf32, #tpu.memory_space<vmem>>, vector<1x1x1x10xf32>
    %466 = vector.shape_cast %465 : vector<1x1x1x10xf32> to vector<1x10xf32>
    %467 = vector.broadcast %466 : vector<1x10xf32> to vector<16x10xf32>
    %468 = arith.addf %464, %467 : vector<16x10xf32>
    %c1_353 = arith.constant 1 : index
    %c2_354 = arith.constant 2 : index
    %c0_355 = arith.constant 0 : index
    %c0_356 = arith.constant 0 : index
    %469 = vector.load %arg8[%c1_353, %c2_354, %c0_355, %c0_356] : memref<2x6x60x10xbf16, #tpu.memory_space<vmem>>, vector<1x1x60x10xbf16>
    %470 = vector.shape_cast %469 : vector<1x1x60x10xbf16> to vector<60x10xbf16>
    %cst_357 = arith.constant dense<0.000000e+00> : vector<16x10xf32>
    %471 = tpu.matmul %374, %470, %cst_357 {dimension_numbers = #tpu.dot_dimension_numbers<[1], [0], [0], [1], [0, 0, 1, 1], [], []>} : vector<16x60xbf16>, vector<60x10xbf16>, vector<16x10xf32> -> vector<16x10xf32>
    %c1_358 = arith.constant 1 : index
    %c2_359 = arith.constant 2 : index
    %c0_360 = arith.constant 0 : index
    %c0_361 = arith.constant 0 : index
    %472 = vector.load %arg9[%c1_358, %c2_359, %c0_360, %c0_361] : memref<2x6x1x10xf32, #tpu.memory_space<vmem>>, vector<1x1x1x10xf32>
    %473 = vector.shape_cast %472 : vector<1x1x1x10xf32> to vector<1x10xf32>
    %474 = vector.broadcast %473 : vector<1x10xf32> to vector<16x10xf32>
    %475 = arith.addf %471, %474 : vector<16x10xf32>
    %c1_362 = arith.constant 1 : index
    %c2_363 = arith.constant 2 : index
    %c0_364 = arith.constant 0 : index
    %c0_365 = arith.constant 0 : index
    %476 = vector.load %arg10[%c1_362, %c2_363, %c0_364, %c0_365] : memref<2x6x60x10xbf16, #tpu.memory_space<vmem>>, vector<1x1x60x10xbf16>
    %477 = vector.shape_cast %476 : vector<1x1x60x10xbf16> to vector<60x10xbf16>
    %cst_366 = arith.constant dense<0.000000e+00> : vector<16x10xf32>
    %478 = tpu.matmul %374, %477, %cst_366 {dimension_numbers = #tpu.dot_dimension_numbers<[1], [0], [0], [1], [0, 0, 1, 1], [], []>} : vector<16x60xbf16>, vector<60x10xbf16>, vector<16x10xf32> -> vector<16x10xf32>
    %c1_367 = arith.constant 1 : index
    %c2_368 = arith.constant 2 : index
    %c0_369 = arith.constant 0 : index
    %c0_370 = arith.constant 0 : index
    %479 = vector.load %arg11[%c1_367, %c2_368, %c0_369, %c0_370] : memref<2x6x1x10xf32, #tpu.memory_space<vmem>>, vector<1x1x1x10xf32>
    %480 = vector.shape_cast %479 : vector<1x1x1x10xf32> to vector<1x10xf32>
    %481 = vector.broadcast %480 : vector<1x10xf32> to vector<16x10xf32>
    %482 = arith.addf %478, %481 : vector<16x10xf32>
    %483 = arith.truncf %468 : vector<16x10xf32> to vector<16x10xbf16>
    %484 = arith.truncf %475 : vector<16x10xf32> to vector<16x10xbf16>
    %cst_371 = arith.constant dense<0.000000e+00> : vector<16x16xf32>
    %485 = tpu.matmul %483, %484, %cst_371 {dimension_numbers = #tpu.dot_dimension_numbers<[1], [1], [0], [0], [0, 0, 1, 0], [], []>} : vector<16x10xbf16>, vector<16x10xbf16>, vector<16x16xf32> -> vector<16x16xf32>
    %486 = arith.addf %485, %5 : vector<16x16xf32>
    %cst_372 = arith.constant dense<0xFF800000> : vector<16xf32>
    %487 = vector.multi_reduction <maximumf>, %486, %cst_372 [1] : vector<16x16xf32> to vector<16xf32>
    %488 = vector.shape_cast %487 : vector<16xf32> to vector<16x1xf32>
    %489 = vector.broadcast %488 : vector<16x1xf32> to vector<16x16xf32>
    %490 = arith.subf %486, %489 : vector<16x16xf32>
    %491 = math.exp %490 : vector<16x16xf32>
    %cst_373 = arith.constant dense<0.000000e+00> : vector<16xf32>
    %492 = vector.multi_reduction <add>, %491, %cst_373 [1] : vector<16x16xf32> to vector<16xf32>
    %493 = vector.shape_cast %492 : vector<16xf32> to vector<16x1xf32>
    %494 = tpu.reciprocal %493 {approx = true} : vector<16x1xf32> -> vector<16x1xf32>
    %495 = vector.broadcast %494 : vector<16x1xf32> to vector<16x16xf32>
    %496 = arith.mulf %491, %495 : vector<16x16xf32>
    %497 = arith.truncf %496 : vector<16x16xf32> to vector<16x16xbf16>
    %498 = arith.truncf %482 : vector<16x10xf32> to vector<16x10xbf16>
    %cst_374 = arith.constant dense<0.000000e+00> : vector<16x10xf32>
    %499 = tpu.matmul %497, %498, %cst_374 {dimension_numbers = #tpu.dot_dimension_numbers<[1], [0], [0], [1], [0, 0, 1, 1], [], []>} : vector<16x16xbf16>, vector<16x10xbf16>, vector<16x10xf32> -> vector<16x10xf32>
    %500 = arith.truncf %499 : vector<16x10xf32> to vector<16x10xbf16>
    %c1_375 = arith.constant 1 : index
    %c2_376 = arith.constant 2 : index
    %c0_377 = arith.constant 0 : index
    %c0_378 = arith.constant 0 : index
    %501 = vector.load %arg12[%c1_375, %c2_376, %c0_377, %c0_378] : memref<2x6x10x60xbf16, #tpu.memory_space<vmem>>, vector<1x1x10x60xbf16>
    %502 = vector.shape_cast %501 : vector<1x1x10x60xbf16> to vector<10x60xbf16>
    %cst_379 = arith.constant dense<0.000000e+00> : vector<16x60xf32>
    %503 = tpu.matmul %500, %502, %cst_379 {dimension_numbers = #tpu.dot_dimension_numbers<[1], [0], [0], [1], [0, 0, 1, 1], [], []>} : vector<16x10xbf16>, vector<10x60xbf16>, vector<16x60xf32> -> vector<16x60xf32>
    %504 = arith.addf %461, %503 : vector<16x60xf32>
    %c1_380 = arith.constant 1 : index
    %c3_381 = arith.constant 3 : index
    %c0_382 = arith.constant 0 : index
    %c0_383 = arith.constant 0 : index
    %505 = vector.load %arg6[%c1_380, %c3_381, %c0_382, %c0_383] : memref<2x6x60x10xbf16, #tpu.memory_space<vmem>>, vector<1x1x60x10xbf16>
    %506 = vector.shape_cast %505 : vector<1x1x60x10xbf16> to vector<60x10xbf16>
    %cst_384 = arith.constant dense<0.000000e+00> : vector<16x10xf32>
    %507 = tpu.matmul %374, %506, %cst_384 {dimension_numbers = #tpu.dot_dimension_numbers<[1], [0], [0], [1], [0, 0, 1, 1], [], []>} : vector<16x60xbf16>, vector<60x10xbf16>, vector<16x10xf32> -> vector<16x10xf32>
    %c1_385 = arith.constant 1 : index
    %c3_386 = arith.constant 3 : index
    %c0_387 = arith.constant 0 : index
    %c0_388 = arith.constant 0 : index
    %508 = vector.load %arg7[%c1_385, %c3_386, %c0_387, %c0_388] : memref<2x6x1x10xf32, #tpu.memory_space<vmem>>, vector<1x1x1x10xf32>
    %509 = vector.shape_cast %508 : vector<1x1x1x10xf32> to vector<1x10xf32>
    %510 = vector.broadcast %509 : vector<1x10xf32> to vector<16x10xf32>
    %511 = arith.addf %507, %510 : vector<16x10xf32>
    %c1_389 = arith.constant 1 : index
    %c3_390 = arith.constant 3 : index
    %c0_391 = arith.constant 0 : index
    %c0_392 = arith.constant 0 : index
    %512 = vector.load %arg8[%c1_389, %c3_390, %c0_391, %c0_392] : memref<2x6x60x10xbf16, #tpu.memory_space<vmem>>, vector<1x1x60x10xbf16>
    %513 = vector.shape_cast %512 : vector<1x1x60x10xbf16> to vector<60x10xbf16>
    %cst_393 = arith.constant dense<0.000000e+00> : vector<16x10xf32>
    %514 = tpu.matmul %374, %513, %cst_393 {dimension_numbers = #tpu.dot_dimension_numbers<[1], [0], [0], [1], [0, 0, 1, 1], [], []>} : vector<16x60xbf16>, vector<60x10xbf16>, vector<16x10xf32> -> vector<16x10xf32>
    %c1_394 = arith.constant 1 : index
    %c3_395 = arith.constant 3 : index
    %c0_396 = arith.constant 0 : index
    %c0_397 = arith.constant 0 : index
    %515 = vector.load %arg9[%c1_394, %c3_395, %c0_396, %c0_397] : memref<2x6x1x10xf32, #tpu.memory_space<vmem>>, vector<1x1x1x10xf32>
    %516 = vector.shape_cast %515 : vector<1x1x1x10xf32> to vector<1x10xf32>
    %517 = vector.broadcast %516 : vector<1x10xf32> to vector<16x10xf32>
    %518 = arith.addf %514, %517 : vector<16x10xf32>
    %c1_398 = arith.constant 1 : index
    %c3_399 = arith.constant 3 : index
    %c0_400 = arith.constant 0 : index
    %c0_401 = arith.constant 0 : index
    %519 = vector.load %arg10[%c1_398, %c3_399, %c0_400, %c0_401] : memref<2x6x60x10xbf16, #tpu.memory_space<vmem>>, vector<1x1x60x10xbf16>
    %520 = vector.shape_cast %519 : vector<1x1x60x10xbf16> to vector<60x10xbf16>
    %cst_402 = arith.constant dense<0.000000e+00> : vector<16x10xf32>
    %521 = tpu.matmul %374, %520, %cst_402 {dimension_numbers = #tpu.dot_dimension_numbers<[1], [0], [0], [1], [0, 0, 1, 1], [], []>} : vector<16x60xbf16>, vector<60x10xbf16>, vector<16x10xf32> -> vector<16x10xf32>
    %c1_403 = arith.constant 1 : index
    %c3_404 = arith.constant 3 : index
    %c0_405 = arith.constant 0 : index
    %c0_406 = arith.constant 0 : index
    %522 = vector.load %arg11[%c1_403, %c3_404, %c0_405, %c0_406] : memref<2x6x1x10xf32, #tpu.memory_space<vmem>>, vector<1x1x1x10xf32>
    %523 = vector.shape_cast %522 : vector<1x1x1x10xf32> to vector<1x10xf32>
    %524 = vector.broadcast %523 : vector<1x10xf32> to vector<16x10xf32>
    %525 = arith.addf %521, %524 : vector<16x10xf32>
    %526 = arith.truncf %511 : vector<16x10xf32> to vector<16x10xbf16>
    %527 = arith.truncf %518 : vector<16x10xf32> to vector<16x10xbf16>
    %cst_407 = arith.constant dense<0.000000e+00> : vector<16x16xf32>
    %528 = tpu.matmul %526, %527, %cst_407 {dimension_numbers = #tpu.dot_dimension_numbers<[1], [1], [0], [0], [0, 0, 1, 0], [], []>} : vector<16x10xbf16>, vector<16x10xbf16>, vector<16x16xf32> -> vector<16x16xf32>
    %529 = arith.addf %528, %5 : vector<16x16xf32>
    %cst_408 = arith.constant dense<0xFF800000> : vector<16xf32>
    %530 = vector.multi_reduction <maximumf>, %529, %cst_408 [1] : vector<16x16xf32> to vector<16xf32>
    %531 = vector.shape_cast %530 : vector<16xf32> to vector<16x1xf32>
    %532 = vector.broadcast %531 : vector<16x1xf32> to vector<16x16xf32>
    %533 = arith.subf %529, %532 : vector<16x16xf32>
    %534 = math.exp %533 : vector<16x16xf32>
    %cst_409 = arith.constant dense<0.000000e+00> : vector<16xf32>
    %535 = vector.multi_reduction <add>, %534, %cst_409 [1] : vector<16x16xf32> to vector<16xf32>
    %536 = vector.shape_cast %535 : vector<16xf32> to vector<16x1xf32>
    %537 = tpu.reciprocal %536 {approx = true} : vector<16x1xf32> -> vector<16x1xf32>
    %538 = vector.broadcast %537 : vector<16x1xf32> to vector<16x16xf32>
    %539 = arith.mulf %534, %538 : vector<16x16xf32>
    %540 = arith.truncf %539 : vector<16x16xf32> to vector<16x16xbf16>
    %541 = arith.truncf %525 : vector<16x10xf32> to vector<16x10xbf16>
    %cst_410 = arith.constant dense<0.000000e+00> : vector<16x10xf32>
    %542 = tpu.matmul %540, %541, %cst_410 {dimension_numbers = #tpu.dot_dimension_numbers<[1], [0], [0], [1], [0, 0, 1, 1], [], []>} : vector<16x16xbf16>, vector<16x10xbf16>, vector<16x10xf32> -> vector<16x10xf32>
    %543 = arith.truncf %542 : vector<16x10xf32> to vector<16x10xbf16>
    %c1_411 = arith.constant 1 : index
    %c3_412 = arith.constant 3 : index
    %c0_413 = arith.constant 0 : index
    %c0_414 = arith.constant 0 : index
    %544 = vector.load %arg12[%c1_411, %c3_412, %c0_413, %c0_414] : memref<2x6x10x60xbf16, #tpu.memory_space<vmem>>, vector<1x1x10x60xbf16>
    %545 = vector.shape_cast %544 : vector<1x1x10x60xbf16> to vector<10x60xbf16>
    %cst_415 = arith.constant dense<0.000000e+00> : vector<16x60xf32>
    %546 = tpu.matmul %543, %545, %cst_415 {dimension_numbers = #tpu.dot_dimension_numbers<[1], [0], [0], [1], [0, 0, 1, 1], [], []>} : vector<16x10xbf16>, vector<10x60xbf16>, vector<16x60xf32> -> vector<16x60xf32>
    %547 = arith.addf %504, %546 : vector<16x60xf32>
    %c1_416 = arith.constant 1 : index
    %c4_417 = arith.constant 4 : index
    %c0_418 = arith.constant 0 : index
    %c0_419 = arith.constant 0 : index
    %548 = vector.load %arg6[%c1_416, %c4_417, %c0_418, %c0_419] : memref<2x6x60x10xbf16, #tpu.memory_space<vmem>>, vector<1x1x60x10xbf16>
    %549 = vector.shape_cast %548 : vector<1x1x60x10xbf16> to vector<60x10xbf16>
    %cst_420 = arith.constant dense<0.000000e+00> : vector<16x10xf32>
    %550 = tpu.matmul %374, %549, %cst_420 {dimension_numbers = #tpu.dot_dimension_numbers<[1], [0], [0], [1], [0, 0, 1, 1], [], []>} : vector<16x60xbf16>, vector<60x10xbf16>, vector<16x10xf32> -> vector<16x10xf32>
    %c1_421 = arith.constant 1 : index
    %c4_422 = arith.constant 4 : index
    %c0_423 = arith.constant 0 : index
    %c0_424 = arith.constant 0 : index
    %551 = vector.load %arg7[%c1_421, %c4_422, %c0_423, %c0_424] : memref<2x6x1x10xf32, #tpu.memory_space<vmem>>, vector<1x1x1x10xf32>
    %552 = vector.shape_cast %551 : vector<1x1x1x10xf32> to vector<1x10xf32>
    %553 = vector.broadcast %552 : vector<1x10xf32> to vector<16x10xf32>
    %554 = arith.addf %550, %553 : vector<16x10xf32>
    %c1_425 = arith.constant 1 : index
    %c4_426 = arith.constant 4 : index
    %c0_427 = arith.constant 0 : index
    %c0_428 = arith.constant 0 : index
    %555 = vector.load %arg8[%c1_425, %c4_426, %c0_427, %c0_428] : memref<2x6x60x10xbf16, #tpu.memory_space<vmem>>, vector<1x1x60x10xbf16>
    %556 = vector.shape_cast %555 : vector<1x1x60x10xbf16> to vector<60x10xbf16>
    %cst_429 = arith.constant dense<0.000000e+00> : vector<16x10xf32>
    %557 = tpu.matmul %374, %556, %cst_429 {dimension_numbers = #tpu.dot_dimension_numbers<[1], [0], [0], [1], [0, 0, 1, 1], [], []>} : vector<16x60xbf16>, vector<60x10xbf16>, vector<16x10xf32> -> vector<16x10xf32>
    %c1_430 = arith.constant 1 : index
    %c4_431 = arith.constant 4 : index
    %c0_432 = arith.constant 0 : index
    %c0_433 = arith.constant 0 : index
    %558 = vector.load %arg9[%c1_430, %c4_431, %c0_432, %c0_433] : memref<2x6x1x10xf32, #tpu.memory_space<vmem>>, vector<1x1x1x10xf32>
    %559 = vector.shape_cast %558 : vector<1x1x1x10xf32> to vector<1x10xf32>
    %560 = vector.broadcast %559 : vector<1x10xf32> to vector<16x10xf32>
    %561 = arith.addf %557, %560 : vector<16x10xf32>
    %c1_434 = arith.constant 1 : index
    %c4_435 = arith.constant 4 : index
    %c0_436 = arith.constant 0 : index
    %c0_437 = arith.constant 0 : index
    %562 = vector.load %arg10[%c1_434, %c4_435, %c0_436, %c0_437] : memref<2x6x60x10xbf16, #tpu.memory_space<vmem>>, vector<1x1x60x10xbf16>
    %563 = vector.shape_cast %562 : vector<1x1x60x10xbf16> to vector<60x10xbf16>
    %cst_438 = arith.constant dense<0.000000e+00> : vector<16x10xf32>
    %564 = tpu.matmul %374, %563, %cst_438 {dimension_numbers = #tpu.dot_dimension_numbers<[1], [0], [0], [1], [0, 0, 1, 1], [], []>} : vector<16x60xbf16>, vector<60x10xbf16>, vector<16x10xf32> -> vector<16x10xf32>
    %c1_439 = arith.constant 1 : index
    %c4_440 = arith.constant 4 : index
    %c0_441 = arith.constant 0 : index
    %c0_442 = arith.constant 0 : index
    %565 = vector.load %arg11[%c1_439, %c4_440, %c0_441, %c0_442] : memref<2x6x1x10xf32, #tpu.memory_space<vmem>>, vector<1x1x1x10xf32>
    %566 = vector.shape_cast %565 : vector<1x1x1x10xf32> to vector<1x10xf32>
    %567 = vector.broadcast %566 : vector<1x10xf32> to vector<16x10xf32>
    %568 = arith.addf %564, %567 : vector<16x10xf32>
    %569 = arith.truncf %554 : vector<16x10xf32> to vector<16x10xbf16>
    %570 = arith.truncf %561 : vector<16x10xf32> to vector<16x10xbf16>
    %cst_443 = arith.constant dense<0.000000e+00> : vector<16x16xf32>
    %571 = tpu.matmul %569, %570, %cst_443 {dimension_numbers = #tpu.dot_dimension_numbers<[1], [1], [0], [0], [0, 0, 1, 0], [], []>} : vector<16x10xbf16>, vector<16x10xbf16>, vector<16x16xf32> -> vector<16x16xf32>
    %572 = arith.addf %571, %5 : vector<16x16xf32>
    %cst_444 = arith.constant dense<0xFF800000> : vector<16xf32>
    %573 = vector.multi_reduction <maximumf>, %572, %cst_444 [1] : vector<16x16xf32> to vector<16xf32>
    %574 = vector.shape_cast %573 : vector<16xf32> to vector<16x1xf32>
    %575 = vector.broadcast %574 : vector<16x1xf32> to vector<16x16xf32>
    %576 = arith.subf %572, %575 : vector<16x16xf32>
    %577 = math.exp %576 : vector<16x16xf32>
    %cst_445 = arith.constant dense<0.000000e+00> : vector<16xf32>
    %578 = vector.multi_reduction <add>, %577, %cst_445 [1] : vector<16x16xf32> to vector<16xf32>
    %579 = vector.shape_cast %578 : vector<16xf32> to vector<16x1xf32>
    %580 = tpu.reciprocal %579 {approx = true} : vector<16x1xf32> -> vector<16x1xf32>
    %581 = vector.broadcast %580 : vector<16x1xf32> to vector<16x16xf32>
    %582 = arith.mulf %577, %581 : vector<16x16xf32>
    %583 = arith.truncf %582 : vector<16x16xf32> to vector<16x16xbf16>
    %584 = arith.truncf %568 : vector<16x10xf32> to vector<16x10xbf16>
    %cst_446 = arith.constant dense<0.000000e+00> : vector<16x10xf32>
    %585 = tpu.matmul %583, %584, %cst_446 {dimension_numbers = #tpu.dot_dimension_numbers<[1], [0], [0], [1], [0, 0, 1, 1], [], []>} : vector<16x16xbf16>, vector<16x10xbf16>, vector<16x10xf32> -> vector<16x10xf32>
    %586 = arith.truncf %585 : vector<16x10xf32> to vector<16x10xbf16>
    %c1_447 = arith.constant 1 : index
    %c4_448 = arith.constant 4 : index
    %c0_449 = arith.constant 0 : index
    %c0_450 = arith.constant 0 : index
    %587 = vector.load %arg12[%c1_447, %c4_448, %c0_449, %c0_450] : memref<2x6x10x60xbf16, #tpu.memory_space<vmem>>, vector<1x1x10x60xbf16>
    %588 = vector.shape_cast %587 : vector<1x1x10x60xbf16> to vector<10x60xbf16>
    %cst_451 = arith.constant dense<0.000000e+00> : vector<16x60xf32>
    %589 = tpu.matmul %586, %588, %cst_451 {dimension_numbers = #tpu.dot_dimension_numbers<[1], [0], [0], [1], [0, 0, 1, 1], [], []>} : vector<16x10xbf16>, vector<10x60xbf16>, vector<16x60xf32> -> vector<16x60xf32>
    %590 = arith.addf %547, %589 : vector<16x60xf32>
    %c1_452 = arith.constant 1 : index
    %c5_453 = arith.constant 5 : index
    %c0_454 = arith.constant 0 : index
    %c0_455 = arith.constant 0 : index
    %591 = vector.load %arg6[%c1_452, %c5_453, %c0_454, %c0_455] : memref<2x6x60x10xbf16, #tpu.memory_space<vmem>>, vector<1x1x60x10xbf16>
    %592 = vector.shape_cast %591 : vector<1x1x60x10xbf16> to vector<60x10xbf16>
    %cst_456 = arith.constant dense<0.000000e+00> : vector<16x10xf32>
    %593 = tpu.matmul %374, %592, %cst_456 {dimension_numbers = #tpu.dot_dimension_numbers<[1], [0], [0], [1], [0, 0, 1, 1], [], []>} : vector<16x60xbf16>, vector<60x10xbf16>, vector<16x10xf32> -> vector<16x10xf32>
    %c1_457 = arith.constant 1 : index
    %c5_458 = arith.constant 5 : index
    %c0_459 = arith.constant 0 : index
    %c0_460 = arith.constant 0 : index
    %594 = vector.load %arg7[%c1_457, %c5_458, %c0_459, %c0_460] : memref<2x6x1x10xf32, #tpu.memory_space<vmem>>, vector<1x1x1x10xf32>
    %595 = vector.shape_cast %594 : vector<1x1x1x10xf32> to vector<1x10xf32>
    %596 = vector.broadcast %595 : vector<1x10xf32> to vector<16x10xf32>
    %597 = arith.addf %593, %596 : vector<16x10xf32>
    %c1_461 = arith.constant 1 : index
    %c5_462 = arith.constant 5 : index
    %c0_463 = arith.constant 0 : index
    %c0_464 = arith.constant 0 : index
    %598 = vector.load %arg8[%c1_461, %c5_462, %c0_463, %c0_464] : memref<2x6x60x10xbf16, #tpu.memory_space<vmem>>, vector<1x1x60x10xbf16>
    %599 = vector.shape_cast %598 : vector<1x1x60x10xbf16> to vector<60x10xbf16>
    %cst_465 = arith.constant dense<0.000000e+00> : vector<16x10xf32>
    %600 = tpu.matmul %374, %599, %cst_465 {dimension_numbers = #tpu.dot_dimension_numbers<[1], [0], [0], [1], [0, 0, 1, 1], [], []>} : vector<16x60xbf16>, vector<60x10xbf16>, vector<16x10xf32> -> vector<16x10xf32>
    %c1_466 = arith.constant 1 : index
    %c5_467 = arith.constant 5 : index
    %c0_468 = arith.constant 0 : index
    %c0_469 = arith.constant 0 : index
    %601 = vector.load %arg9[%c1_466, %c5_467, %c0_468, %c0_469] : memref<2x6x1x10xf32, #tpu.memory_space<vmem>>, vector<1x1x1x10xf32>
    %602 = vector.shape_cast %601 : vector<1x1x1x10xf32> to vector<1x10xf32>
    %603 = vector.broadcast %602 : vector<1x10xf32> to vector<16x10xf32>
    %604 = arith.addf %600, %603 : vector<16x10xf32>
    %c1_470 = arith.constant 1 : index
    %c5_471 = arith.constant 5 : index
    %c0_472 = arith.constant 0 : index
    %c0_473 = arith.constant 0 : index
    %605 = vector.load %arg10[%c1_470, %c5_471, %c0_472, %c0_473] : memref<2x6x60x10xbf16, #tpu.memory_space<vmem>>, vector<1x1x60x10xbf16>
    %606 = vector.shape_cast %605 : vector<1x1x60x10xbf16> to vector<60x10xbf16>
    %cst_474 = arith.constant dense<0.000000e+00> : vector<16x10xf32>
    %607 = tpu.matmul %374, %606, %cst_474 {dimension_numbers = #tpu.dot_dimension_numbers<[1], [0], [0], [1], [0, 0, 1, 1], [], []>} : vector<16x60xbf16>, vector<60x10xbf16>, vector<16x10xf32> -> vector<16x10xf32>
    %c1_475 = arith.constant 1 : index
    %c5_476 = arith.constant 5 : index
    %c0_477 = arith.constant 0 : index
    %c0_478 = arith.constant 0 : index
    %608 = vector.load %arg11[%c1_475, %c5_476, %c0_477, %c0_478] : memref<2x6x1x10xf32, #tpu.memory_space<vmem>>, vector<1x1x1x10xf32>
    %609 = vector.shape_cast %608 : vector<1x1x1x10xf32> to vector<1x10xf32>
    %610 = vector.broadcast %609 : vector<1x10xf32> to vector<16x10xf32>
    %611 = arith.addf %607, %610 : vector<16x10xf32>
    %612 = arith.truncf %597 : vector<16x10xf32> to vector<16x10xbf16>
    %613 = arith.truncf %604 : vector<16x10xf32> to vector<16x10xbf16>
    %cst_479 = arith.constant dense<0.000000e+00> : vector<16x16xf32>
    %614 = tpu.matmul %612, %613, %cst_479 {dimension_numbers = #tpu.dot_dimension_numbers<[1], [1], [0], [0], [0, 0, 1, 0], [], []>} : vector<16x10xbf16>, vector<16x10xbf16>, vector<16x16xf32> -> vector<16x16xf32>
    %615 = arith.addf %614, %5 : vector<16x16xf32>
    %cst_480 = arith.constant dense<0xFF800000> : vector<16xf32>
    %616 = vector.multi_reduction <maximumf>, %615, %cst_480 [1] : vector<16x16xf32> to vector<16xf32>
    %617 = vector.shape_cast %616 : vector<16xf32> to vector<16x1xf32>
    %618 = vector.broadcast %617 : vector<16x1xf32> to vector<16x16xf32>
    %619 = arith.subf %615, %618 : vector<16x16xf32>
    %620 = math.exp %619 : vector<16x16xf32>
    %cst_481 = arith.constant dense<0.000000e+00> : vector<16xf32>
    %621 = vector.multi_reduction <add>, %620, %cst_481 [1] : vector<16x16xf32> to vector<16xf32>
    %622 = vector.shape_cast %621 : vector<16xf32> to vector<16x1xf32>
    %623 = tpu.reciprocal %622 {approx = true} : vector<16x1xf32> -> vector<16x1xf32>
    %624 = vector.broadcast %623 : vector<16x1xf32> to vector<16x16xf32>
    %625 = arith.mulf %620, %624 : vector<16x16xf32>
    %626 = arith.truncf %625 : vector<16x16xf32> to vector<16x16xbf16>
    %627 = arith.truncf %611 : vector<16x10xf32> to vector<16x10xbf16>
    %cst_482 = arith.constant dense<0.000000e+00> : vector<16x10xf32>
    %628 = tpu.matmul %626, %627, %cst_482 {dimension_numbers = #tpu.dot_dimension_numbers<[1], [0], [0], [1], [0, 0, 1, 1], [], []>} : vector<16x16xbf16>, vector<16x10xbf16>, vector<16x10xf32> -> vector<16x10xf32>
    %629 = arith.truncf %628 : vector<16x10xf32> to vector<16x10xbf16>
    %c1_483 = arith.constant 1 : index
    %c5_484 = arith.constant 5 : index
    %c0_485 = arith.constant 0 : index
    %c0_486 = arith.constant 0 : index
    %630 = vector.load %arg12[%c1_483, %c5_484, %c0_485, %c0_486] : memref<2x6x10x60xbf16, #tpu.memory_space<vmem>>, vector<1x1x10x60xbf16>
    %631 = vector.shape_cast %630 : vector<1x1x10x60xbf16> to vector<10x60xbf16>
    %cst_487 = arith.constant dense<0.000000e+00> : vector<16x60xf32>
    %632 = tpu.matmul %629, %631, %cst_487 {dimension_numbers = #tpu.dot_dimension_numbers<[1], [0], [0], [1], [0, 0, 1, 1], [], []>} : vector<16x10xbf16>, vector<10x60xbf16>, vector<16x60xf32> -> vector<16x60xf32>
    %633 = arith.addf %590, %632 : vector<16x60xf32>
    %634 = arith.addf %349, %633 : vector<16x60xf32>
    %c1_488 = arith.constant 1 : index
    %c0_489 = arith.constant 0 : index
    %c0_490 = arith.constant 0 : index
    %635 = vector.load %arg13[%c1_488, %c0_489, %c0_490] : memref<2x1x60xf32, #tpu.memory_space<vmem>>, vector<1x1x60xf32>
    %636 = vector.shape_cast %635 : vector<1x1x60xf32> to vector<1x60xf32>
    %637 = vector.broadcast %636 : vector<1x60xf32> to vector<16x60xf32>
    %638 = arith.addf %634, %637 : vector<16x60xf32>
    %c1_491 = arith.constant 1 : index
    %c0_492 = arith.constant 0 : index
    %c0_493 = arith.constant 0 : index
    %639 = vector.load %arg14[%c1_491, %c0_492, %c0_493] : memref<2x1x60xf32, #tpu.memory_space<vmem>>, vector<1x1x60xf32>
    %640 = vector.shape_cast %639 : vector<1x1x60xf32> to vector<1x60xf32>
    %c1_494 = arith.constant 1 : index
    %c0_495 = arith.constant 0 : index
    %c0_496 = arith.constant 0 : index
    %641 = vector.load %arg15[%c1_494, %c0_495, %c0_496] : memref<2x1x60xf32, #tpu.memory_space<vmem>>, vector<1x1x60xf32>
    %642 = vector.shape_cast %641 : vector<1x1x60xf32> to vector<1x60xf32>
    %cst_497 = arith.constant dense<0.000000e+00> : vector<16xf32>
    %643 = vector.multi_reduction <add>, %638, %cst_497 [1] : vector<16x60xf32> to vector<16xf32>
    %644 = vector.shape_cast %643 : vector<16xf32> to vector<16x1xf32>
    %cst_498 = arith.constant 6.000000e+01 : f32
    %645 = vector.broadcast %cst_498 : f32 to vector<16x1xf32>
    %646 = arith.divf %644, %645 : vector<16x1xf32>
    %647 = vector.broadcast %646 : vector<16x1xf32> to vector<16x60xf32>
    %648 = arith.subf %638, %647 : vector<16x60xf32>
    %649 = arith.mulf %648, %648 : vector<16x60xf32>
    %cst_499 = arith.constant dense<0.000000e+00> : vector<16xf32>
    %650 = vector.multi_reduction <add>, %649, %cst_499 [1] : vector<16x60xf32> to vector<16xf32>
    %651 = vector.shape_cast %650 : vector<16xf32> to vector<16x1xf32>
    %cst_500 = arith.constant 6.000000e+01 : f32
    %652 = vector.broadcast %cst_500 : f32 to vector<16x1xf32>
    %653 = arith.divf %651, %652 : vector<16x1xf32>
    %cst_501 = arith.constant 9.99999974E-6 : f32
    %654 = vector.broadcast %cst_501 : f32 to vector<16x1xf32>
    %655 = arith.addf %653, %654 : vector<16x1xf32>
    %656 = math.rsqrt %655 : vector<16x1xf32>
    %657 = vector.broadcast %656 : vector<16x1xf32> to vector<16x60xf32>
    %658 = arith.mulf %648, %657 : vector<16x60xf32>
    %659 = vector.broadcast %640 : vector<1x60xf32> to vector<16x60xf32>
    %660 = arith.mulf %658, %659 : vector<16x60xf32>
    %661 = vector.broadcast %642 : vector<1x60xf32> to vector<16x60xf32>
    %662 = arith.addf %660, %661 : vector<16x60xf32>
    %663 = arith.truncf %662 : vector<16x60xf32> to vector<16x60xbf16>
    %c1_502 = arith.constant 1 : index
    %c0_503 = arith.constant 0 : index
    %c0_504 = arith.constant 0 : index
    %664 = vector.load %arg16[%c1_502, %c0_503, %c0_504] : memref<2x60x240xbf16, #tpu.memory_space<vmem>>, vector<1x60x240xbf16>
    %665 = vector.shape_cast %664 : vector<1x60x240xbf16> to vector<60x240xbf16>
    %cst_505 = arith.constant dense<0.000000e+00> : vector<16x240xf32>
    %666 = tpu.matmul %663, %665, %cst_505 {dimension_numbers = #tpu.dot_dimension_numbers<[1], [0], [0], [1], [0, 0, 1, 1], [], []>} : vector<16x60xbf16>, vector<60x240xbf16>, vector<16x240xf32> -> vector<16x240xf32>
    %c1_506 = arith.constant 1 : index
    %c0_507 = arith.constant 0 : index
    %c0_508 = arith.constant 0 : index
    %667 = vector.load %arg17[%c1_506, %c0_507, %c0_508] : memref<2x1x240xf32, #tpu.memory_space<vmem>>, vector<1x1x240xf32>
    %668 = vector.shape_cast %667 : vector<1x1x240xf32> to vector<1x240xf32>
    %669 = vector.broadcast %668 : vector<1x240xf32> to vector<16x240xf32>
    %670 = arith.addf %666, %669 : vector<16x240xf32>
    %cst_509 = arith.constant 0.000000e+00 : f32
    %671 = vector.broadcast %cst_509 : f32 to vector<16x240xf32>
    %672 = arith.maximumf %670, %671 : vector<16x240xf32>
    %673 = arith.truncf %672 : vector<16x240xf32> to vector<16x240xbf16>
    %c1_510 = arith.constant 1 : index
    %c0_511 = arith.constant 0 : index
    %c0_512 = arith.constant 0 : index
    %674 = vector.load %arg18[%c1_510, %c0_511, %c0_512] : memref<2x240x60xbf16, #tpu.memory_space<vmem>>, vector<1x240x60xbf16>
    %675 = vector.shape_cast %674 : vector<1x240x60xbf16> to vector<240x60xbf16>
    %cst_513 = arith.constant dense<0.000000e+00> : vector<16x60xf32>
    %676 = tpu.matmul %673, %675, %cst_513 {dimension_numbers = #tpu.dot_dimension_numbers<[1], [0], [0], [1], [0, 0, 1, 1], [], []>} : vector<16x240xbf16>, vector<240x60xbf16>, vector<16x60xf32> -> vector<16x60xf32>
    %c1_514 = arith.constant 1 : index
    %c0_515 = arith.constant 0 : index
    %c0_516 = arith.constant 0 : index
    %677 = vector.load %arg19[%c1_514, %c0_515, %c0_516] : memref<2x1x60xf32, #tpu.memory_space<vmem>>, vector<1x1x60xf32>
    %678 = vector.shape_cast %677 : vector<1x1x60xf32> to vector<1x60xf32>
    %679 = vector.broadcast %678 : vector<1x60xf32> to vector<16x60xf32>
    %680 = arith.addf %676, %679 : vector<16x60xf32>
    %681 = arith.addf %638, %680 : vector<16x60xf32>
    %682 = arith.truncf %681 : vector<16x60xf32> to vector<16x60xbf16>
    %c0_517 = arith.constant 0 : index
    %c0_518 = arith.constant 0 : index
    %683 = vector.load %arg20[%c0_517, %c0_518] : memref<60x128xbf16, #tpu.memory_space<vmem>>, vector<60x128xbf16>
    %cst_519 = arith.constant dense<0.000000e+00> : vector<16x128xf32>
    %684 = tpu.matmul %682, %683, %cst_519 {dimension_numbers = #tpu.dot_dimension_numbers<[1], [0], [0], [1], [0, 0, 1, 1], [], []>} : vector<16x60xbf16>, vector<60x128xbf16>, vector<16x128xf32> -> vector<16x128xf32>
    %c0_520 = arith.constant 0 : index
    %c0_521 = arith.constant 0 : index
    %685 = vector.load %arg21[%c0_520, %c0_521] : memref<1x128xf32, #tpu.memory_space<vmem>>, vector<1x128xf32>
    %686 = vector.broadcast %685 : vector<1x128xf32> to vector<16x128xf32>
    %687 = arith.addf %684, %686 : vector<16x128xf32>
    %c0_522 = arith.constant 0 : index
    %c0_523 = arith.constant 0 : index
    %c0_524 = arith.constant 0 : index
    %688 = vector.load %arg22[%c0_522, %c0_523, %c0_524] : memref<1x16x128xf32, #tpu.memory_space<vmem>>, vector<1x16x128xf32>
    %689 = vector.shape_cast %688 : vector<1x16x128xf32> to vector<16x128xf32>
    %690 = vector.shape_cast %687 : vector<16x128xf32> to vector<1x16x128xf32>
    tpu.vector_store %arg22[%c0_522, %c0_523, %c0_524], %690 {strides = array<i32>} : memref<1x16x128xf32, #tpu.memory_space<vmem>>, vector<1x16x128xf32>,
    return
  }
  func.func @transform_0(%arg0: i32) -> (i32, i32, i32) {
    %c0_i32 = arith.constant 0 : i32
    %c0_i32_0 = arith.constant 0 : i32
    %c0_i32_1 = arith.constant 0 : i32
    return %arg0, %c0_i32, %c0_i32_0 : i32, i32, i32
  }
  func.func @transform_1(%arg0: i32) -> (i32, i32) {
    %c0_i32 = arith.constant 0 : i32
    %c0_i32_0 = arith.constant 0 : i32
    %c0_i32_1 = arith.constant 0 : i32
    return %c0_i32, %c0_i32_0 : i32, i32
  }
  func.func @transform_2(%arg0: i32) -> (i32, i32) {
    %c0_i32 = arith.constant 0 : i32
    %c0_i32_0 = arith.constant 0 : i32
    %c0_i32_1 = arith.constant 0 : i32
    return %c0_i32, %c0_i32_0 : i32, i32
  }
  func.func @transform_3(%arg0: i32) -> (i32, i32, i32) {
    %c0_i32 = arith.constant 0 : i32
    %c0_i32_0 = arith.constant 0 : i32
    %c0_i32_1 = arith.constant 0 : i32
    %c0_i32_2 = arith.constant 0 : i32
    return %c0_i32, %c0_i32_0, %c0_i32_1 : i32, i32, i32
  }
  func.func @transform_4(%arg0: i32) -> (i32, i32, i32) {
    %c0_i32 = arith.constant 0 : i32
    %c0_i32_0 = arith.constant 0 : i32
    %c0_i32_1 = arith.constant 0 : i32
    %c0_i32_2 = arith.constant 0 : i32
    return %c0_i32, %c0_i32_0, %c0_i32_1 : i32, i32, i32
  }
  func.func @transform_5(%arg0: i32) -> (i32, i32, i32, i32) {
    %c0_i32 = arith.constant 0 : i32
    %c0_i32_0 = arith.constant 0 : i32
    %c0_i32_1 = arith.constant 0 : i32
    %c0_i32_2 = arith.constant 0 : i32
    %c0_i32_3 = arith.constant 0 : i32
    return %c0_i32, %c0_i32_0, %c0_i32_1, %c0_i32_2 : i32, i32, i32, i32
  }
  func.func @transform_6(%arg0: i32) -> (i32, i32, i32, i32) {
    %c0_i32 = arith.constant 0 : i32
    %c0_i32_0 = arith.constant 0 : i32
    %c0_i32_1 = arith.constant 0 : i32
    %c0_i32_2 = arith.constant 0 : i32
    %c0_i32_3 = arith.constant 0 : i32
    return %c0_i32, %c0_i32_0, %c0_i32_1, %c0_i32_2 : i32, i32, i32, i32
  }
  func.func @transform_7(%arg0: i32) -> (i32, i32, i32, i32) {
    %c0_i32 = arith.constant 0 : i32
    %c0_i32_0 = arith.constant 0 : i32
    %c0_i32_1 = arith.constant 0 : i32
    %c0_i32_2 = arith.constant 0 : i32
    %c0_i32_3 = arith.constant 0 : i32
    return %c0_i32, %c0_i32_0, %c0_i32_1, %c0_i32_2 : i32, i32, i32, i32
  }
  func.func @transform_8(%arg0: i32) -> (i32, i32, i32, i32) {
    %c0_i32 = arith.constant 0 : i32
    %c0_i32_0 = arith.constant 0 : i32
    %c0_i32_1 = arith.constant 0 : i32
    %c0_i32_2 = arith.constant 0 : i32
    %c0_i32_3 = arith.constant 0 : i32
    return %c0_i32, %c0_i32_0, %c0_i32_1, %c0_i32_2 : i32, i32, i32, i32
  }
  func.func @transform_9(%arg0: i32) -> (i32, i32, i32, i32) {
    %c0_i32 = arith.constant 0 : i32
    %c0_i32_0 = arith.constant 0 : i32
    %c0_i32_1 = arith.constant 0 : i32
    %c0_i32_2 = arith.constant 0 : i32
    %c0_i32_3 = arith.constant 0 : i32
    return %c0_i32, %c0_i32_0, %c0_i32_1, %c0_i32_2 : i32, i32, i32, i32
  }
  func.func @transform_10(%arg0: i32) -> (i32, i32, i32, i32) {
    %c0_i32 = arith.constant 0 : i32
    %c0_i32_0 = arith.constant 0 : i32
    %c0_i32_1 = arith.constant 0 : i32
    %c0_i32_2 = arith.constant 0 : i32
    %c0_i32_3 = arith.constant 0 : i32
    return %c0_i32, %c0_i32_0, %c0_i32_1, %c0_i32_2 : i32, i32, i32, i32
  }
  func.func @transform_11(%arg0: i32) -> (i32, i32, i32, i32) {
    %c0_i32 = arith.constant 0 : i32
    %c0_i32_0 = arith.constant 0 : i32
    %c0_i32_1 = arith.constant 0 : i32
    %c0_i32_2 = arith.constant 0 : i32
    %c0_i32_3 = arith.constant 0 : i32
    return %c0_i32, %c0_i32_0, %c0_i32_1, %c0_i32_2 : i32, i32, i32, i32
  }
  func.func @transform_12(%arg0: i32) -> (i32, i32, i32) {
    %c0_i32 = arith.constant 0 : i32
    %c0_i32_0 = arith.constant 0 : i32
    %c0_i32_1 = arith.constant 0 : i32
    %c0_i32_2 = arith.constant 0 : i32
    return %c0_i32, %c0_i32_0, %c0_i32_1 : i32, i32, i32
  }
  func.func @transform_13(%arg0: i32) -> (i32, i32, i32) {
    %c0_i32 = arith.constant 0 : i32
    %c0_i32_0 = arith.constant 0 : i32
    %c0_i32_1 = arith.constant 0 : i32
    %c0_i32_2 = arith.constant 0 : i32
    return %c0_i32, %c0_i32_0, %c0_i32_1 : i32, i32, i32
  }
  func.func @transform_14(%arg0: i32) -> (i32, i32, i32) {
    %c0_i32 = arith.constant 0 : i32
    %c0_i32_0 = arith.constant 0 : i32
    %c0_i32_1 = arith.constant 0 : i32
    %c0_i32_2 = arith.constant 0 : i32
    return %c0_i32, %c0_i32_0, %c0_i32_1 : i32, i32, i32
  }
  func.func @transform_15(%arg0: i32) -> (i32, i32, i32) {
    %c0_i32 = arith.constant 0 : i32
    %c0_i32_0 = arith.constant 0 : i32
    %c0_i32_1 = arith.constant 0 : i32
    %c0_i32_2 = arith.constant 0 : i32
    return %c0_i32, %c0_i32_0, %c0_i32_1 : i32, i32, i32
  }
  func.func @transform_16(%arg0: i32) -> (i32, i32, i32) {
    %c0_i32 = arith.constant 0 : i32
    %c0_i32_0 = arith.constant 0 : i32
    %c0_i32_1 = arith.constant 0 : i32
    %c0_i32_2 = arith.constant 0 : i32
    return %c0_i32, %c0_i32_0, %c0_i32_1 : i32, i32, i32
  }
  func.func @transform_17(%arg0: i32) -> (i32, i32, i32) {
    %c0_i32 = arith.constant 0 : i32
    %c0_i32_0 = arith.constant 0 : i32
    %c0_i32_1 = arith.constant 0 : i32
    %c0_i32_2 = arith.constant 0 : i32
    return %c0_i32, %c0_i32_0, %c0_i32_1 : i32, i32, i32
  }
  func.func @transform_18(%arg0: i32) -> (i32, i32, i32) {
    %c0_i32 = arith.constant 0 : i32
    %c0_i32_0 = arith.constant 0 : i32
    %c0_i32_1 = arith.constant 0 : i32
    %c0_i32_2 = arith.constant 0 : i32
    return %c0_i32, %c0_i32_0, %c0_i32_1 : i32, i32, i32
  }
  func.func @transform_19(%arg0: i32) -> (i32, i32) {
    %c0_i32 = arith.constant 0 : i32
    %c0_i32_0 = arith.constant 0 : i32
    %c0_i32_1 = arith.constant 0 : i32
    return %c0_i32, %c0_i32_0 : i32, i32
  }
  func.func @transform_20(%arg0: i32) -> (i32, i32) {
    %c0_i32 = arith.constant 0 : i32
    %c0_i32_0 = arith.constant 0 : i32
    %c0_i32_1 = arith.constant 0 : i32
    return %c0_i32, %c0_i32_0 : i32, i32
  }
  func.func @transform_21(%arg0: i32) -> (i32, i32, i32) {
    %c0_i32 = arith.constant 0 : i32
    %c0_i32_0 = arith.constant 0 : i32
    %c0_i32_1 = arith.constant 0 : i32
    return %arg0, %c0_i32, %c0_i32_0 : i32, i32, i32
  }
}

</mosaic_0001>

<bundles_post_ra>
// kernel: tpu_custom_call.1
= control target key start
LH: loop header
LB: loop body
LE: loop exit
PB: predicated region body
PF: predicated region fallthrough
CT: control target
= control target key end

     0   :  { %s10761_s0 = inlined_call_operand.vmem [shape: s32[2,16,1], index: 0, kind: input, shape index: {}]   ;;  %s10762_s1 = inlined_call_operand.vmem [shape: bf16[65,60], index: 1, kind: input, shape index: {}]   ;;  %s10763_s2 = inlined_call_operand.vmem [shape: f32[16,60], index: 2, kind: input, shape index: {}]   ;;  %s10764_s3 = inlined_call_operand.vmem [shape: f32[2,1,60], index: 3, kind: input, shape index: {}]   ;;  %s10765_s4 = inlined_call_operand.vmem [shape: f32[2,1,60], index: 4, kind: input, shape index: {}]   ;;  %s10766_s5 = inlined_call_operand.vmem [shape: bf16[2,6,60,10], index: 5, kind: input, shape index: {}]   ;;  %s10767_s6 = inlined_call_operand.vmem [shape: f32[2,6,1,10], index: 6, kind: input, shape index: {}]   ;;  %s10768_s7 = inlined_call_operand.vmem [shape: bf16[2,6,60,10], index: 7, kind: input, shape index: {}]   ;;  %s10769_s8 = inlined_call_operand.vmem [shape: f32[2,6,1,10], index: 8, kind: input, shape index: {}]   ;;  %s10770_s9 = inlined_call_operand.vmem [shape: bf16[2,6,60,10], index: 9, kind: input, shape index: {}]   ;;  %s10771_s10 = inlined_call_operand.vmem [shape: f32[2,6,1,10], index: 10, kind: input, shape index: {}]   ;;  %s10772_s11 = inlined_call_operand.vmem [shape: bf16[2,6,10,60], index: 11, kind: input, shape index: {}]   ;;  %s10773_s12 = inlined_call_operand.vmem [shape: f32[2,1,60], index: 12, kind: input, shape index: {}]   ;;  %s10774_s13 = inlined_call_operand.vmem [shape: f32[2,1,60], index: 13, kind: input, shape index: {}]   ;;  %s10775_s14 = inlined_call_operand.vmem [shape: f32[2,1,60], index: 14, kind: input, shape index: {}]   ;;  %s10776_s15 = inlined_call_operand.vmem [shape: bf16[2,60,240], index: 15, kind: input, shape index: {}]   ;;  %s10777_s16 = inlined_call_operand.vmem [shape: f32[2,1,240], index: 16, kind: input, shape index: {}]   ;;  %s10778_s17 = inlined_call_operand.vmem [shape: bf16[2,240,60], index: 17, kind: input, shape index: {}]   ;;  %s10779_s18 = inlined_call_operand.vmem [shape: f32[2,1,60], index: 18, kind: input, shape index: {}]   ;;  %s10780_s19 = inlined_call_operand.vmem [shape: bf16[60,128], index: 19, kind: input, shape index: {}]   ;;  %s10781_s20 = inlined_call_operand.vmem [shape: f32[1,128], index: 20, kind: input, shape index: {}]   ;;  %s10782_s21 = inlined_call_operand.hbm [shape: f32[2,16,128], index: 21, kind: output, shape index: {}]  }
   0x1   :  { %10798 = sst [smem:[#allocation11_spill]] %s10761_s0 }
   0x2   :  { %10799 = sst [smem:[#allocation12_spill]] %s10762_s1 }
   0x3   :  { %10800 = sst [smem:[#allocation13_spill]] %s10763_s2 }
   0x4   :  { %10801 = sst [smem:[#allocation14_spill]] %s10764_s3 }
   0x5   :  { %10802 = sst [smem:[#allocation15_spill]] %s10765_s4 }
   0x6   :  { %10803 = sst [smem:[#allocation16_spill]] %s10766_s5 }
   0x7   :  { %10804 = sst [smem:[#allocation17_spill]] %s10767_s6 }
   0x8   :  { %10805 = sst [smem:[#allocation18_spill]] %s10768_s7 }
   0x9   :  { %10806 = sst [smem:[#allocation19_spill]] %s10782_s21 }
   0xa   :  { %26 = vsyncpa [#allocation3], 0 }
   0xb   :  { %28 = vsyncpa [#allocation3 + $0x1], 0  ;;  %s9057_s2 = smov 0   ;;  %s9059_s25 = smov 0  }
   0xc   :  { %s9061_s26 = smov 0   ;;  %s9063_s27 = smov 0  }
   0xd LB: > { %10807 = sst [smem:[#allocation5_spill]] %s8926_s2  ;;  %s9078_s3 = sadd.s32 4294967295, %s8938_s27   ;;  %s8938_s27 = sphi %s9063_s27, %s10828_s27   ;;  %s8934_s26 = sphi %s9061_s26, %s10830_s26   ;;  %s8930_s25 = sphi %s9059_s25, %s10832_s25   ;;  %s8926_s2 = sphi %s9057_s2, %s10831_s2  }
   0xe   : > { %10808 = sst [smem:[#allocation6_spill]] %s8934_s26  ;;  %s6844_s28 = sadd.s32 4294967294, %s8938_s27  }
   0xf   : > { %10809 = sst [smem:[#allocation7_spill]] %s8938_s27  ;;  %s9082_s29 = sadd.s32 1, %s8938_s27  }
  0x10   : > { %10810 = sst [smem:[#allocation8_spill]] %s9082_s29  ;;  %s487_s0 = sadd.s32 1, %s8934_s26 }
  0x11   : > { %s484_s4 = ssub.s32 %s8938_s27, %s9082_s29  ;;  %p497_p0 = scmp.ne.s32.totalorder %s8934_s26, %s8930_s25 }
  0x12   : > { %p485_p1 = scmp.eq.s32.totalorder %s484_s4, 0  ;;  %p498_p2 = scmp.eq.s32.totalorder %s9078_s3, 1 }
  0x13   : > { %p503_p3 = scmp.ne.s32.totalorder %s8930_s25, %s8926_s2  ;;  %p504_p4 = scmp.eq.s32.totalorder %s6844_s28, 1 }
  0x14   : > { %s9093_s30 = scalar_select %p485_p1, %s8934_s26, %s487_s0  }
  0x15   : > { %p9095_p5 = por %p498_p2, %p497_p0  ;;  %p9099_p6 = por %p504_p4, %p503_p3 }
  0x16   : > { %10811 = sst [smem:[#allocation9_spill]] %s9093_s30  ;;  %p6847_p7 = scmp.ge.s32.totalorder %s8938_s27, 1 }
  0x17   : > { %s10813_s22 = scalar_select %p9099_p6, 1, 0 }
  0x18   : > { %p590_p8 = scmp.lt.s32.totalorder %s8938_s27, 3 }
  0x19   : > { %10814 = sst [smem:[#allocation10_spill]] %s10813_s22 }
  0x1a   : > { %p591_p9 = pnand %p6847_p7, %p590_p8 }
  0x1b   : > { %p650_p10 = scmp.lt.s32.totalorder (!%p591_p9), %s9078_s3, 1  ;;  %s10815_s24 = sld [smem:[#allocation12_spill]] (!%p591_p9) }
  0x1c   : > { %594 = sbr.rel (%p591_p9) target bundleno = 13859 (0x3623), region = 104  ;;  %s10816_s22 = sld [smem:[#allocation11_spill]] (!%p591_p9) }
  0x1d   : > { %s10818_s29 = sld [smem:[#allocation16_spill]] (!%p591_p9)  ;;  %s7563_s21 = sshll.u32 (!%p591_p9), %s9078_s3, 8 }
  0x1e   : > { %s10819_s7 = sld [smem:[#allocation18_spill]] (!%p591_p9) }
  0x1f   : > { %s10822_s4 = sld [smem:[#allocation15_spill]] (!%p591_p9) }
  0x20   : > { %s10823_s6 = sld [smem:[#allocation17_spill]] (!%p591_p9) }
  0x21   : > { %vm722_vm0 = vcmask 1040384   ;;  %v8940_v0 = vmov 0   ;;  %v8941_v1 = vmov 0.0   ;;  %v8547_v2 = vld [vmem:[%s10815_s24 + $0x20] ss:$0 sps:$4 sm:$0x11]   ;;  %v656_v11 = vlaneseq }
  0x22   : > { %8546 = vset.pattern.permute.xlu0 %v8940_v0  ;;  %7827 = vmatprep.subr.bf16.mxu0 %v8941_v1  ;;  %v724_v3 = vsel %vm722_vm0, 65535, %v8940_v0  ;;  %s651_s28 = scalar_select %p650_p10, %s9078_s3, 1  ;;  %v8548_v5 = vld [vmem:[%s10815_s24 + $0x18] sm:$0xff]   ;;  %v8549_v8 = vld [vmem:[%s10815_s24 + $0x10] sm:$0xff]   ;;  %vm8942_vm1 = vmmov 0   ;;  %v8550_v9 = vld [vmem:[%s10815_s24 + $0x8] sm:$0xff]  }
  0x23   : > { %7853 = vmatprep.subr.bf16.mxu1 %v8941_v1  ;;  %v726_v4 = vand.u32 %v8547_v2, %v724_v3  ;;  %7837 = vmatprep.mubr.msk.bf16.mxu0 %vm8942_vm1, %v8941_v1  ;;  %v8551_v10 = vld [vmem:[%s10815_s24] sm:$0xff]   ;;  %v9139_v12 = vand.u32 127, %v656_v11  ;;  %vm718_vm2 = vcmask 531456   ;;  %vm771_vm5 = vcmask 490496   ;;  %v8552_v38 = vld [vmem:[%s10818_s29 + $0x18] sm:$0x3f]  }
  0x24   : > { %s7562_s0 = sshll.u32 %s651_s28, 4  ;;  %7861 = vmatprep.mubr.msk.bf16.mxu1 %vm8942_vm1, %v8941_v1  ;;  %vm857_vm6 = vcmask 1045504   ;;  %v8553_v39 = vld [vmem:[%s10819_s7 + $0x18] sm:$0x3f]   ;;  %v8554_v42 = vld [vmem:[%s10818_s29 + $0x10] sm:$0xff]   ;;  %v8556_v44 = vld [vmem:[%s10818_s29 + $0x8] sm:$0xff]  }
  0x25   : > { %s654_s2 = scalar_lea.vmem %s10816_s22, %s7562_s0  ;;  %7828 = vmatpush3.bf16.msra.mxu0 %v726_v4  ;;  %s10817_s0 = sld [smem:[#allocation13_spill]]  ;;  %v859_v40 = vsel %vm857_vm6, %v8552_v38, 0  ;;  %v941_v41 = vsel %vm857_vm6, %v8553_v39, 0  ;;  %v8555_v43 = vld [vmem:[%s10819_s7 + $0x10] sm:$0xff]   ;;  %v8557_v45 = vld [vmem:[%s10819_s7 + $0x8] sm:$0xff]   ;;  %v8558_v46 = vld [vmem:[%s10818_s29] sm:$0xff]  }
  0x26   : > { %v665_v6 = vld [vmem:[%s654_s2] sm:$0xff]  ;;  %7829 = vmatprep.subr.bf16.mxu0 %v8941_v1  ;;  %v666_v7 = vld [vmem:[%s654_s2 + $0x8] sm:$0xff]  ;;  %7854 = vmatpush3.bf16.msra.mxu1 %v941_v41  ;;  %s10820_s2 = sld [smem:[#allocation14_spill]]  ;;  %v8560_v62 = vld [vmem:[%s10770_s9 + $0x18] sm:$0x3f]   ;;  %vm1068_vm7 = vcmask 80896  }
  0x27   : > { %668 = vperm.xlu0 %8546, %v665_v6   ;;  %7855 = vmatprep.subr.bf16.mxu1 %v8941_v1  ;;  %v8559_v47 = vld [vmem:[%s10819_s7] sm:$0xff]   ;;  %v1023_v4 = vsel %vm857_vm6, %v8560_v62, 0  ;;  %v8562_v6 = vld [vmem:[%s10770_s9 + $0x8] sm:$0xff]   ;;  %vm1116_vm10 = vcmask 130048   ;;  %vm1569_vm11 = vcmask 1044480   ;;  %vm3673_vm12 = vcmask 916480  }
  0x28   : > { %v6860_v60 = vld [vmem:[%s10822_s4] ss:$0 sm:$0xff]  ;;  %v8566_v39 = vld [vmem:[%s10818_s29 + $0x28] sm:$0xff]   ;;  %s647_s28 = sand.u32 1, %s8930_s25   ;;  %s10824_s22 = sld [smem:[#allocation19_spill]] }
  0x29   : > { %7830 = vmatpush3.bf16.msra.mxu0 %v8548_v5  ;;  %v8561_v5 = vld [vmem:[%s10770_s9 + $0x10] sm:$0xff]   ;;  %v8567_v41 = vld [vmem:[%s10818_s29 + $0x20] sm:$0xff]   ;;  %s6848_s23 = sshll.u32 %s647_s28, 4  ;;  %s10721_s24 = scalar_lea.sflag [#allocation3], %s647_s28 }
  0x2a   : > { %7831 = vmatprep.subr.bf16.mxu0 %v8941_v1  ;;  %7856 = vmatpush3.bf16.msra.mxu1 %v8555_v43  ;;  %s649_s26 = scalar_lea.vmem [#allocation2], %s6848_s23  ;;  %s8944_s3 = smov [#allocation2]  }
  0x2b   : > { %671 = vperm.xlu0 %8546, %v666_v7   ;;  %v689_v18 = vld [vmem:[%s10817_s0] sm:$0xff]  ;;  %v690_v22 = vld [vmem:[%s10817_s0 + $0x8] sm:$0xff]  ;;  %7857 = vmatprep.subr.bf16.mxu1 %v8941_v1  ;;  %s6782_s0 = sshll.u32 %s649_s26, 4  ;;  %s8882_s1 = sshll.u32 %s8944_s3, 4  ;;  %s10714_s0 = int_to_ptr.vmem [resolvable:$true] %s6782_s0  ;;  %s8883_s1 = int_to_ptr.vmem [resolvable:$false] %s8882_s1 }
  0x2c   : > { %s10821_s30 = smov %s10820_s2  ;;  %v6859_v56 = vld [vmem:[%s10820_s2] ss:$0 sm:$0xff]  ;;  %s8878_s23 = scalar_lea.vmem %s10714_s0, 256 }
  0x2d   : > { %7832 = vmatpush3.bf16.msra.mxu0 %v8549_v8  ;;  %v8563_v7 = vld [vmem:[%s10770_s9] sm:$0xff]   ;;  %p8879_p11 = scmp.ne.s32.totalorder %s10714_s0, %s8878_s23  ;;  %p8885_p0 = scmp.lt.s32.totalorder %s10714_s0, %s8883_s1 }
  0x2e   : > { %7833 = vmatprep.subr.bf16.mxu0 %v8941_v1  ;;  %7858 = vmatpush3.bf16.msra.mxu1 %v8557_v45  ;;  %v8570_v45 = vld [vmem:[%s10770_s9 + $0x28] sm:$0xff]  }
  0x2f   : > { %7859 = vmatprep.subr.bf16.mxu1 %v8941_v1  ;;  %p8880_p12 = pnand %p8879_p11, %p9095_p5 }
  0x31   : > { %7834 = vmatpush3.bf16.msra.mxu0 %v8550_v9  ;;  %p8881_p13 = pneg %p8880_p12 }
  0x32   : > { %7835 = vmatprep.subr.bf16.mxu0 %v8941_v1  ;;  %7860 = vmatpush3.bf16.msra.mxu1 %v8559_v47  ;;  %v9294_v47 = vshrl.u32 %v656_v11, 7 }
  0x33   : > { %7877 = vmatprep.subr.bf16.mxu1 %v8941_v1 }
  0x34   : > { %vm661_vm8 = vcmp.le.s32.totalorder %v9139_v12, %v9294_v47 }
  0x35   : > { %7836 = vmatpush3.bf16.msra.mxu0 %v8551_v10  ;;  %v6867_v10 = vld [vmem:[%s10769_s8] ss:$0 sm:$0xff] }
  0x36   : > { %7841 = vmatprep.subr.bf16.mxu0 %v8941_v1 }
  0xa2   : > { %v669_v13 = vpop.permute.xlu0 %668 }
  0xa3   : > { %vm673_vm3 = vcmp.eq.s32.totalorder %v669_v13, %v9139_v12 }
  0xa4   : > { %v6851_v15 = vsel %vm673_vm3, 1.0, %v8941_v1 }
  0xa6   : > { %v672_v14 = vpop.permute.xlu0 %671 }
  0xa7   : > { %vm674_vm4 = vcmp.eq.s32.totalorder %v672_v14, %v9139_v12 }
  0xa8   : > { %v6852_v16 = vsel %vm674_vm4, 1.0, %v8941_v1 }
  0xa9   : > { %v679_v17 = vpack.c.bf16 %v6852_v16, %v6851_v15 }
  0xab   : > { %7838 = vmatmul.mubr.msk.bf16.vlgmr.msra.gmra.mxu0 %vm718_vm2, %v679_v17 }
  0xac   : > { %7849 = vmatprep.mubr.msk.bf16.mxu0 %vm8942_vm1, %v8941_v1  ;;  %7842 = vmatpush3.bf16.msra.mxu0 %v859_v40 }
  0xad   : > { %7843 = vmatprep.subr.bf16.mxu0 %v8941_v1 }
  0xb0   : > { %7844 = vmatpush3.bf16.msra.mxu0 %v8554_v42  ;;  %v8568_v42 = vld [vmem:[%s10770_s9 + $0x38] sm:$0x3f]  }
  0xb1   : > { %7845 = vmatprep.subr.bf16.mxu0 %v8941_v1  ;;  %v1397_v43 = vsel %vm857_vm6, %v8568_v42, 0 }
  0xb4   : > { %7846 = vmatpush3.bf16.msra.mxu0 %v8556_v44  ;;  %v8569_v44 = vld [vmem:[%s10770_s9 + $0x30] sm:$0xff]  }
  0xb5   : > { %7847 = vmatprep.subr.bf16.mxu0 %v8941_v1 }
  0xb8   : > { %7848 = vmatpush3.bf16.msra.mxu0 %v8558_v46  ;;  %v8571_v46 = vld [vmem:[%s10770_s9 + $0x20] sm:$0xff]  }
  0xb9   : > { %7865 = vmatprep.subr.bf16.mxu0 %v8941_v1 }
 0x16b   : > { %v762_v19 = vpop.f32.mrf.mxu0 }
 0x16c   : > { %v9150_v20 = vadd.f32 %v762_v19, %v689_v18 }
 0x16d   : > { %v7839_v21 = vpop.f32.mrf.mxu0 }
 0x16e   : > { %v772_v23 = vsel %vm771_vm5, %v9150_v20, 0.0 }
 0x16f   : > { %773 = vadd.xlane.f32.xlu1 %v772_v23  ;;  %v765_v24 = vpop.f32.mrf.mxu0 }
 0x170   : > { %v9157_v25 = vadd.f32 %v765_v24, %v690_v22  ;;  %v6861_v24 = vld [vmem:[%s10823_s6] ss:$0 sm:$0xff] }
 0x171   : > { %v7840_v26 = vpop.f32.mrf.mxu0 }
 0x172   : > { %v775_v27 = vsel %vm771_vm5, %v9157_v25, 0.0 }
 0x173   : > { %776 = vadd.xlane.f32.xlu1 %v775_v27  ;;  %v8564_v27 = vld [vmem:[%s10818_s29 + $0x38] sm:$0x3f]  }
 0x1f8   : > { %v774_v28 = vpop.xlane.xlu1 %773 }
 0x1f9   : > { %v779_v29 = vmul.f32 0.016666668, %v774_v28 }
 0x1fb   : > { %v781_v30 = vsub.f32 %v9150_v20, %v779_v29 }
 0x1fc   : > { %v777_v31 = vpop.xlane.xlu1 %776 }
 0x1fd   : > { %v780_v32 = vmul.f32 0.016666668, %v777_v31  ;;  %v783_v33 = vmul.f32 %v781_v30, %v781_v30 }
 0x1ff   : > { %v782_v34 = vsub.f32 %v9157_v25, %v780_v32  ;;  %v785_v35 = vsel %vm771_vm5, %v783_v33, 0.0  ;;  %v6873_v32 = vld [vmem:[%s10771_s10] ss:$0 sm:$0xff] }
 0x200   : > { %786 = vadd.xlane.f32.xlu0 %v785_v35 }
 0x201   : > { %v784_v36 = vmul.f32 %v782_v34, %v782_v34 }
 0x203   : > { %v788_v37 = vsel %vm771_vm5, %v784_v36, 0.0 }
 0x204   : > { %789 = vadd.xlane.f32.xlu1 %v788_v37 }
 0x289   : > { %v787_v48 = vpop.xlane.xlu0 %786 }
 0x28a   : > { %v791_v49 = vmul.f32 0.016666668, %v787_v48  ;;  %v658_v48 = vadd.s32 8, %v9294_v47 }
 0x28c   : > { %v793_v50 = vadd.f32 1e-05, %v791_v49  ;;  %v8943_v49 = vmov -1e+30   ;;  %vm662_vm9 = vcmp.le.s32.totalorder %v9139_v12, %v658_v48  ;;  %v6890_v12 = vld [vmem:[%s10823_s6 + $0x1] ss:$0 sm:$0xff] }
 0x28d   : > { %v790_v51 = vpop.xlane.xlu1 %789 }
 0x28e   : > { %8766 = vrsqrt.f32 %v793_v50  ;;  %v792_v52 = vmul.f32 0.016666668, %v790_v51  ;;  %v9299_v50 = vsel %vm661_vm8, 0.0, %v8943_v49 }
 0x290   : > { %v794_v53 = vadd.f32 1e-05, %v792_v52 }
 0x292   : > { %8768 = vrsqrt.f32 %v794_v53  ;;  %v9303_v53 = vsel %vm662_vm9, 0.0, %v8943_v49 }
 0x29b   : > { %v8767_v54 = vpop.eup %8766 }
 0x29c   : > { %v797_v55 = vmul.f32 %v8767_v54, %v781_v30  ;;  %v1229_v30 = vsel %vm857_vm6, %v8564_v27, 0 }
 0x29e   : > { %v805_v58 = vmul.f32 %v6859_v56, %v797_v55 }
 0x29f   : > { %v8769_v57 = vpop.eup %8768 }
 0x2a0   : > { %v798_v59 = vmul.f32 %v8769_v57, %v782_v34  ;;  %v813_v63 = vadd.f32 %v6860_v60, %v805_v58  ;;  %v8565_v34 = vld [vmem:[%s10818_s29 + $0x30] sm:$0xff]  }
 0x2a2   : > { %v806_v61 = vmul.f32 %v6859_v56, %v798_v59 }
 0x2a4   : > { %v814_v2 = vadd.f32 %v6860_v60, %v806_v61 }
 0x2a6   : > { %v9208_v3 = vpack.c.bf16 %v814_v2, %v813_v63 }
 0x2a8   : > { %7850 = vmatmul.mubr.msk.bf16.vlgmr.msra.gmra.mxu0 %vm771_vm5, %v9208_v3  ;;  %7862 = vmatmul.mubr.msk.bf16.vlgmr.msra.gmra.mxu1 %vm771_vm5, %v9208_v3 }
 0x2a9   : > { %7866 = vmatpush3.bf16.msra.mxu0 %v1023_v4  ;;  %7873 = vmatprep.mubr.msk.bf16.mxu0 %vm8942_vm1, %v8941_v1 }
 0x2aa   : > { %7867 = vmatprep.subr.bf16.mxu0 %v8941_v1  ;;  %7879 = vmatprep.mubr.msk.bf16.mxu1 %vm8942_vm1, %v8941_v1 }
 0x2ad   : > { %7868 = vmatpush3.bf16.msra.mxu0 %v8561_v5 }
 0x2ae   : > { %7869 = vmatprep.subr.bf16.mxu0 %v8941_v1 }
 0x2b1   : > { %7870 = vmatpush3.bf16.msra.mxu0 %v8562_v6  ;;  %v6920_v6 = vld [vmem:[%s10771_s10 + $0x1] ss:$0 sm:$0xff] }
 0x2b2   : > { %7871 = vmatprep.subr.bf16.mxu0 %v8941_v1 }
 0x2b5   : > { %7872 = vmatpush3.bf16.msra.mxu0 %v8563_v7 }
 0x2b6   : > { %7883 = vmatprep.subr.bf16.mxu0 %v8941_v1 }
 0x2b8   : > { %7874 = vmatmul.mubr.msk.bf16.vlgmr.msra.gmra.mxu0 %vm771_vm5, %v9208_v3 }
 0x2b9   : > { %7885 = vmatprep.mubr.msk.bf16.mxu0 %vm8942_vm1, %v8941_v1 }
 0x368   : > { %v895_v8 = vpop.f32.mrf.mxu0  ;;  %v977_v9 = vpop.f32.mrf.mxu1 }
 0x369   : > { %v978_v17 = vadd.f32 %v6867_v10, %v977_v9  ;;  %v896_v28 = vadd.f32 %v6861_v24, %v895_v8 }
 0x36a   : > { %v7851_v13 = vpop.f32.mrf.mxu0  ;;  %v7863_v14 = vpop.f32.mrf.mxu1 }
 0x36c   : > { %v898_v15 = vpop.f32.mrf.mxu0  ;;  %v980_v16 = vpop.f32.mrf.mxu1 }
 0x36d   : > { %v981_v18 = vadd.f32 %v6867_v10, %v980_v16  ;;  %v899_v26 = vadd.f32 %v6861_v24, %v898_v15 }
 0x36e   : > { %v7852_v19 = vpop.f32.mrf.mxu0  ;;  %v7864_v21 = vpop.f32.mrf.mxu1 }
 0x36f   : > { %v1067_v22 = vpack.c.bf16 %v981_v18, %v978_v17  ;;  %v1066_v29 = vpack.c.bf16 %v899_v26, %v896_v28 }
 0x371   : > { %v1073_v23 = vsel %vm1068_vm7, %v1067_v22, 0 }
 0x372   : > { %7878 = vmatpush3.bf16.xpose.msra.mxu1 %v1073_v23 }
 0x373   : > { %7889 = vmatprep.subr.bf16.mxu1 %v8941_v1 }
 0x378   : > { %v1059_v31 = vpop.f32.mrf.mxu0 }
 0x379   : > { %7880 = vmatmul.mubr.msk.bf16.vlgmr.msra.gmra.mxu1 %vm1068_vm7, %v1066_v29  ;;  %v1060_v36 = vadd.f32 %v6873_v32, %v1059_v31 }
 0x37a   : > { %v7875_v33 = vpop.f32.mrf.mxu0  ;;  %7890 = vmatpush3.bf16.msra.mxu1 %v1229_v30  ;;  %7897 = vmatprep.mubr.msk.bf16.mxu1 %vm8942_vm1, %v8941_v1  ;;  %v8572_v30 = vld [vmem:[%s10819_s7 + $0x38] sm:$0x3f]  }
 0x37b   : > { %7891 = vmatprep.subr.bf16.mxu1 %v8941_v1 }
 0x37c   : > { %v1062_v35 = vpop.f32.mrf.mxu0 }
 0x37d   : > { %v1063_v37 = vadd.f32 %v6873_v32, %v1062_v35  ;;  %v1313_v35 = vsel %vm857_vm6, %v8572_v30, 0 }
 0x37e   : > { %v7876_v38 = vpop.f32.mrf.mxu0  ;;  %7892 = vmatpush3.bf16.msra.mxu1 %v8565_v34 }
 0x37f   : > { %v1140_v40 = vpack.c.bf16 %v1063_v37, %v1060_v36  ;;  %7893 = vmatprep.subr.bf16.mxu1 %v8941_v1  ;;  %v8573_v36 = vld [vmem:[%s10819_s7 + $0x30] sm:$0xff]   ;;  %v8574_v37 = vld [vmem:[%s10819_s7 + $0x28] sm:$0xff]   ;;  %v8575_v38 = vld [vmem:[%s10819_s7 + $0x20] sm:$0xff]  }
 0x381   : > { %7884 = vmatpush3.bf16.msra.mxu0 %v1140_v40 }
 0x382   : > { %7894 = vmatpush3.bf16.msra.mxu1 %v8566_v39  ;;  %7901 = vmatprep.subr.bf16.mxu0 %v8941_v1 }
 0x383   : > { %7895 = vmatprep.subr.bf16.mxu1 %v8941_v1 }
 0x386   : > { %7896 = vmatpush3.bf16.msra.mxu1 %v8567_v41 }
 0x387   : > { %7913 = vmatprep.subr.bf16.mxu1 %v8941_v1 }
 0x389   : > { %7898 = vmatmul.mubr.msk.bf16.vlgmr.msra.gmra.mxu1 %vm771_vm5, %v9208_v3 }
 0x38a   : > { %7914 = vmatpush3.bf16.msra.mxu1 %v1397_v43  ;;  %7921 = vmatprep.mubr.msk.bf16.mxu1 %vm8942_vm1, %v8941_v1 }
 0x38b   : > { %7915 = vmatprep.subr.bf16.mxu1 %v8941_v1 }
 0x38e   : > { %7916 = vmatpush3.bf16.msra.mxu1 %v8569_v44 }
 0x38f   : > { %7917 = vmatprep.subr.bf16.mxu1 %v8941_v1 }
 0x392   : > { %7918 = vmatpush3.bf16.msra.mxu1 %v8570_v45  ;;  %v6905_v45 = vld [vmem:[%s10769_s8 + $0x1] ss:$0 sm:$0xff] }
 0x393   : > { %7919 = vmatprep.subr.bf16.mxu1 %v8941_v1 }
 0x396   : > { %7920 = vmatpush3.bf16.msra.mxu1 %v8571_v46 }
 0x397   : > { %7937 = vmatprep.subr.bf16.mxu1 %v8941_v1 }
 0x399   : > { %7922 = vmatmul.mubr.msk.bf16.vlgmr.msra.gmra.mxu1 %vm771_vm5, %v9208_v3 }
 0x39a   : > { %7939 = vmatprep.mubr.msk.bf16.mxu1 %vm8942_vm1, %v8941_v1 }
 0x439   : > { %v1109_v51 = vpop.f32.mrf.mxu1 }
 0x43a   : > { %v1110_v52 = vadd.f32 %v1109_v51, %v9299_v50 }
 0x43b   : > { %v7881_v54 = vpop.f32.mrf.mxu1 }
 0x43c   : > { %v1117_v11 = vsel %vm1116_vm10, %v1110_v52, -inf }
 0x43d   : > { %1118 = vmax.xlane.f32.xlu1 %v1117_v11  ;;  %v1112_v55 = vpop.f32.mrf.mxu1 }
 0x43e   : > { %v1113_v56 = vadd.f32 %v1112_v55, %v9303_v53 }
 0x43f   : > { %v7882_v57 = vpop.f32.mrf.mxu1 }
 0x440   : > { %v1120_v58 = vsel %vm1116_vm10, %v1113_v56, -inf }
 0x441   : > { %1121 = vmax.xlane.f32.xlu1 %v1120_v58 }
 0x449   : > { %v1265_v59 = vpop.f32.mrf.mxu1 }
 0x44a   : > { %v9311_v62 = vadd.f32 %v6890_v12, %v1265_v59 }
 0x44b   : > { %v7899_v60 = vpop.f32.mrf.mxu1 }
 0x44d   : > { %v1268_v61 = vpop.f32.mrf.mxu1 }
 0x44e   : > { %v9313_v63 = vadd.f32 %v6890_v12, %v1268_v61 }
 0x44f   : > { %v7900_v2 = vpop.f32.mrf.mxu1 }
 0x450   : > { %v1440_v4 = vpack.c.bf16 %v9313_v63, %v9311_v62 }
 0x459   : > { %v1433_v5 = vpop.f32.mrf.mxu1 }
 0x45a   : > { %v1434_v9 = vadd.f32 %v6920_v6, %v1433_v5 }
 0x45b   : > { %v7923_v7 = vpop.f32.mrf.mxu1 }
 0x45d   : > { %v1436_v8 = vpop.f32.mrf.mxu1 }
 0x45e   : > { %v1437_v10 = vadd.f32 %v6920_v6, %v1436_v8 }
 0x45f   : > { %v7924_v13 = vpop.f32.mrf.mxu1 }
 0x460   : > { %v1512_v14 = vpack.c.bf16 %v1437_v10, %v1434_v9 }
 0x4c6   : > { %v1119_v15 = vpop.xlane.xlu1 %1118 }
 0x4c7   : > { %v1123_v16 = vsub.f32 %v1110_v52, %v1119_v15 }
 0x4c9   : > { %v1125_v17 = vmul.f32 1.442695, %v1123_v16  ;;  %v8576_v16 = vld [vmem:[%s10772_s11] sm:$0x1f]  }
 0x4ca   : > { %v1122_v18 = vpop.xlane.xlu1 %1121 }
 0x4cb   : > { %8770 = vpow2.f32 %v1125_v17  ;;  %v1124_v19 = vsub.f32 %v1113_v56, %v1122_v18 }
 0x4cd   : > { %v1127_v21 = vmul.f32 1.442695, %v1124_v19 }
 0x4cf   : > { %8772 = vpow2.f32 %v1127_v21 }
 0x4d8   : > { %v8771_v22 = vpop.eup %8770 }
 0x4d9   : > { %v1129_v23 = vsel %vm1116_vm10, %v8771_v22, 0.0 }
 0x4da   : > { %1130 = vadd.xlane.f32.xlu1 %v1129_v23  ;;  %v8577_v23 = vld [vmem:[%s10819_s7 + $0x58] sm:$0x3f]  }
 0x4dc   : > { %v8773_v24 = vpop.eup %8772 }
 0x4dd   : > { %v1132_v26 = vsel %vm1116_vm10, %v8773_v24, 0.0 }
 0x4de   : > { %1133 = vadd.xlane.f32.xlu1 %v1132_v26  ;;  %v8578_v26 = vld [vmem:[%s10819_s7 + $0x50] sm:$0xff]  }
 0x563   : > { %v1131_v27 = vpop.xlane.xlu1 %1130 }
 0x564   : > { %8774 = vrcp.f32 %v1131_v27  ;;  %v8579_v27 = vld [vmem:[%s10819_s7 + $0x48] sm:$0xff]  }
 0x567   : > { %v1134_v28 = vpop.xlane.xlu1 %1133 }
 0x568   : > { %8776 = vrcp.f32 %v1134_v28  ;;  %v8580_v28 = vld [vmem:[%s10819_s7 + $0x40] sm:$0xff]  }
 0x571   : > { %v8775_v29 = vpop.eup %8774 }
 0x572   : > { %v1137_v32 = vmul.f32 %v8775_v29, %v8771_v22  ;;  %v1623_v22 = vsel %vm1569_vm11, %v8576_v16, 0  ;;  %v8581_v29 = vld [vmem:[%s10772_s11 + $0x8] sm:$0x1f]  }
 0x573   : > { %v1571_v30 = vsel %vm1569_vm11, %v8581_v29, 0 }
 0x574   : > { %7938 = vmatpush3.bf16.msra.mxu1 %v1571_v30 }
 0x575   : > { %v8777_v31 = vpop.eup %8776  ;;  %7949 = vmatprep.subr.bf16.mxu1 %v8941_v1 }
 0x576   : > { %v1138_v33 = vmul.f32 %v8777_v31, %v8773_v24  ;;  %v1791_v24 = vsel %vm857_vm6, %v8577_v23, 0 }
 0x578   : > { %v1139_v34 = vpack.c.bf16 %v1138_v33, %v1137_v32  ;;  %v8582_v32 = vld [vmem:[%s10818_s29 + $0x58] sm:$0x3f]  }
 0x57a   : > { %7886 = vmatmul.mubr.msk.bf16.vlgmr.msra.gmra.mxu0 %vm1116_vm10, %v1139_v34 }
 0x57b   : > { %7902 = vmatpush3.bf16.msra.mxu0 %v1313_v35  ;;  %7909 = vmatprep.mubr.msk.bf16.mxu0 %vm8942_vm1, %v8941_v1 }
 0x57c   : > { %7903 = vmatprep.subr.bf16.mxu0 %v8941_v1 }
 0x57f   : > { %7904 = vmatpush3.bf16.msra.mxu0 %v8573_v36  ;;  %v1707_v36 = vsel %vm857_vm6, %v8582_v32, 0 }
 0x580   : > { %7905 = vmatprep.subr.bf16.mxu0 %v8941_v1 }
 0x583   : > { %7906 = vmatpush3.bf16.msra.mxu0 %v8574_v37 }
 0x584   : > { %7907 = vmatprep.subr.bf16.mxu0 %v8941_v1 }
 0x587   : > { %7908 = vmatpush3.bf16.msra.mxu0 %v8575_v38 }
 0x588   : > { %7925 = vmatprep.subr.bf16.mxu0 %v8941_v1 }
 0x58a   : > { %7910 = vmatmul.mubr.msk.bf16.vlgmr.msra.gmra.mxu0 %vm771_vm5, %v9208_v3 }
 0x58b   : > { %7927 = vmatprep.mubr.msk.bf16.mxu0 %vm8942_vm1, %v8941_v1 }
 0x63a   : > { %v9346_v39 = vpop.f32.mrf.mxu0 }
 0x63c   : > { %v7887_v40 = vpop.f32.mrf.mxu0 }
 0x63e   : > { %v1181_v41 = vpop.f32.mrf.mxu0 }
 0x63f   : > { %v1185_v42 = vpack.c.bf16 %v1181_v41, %v9346_v39  ;;  %v8583_v39 = vld [vmem:[%s10818_s29 + $0x50] sm:$0xff]  }
 0x640   : > { %v7888_v43 = vpop.f32.mrf.mxu0 }
 0x64a   : > { %v1349_v44 = vpop.f32.mrf.mxu0 }
 0x64b   : > { %v1350_v49 = vadd.f32 %v6905_v45, %v1349_v44  ;;  %v8585_v44 = vld [vmem:[%s10818_s29 + $0x40] sm:$0xff]  }
 0x64c   : > { %v7911_v46 = vpop.f32.mrf.mxu0 }
 0x64e   : > { %v1352_v48 = vpop.f32.mrf.mxu0 }
 0x64f   : > { %v1353_v51 = vadd.f32 %v6905_v45, %v1352_v48  ;;  %v8586_v45 = vld [vmem:[%s10770_s9 + $0x58] sm:$0x3f]  }
 0x650   : > { %v7912_v52 = vpop.f32.mrf.mxu0  ;;  %v1875_v46 = vsel %vm857_vm6, %v8586_v45, 0 }
 0x651   : > { %v1441_v54 = vpack.c.bf16 %v1353_v51, %v1350_v49  ;;  %v8587_v49 = vld [vmem:[%s10770_s9 + $0x50] sm:$0xff]   ;;  %v6958_v51 = vld [vmem:[%s10769_s8 + $0x2] ss:$0 sm:$0xff] }
 0x653   : > { %v1446_v11 = vsel %vm1068_vm7, %v1441_v54, 0 }
 0x654   : > { %7926 = vmatpush3.bf16.xpose.msra.mxu0 %v1446_v11  ;;  %v8588_v11 = vld [vmem:[%s10770_s9 + $0x48] sm:$0xff]  }
 0x655   : > { %7931 = vmatprep.subr.bf16.mxu0 %v8941_v1 }
 0x65b   : > { %7928 = vmatmul.mubr.msk.bf16.vlgmr.msra.gmra.mxu0 %vm1068_vm7, %v1440_v4 }
 0x65c   : > { %7932 = vmatpush3.bf16.msra.mxu0 %v1512_v14  ;;  %7933 = vmatprep.mubr.msk.bf16.mxu0 %vm8942_vm1, %v8941_v1 }
 0x65d   : > { %7943 = vmatprep.subr.bf16.mxu0 %v8941_v1 }
 0x71b   : > { %v1482_v55 = vpop.f32.mrf.mxu0 }
 0x71c   : > { %v1483_v56 = vadd.f32 %v1482_v55, %v9299_v50 }
 0x71d   : > { %v7929_v57 = vpop.f32.mrf.mxu0 }
 0x71e   : > { %v1489_v58 = vsel %vm1116_vm10, %v1483_v56, -inf }
 0x71f   : > { %1490 = vmax.xlane.f32.xlu1 %v1489_v58  ;;  %v1485_v59 = vpop.f32.mrf.mxu0 }
 0x720   : > { %v1486_v12 = vadd.f32 %v1485_v59, %v9303_v53  ;;  %v8589_v59 = vld [vmem:[%s10770_s9 + $0x40] sm:$0xff]  }
 0x721   : > { %v7930_v60 = vpop.f32.mrf.mxu0 }
 0x722   : > { %v1492_v61 = vsel %vm1116_vm10, %v1486_v12, -inf }
 0x723   : > { %1493 = vmax.xlane.f32.xlu1 %v1492_v61 }
 0x7a8   : > { %v1491_v62 = vpop.xlane.xlu1 %1490 }
 0x7a9   : > { %v1495_v63 = vsub.f32 %v1483_v56, %v1491_v62 }
 0x7ab   : > { %v1497_v2 = vmul.f32 1.442695, %v1495_v63 }
 0x7ac   : > { %v1494_v4 = vpop.xlane.xlu1 %1493 }
 0x7ad   : > { %8778 = vpow2.f32 %v1497_v2  ;;  %v1496_v5 = vsub.f32 %v1486_v12, %v1494_v4  ;;  %v6943_v4 = vld [vmem:[%s10823_s6 + $0x2] ss:$0 sm:$0xff] }
 0x7af   : > { %v1499_v6 = vmul.f32 1.442695, %v1496_v5 }
 0x7b1   : > { %8780 = vpow2.f32 %v1499_v6 }
 0x7ba   : > { %v8779_v7 = vpop.eup %8778 }
 0x7bb   : > { %v1501_v8 = vsel %vm1116_vm10, %v8779_v7, 0.0 }
 0x7bc   : > { %1502 = vadd.xlane.f32.xlu1 %v1501_v8 }
 0x7be   : > { %v8781_v9 = vpop.eup %8780 }
 0x7bf   : > { %v1504_v10 = vsel %vm1116_vm10, %v8781_v9, 0.0 }
 0x7c0   : > { %1505 = vadd.xlane.f32.xlu0 %v1504_v10 }
 0x845   : > { %v1503_v13 = vpop.xlane.xlu1 %1502 }
 0x846   : > { %8782 = vrcp.f32 %v1503_v13 }
 0x849   : > { %v1506_v14 = vpop.xlane.xlu0 %1505 }
 0x84a   : > { %8784 = vrcp.f32 %v1506_v14  ;;  %v6973_v14 = vld [vmem:[%s10771_s10 + $0x2] ss:$0 sm:$0xff] }
 0x853   : > { %v8783_v15 = vpop.eup %8782 }
 0x854   : > { %v1509_v18 = vmul.f32 %v8783_v15, %v8779_v7 }
 0x857   : > { %v8785_v17 = vpop.eup %8784 }
 0x858   : > { %v1510_v19 = vmul.f32 %v8785_v17, %v8781_v9 }
 0x85a   : > { %v1511_v21 = vpack.c.bf16 %v1510_v19, %v1509_v18 }
 0x85c   : > { %7934 = vmatmul.mubr.msk.bf16.vlgmr.msra.gmra.mxu0 %vm1116_vm10, %v1511_v21 }
 0x85d   : > { %7944 = vmatpush3.bf16.msra.mxu0 %v1623_v22  ;;  %7945 = vmatprep.mubr.msk.bf16.mxu0 %vm8942_vm1, %v8941_v1 }
 0x85e   : > { %7961 = vmatprep.subr.bf16.mxu0 %v8941_v1 }
 0x864   : > { %7946 = vmatmul.mubr.msk.bf16.vlgmr.msra.gmra.mxu0 %vm1068_vm7, %v1185_v42  ;;  %v8584_v42 = vld [vmem:[%s10818_s29 + $0x48] sm:$0xff]  }
 0x865   : > { %7962 = vmatpush3.bf16.msra.mxu0 %v1791_v24  ;;  %7969 = vmatprep.mubr.msk.bf16.mxu0 %vm8942_vm1, %v8941_v1 }
 0x866   : > { %7963 = vmatprep.subr.bf16.mxu0 %v8941_v1 }
 0x869   : > { %7964 = vmatpush3.bf16.msra.mxu0 %v8578_v26 }
 0x86a   : > { %7965 = vmatprep.subr.bf16.mxu0 %v8941_v1 }
 0x86d   : > { %7966 = vmatpush3.bf16.msra.mxu0 %v8579_v27 }
 0x86e   : > { %7967 = vmatprep.subr.bf16.mxu0 %v8941_v1 }
 0x871   : > { %7968 = vmatpush3.bf16.msra.mxu0 %v8580_v28 }
 0x872   : > { %7985 = vmatprep.subr.bf16.mxu0 %v8941_v1 }
 0x874   : > { %7970 = vmatmul.mubr.msk.bf16.vlgmr.msra.gmra.mxu0 %vm771_vm5, %v9208_v3 }
 0x875   : > { %7987 = vmatprep.mubr.msk.bf16.mxu0 %vm8942_vm1, %v8941_v1 }
 0x91c   : > { %v1550_v31 = vpop.f32.mrf.mxu0 }
 0x91e   : > { %v7935_v33 = vpop.f32.mrf.mxu0 }
 0x920   : > { %v1553_v34 = vpop.f32.mrf.mxu0 }
 0x921   : > { %v1557_v35 = vpack.c.bf16 %v1553_v34, %v1550_v31 }
 0x922   : > { %v7936_v37 = vpop.f32.mrf.mxu0 }
 0x923   : > { %7940 = vmatmul.mubr.msk.bf16.vlgmr.msra.gmra.mxu1 %vm1068_vm7, %v1557_v35 }
 0x924   : > { %7950 = vmatpush3.bf16.msra.mxu1 %v1707_v36  ;;  %v9409_v38 = vpop.f32.mrf.mxu0  ;;  %7957 = vmatprep.mubr.msk.bf16.mxu1 %vm8942_vm1, %v8941_v1 }
 0x925   : > { %7951 = vmatprep.subr.bf16.mxu1 %v8941_v1 }
 0x926   : > { %v7947_v40 = vpop.f32.mrf.mxu0 }
 0x928   : > { %7952 = vmatpush3.bf16.msra.mxu1 %v8583_v39  ;;  %v9417_v41 = vpop.f32.mrf.mxu0 }
 0x929   : > { %7953 = vmatprep.subr.bf16.mxu1 %v8941_v1 }
 0x92a   : > { %v7948_v43 = vpop.f32.mrf.mxu0 }
 0x92c   : > { %7954 = vmatpush3.bf16.msra.mxu1 %v8584_v42 }
 0x92d   : > { %7955 = vmatprep.subr.bf16.mxu1 %v8941_v1 }
 0x930   : > { %7956 = vmatpush3.bf16.msra.mxu1 %v8585_v44 }
 0x931   : > { %7973 = vmatprep.subr.bf16.mxu1 %v8941_v1 }
 0x933   : > { %7958 = vmatmul.mubr.msk.bf16.vlgmr.msra.gmra.mxu1 %vm771_vm5, %v9208_v3 }
 0x934   : > { %v1827_v48 = vpop.f32.mrf.mxu0  ;;  %7974 = vmatpush3.bf16.msra.mxu1 %v1875_v46  ;;  %7981 = vmatprep.mubr.msk.bf16.mxu1 %vm8942_vm1, %v8941_v1  ;;  %v8590_v46 = vld [vmem:[%s10818_s29 + $0x78] sm:$0x3f]  }
 0x935   : > { %7975 = vmatprep.subr.bf16.mxu1 %v8941_v1  ;;  %v1828_v55 = vadd.f32 %v6958_v51, %v1827_v48 }
 0x936   : > { %v7971_v52 = vpop.f32.mrf.mxu0 }
 0x938   : > { %v1830_v54 = vpop.f32.mrf.mxu0  ;;  %7976 = vmatpush3.bf16.msra.mxu1 %v8587_v49 }
 0x939   : > { %v1831_v56 = vadd.f32 %v6958_v51, %v1830_v54  ;;  %7977 = vmatprep.subr.bf16.mxu1 %v8941_v1  ;;  %v2134_v54 = vsel %vm857_vm6, %v8590_v46, 0 }
 0x93a   : > { %v7972_v57 = vpop.f32.mrf.mxu0 }
 0x93b   : > { %v1919_v58 = vpack.c.bf16 %v1831_v56, %v1828_v55  ;;  %v8592_v55 = vld [vmem:[%s10818_s29 + $0x68] sm:$0xff]   ;;  %v8593_v56 = vld [vmem:[%s10818_s29 + $0x60] sm:$0xff]   ;;  %v8594_v57 = vld [vmem:[%s10770_s9 + $0x78] sm:$0x3f]  }
 0x93c   : > { %7978 = vmatpush3.bf16.msra.mxu1 %v8588_v11  ;;  %v8591_v11 = vld [vmem:[%s10818_s29 + $0x70] sm:$0xff]  }
 0x93d   : > { %v1924_v12 = vsel %vm1068_vm7, %v1919_v58, 0  ;;  %7979 = vmatprep.subr.bf16.mxu1 %v8941_v1  ;;  %v2302_v58 = vsel %vm857_vm6, %v8594_v57, 0 }
 0x93e   : > { %7986 = vmatpush3.bf16.xpose.msra.mxu0 %v1924_v12  ;;  %v8596_v12 = vld [vmem:[%s10770_s9 + $0x68] sm:$0xff]  }
 0x93f   : > { %7991 = vmatprep.subr.bf16.mxu0 %v8941_v1 }
 0x940   : > { %7980 = vmatpush3.bf16.msra.mxu1 %v8589_v59  ;;  %v8595_v59 = vld [vmem:[%s10770_s9 + $0x70] sm:$0xff]  }
 0x941   : > { %7997 = vmatprep.subr.bf16.mxu1 %v8941_v1 }
 0x943   : > { %7982 = vmatmul.mubr.msk.bf16.vlgmr.msra.gmra.mxu1 %vm771_vm5, %v9208_v3 }
 0x944   : > { %7999 = vmatprep.mubr.msk.bf16.mxu1 %vm8942_vm1, %v8941_v1 }
 0x9e3   : > { %v9458_v60 = vpop.f32.mrf.mxu1 }
 0x9e5   : > { %v7941_v61 = vpop.f32.mrf.mxu1 }
 0x9e6   : > { %v8597_v61 = vld [vmem:[%s10770_s9 + $0x60] sm:$0xff]  }
 0x9e7   : > { %v9460_v62 = vpop.f32.mrf.mxu1 }
 0x9e9   : > { %v7942_v63 = vpop.f32.mrf.mxu1 }
 0x9ea   : > { %v8598_v63 = vld [vmem:[%s10772_s11 + $0x10] sm:$0x1f]  }
 0x9f3   : > { %v1743_v2 = vpop.f32.mrf.mxu1 }
 0x9f4   : > { %v1744_v7 = vadd.f32 %v6943_v4, %v1743_v2  ;;  %v2048_v2 = vsel %vm1569_vm11, %v8598_v63, 0 }
 0x9f5   : > { %v7959_v5 = vpop.f32.mrf.mxu1  ;;  %7998 = vmatpush3.bf16.msra.mxu1 %v2048_v2 }
 0x9f6   : > { %8015 = vmatprep.subr.bf16.mxu1 %v8941_v1  ;;  %v8599_v5 = vld [vmem:[%s10819_s7 + $0x78] sm:$0x3f]  }
 0x9f7   : > { %v1746_v6 = vpop.f32.mrf.mxu1 }
 0x9f8   : > { %v1747_v8 = vadd.f32 %v6943_v4, %v1746_v6 }
 0x9f9   : > { %v7960_v9 = vpop.f32.mrf.mxu1 }
 0x9fa   : > { %v1918_v10 = vpack.c.bf16 %v1747_v8, %v1744_v7  ;;  %v2218_v9 = vsel %vm857_vm6, %v8599_v5, 0 }
 0x9fc   : > { %7988 = vmatmul.mubr.msk.bf16.vlgmr.msra.gmra.mxu0 %vm1068_vm7, %v1918_v10 }
 0x9fd   : > { %7993 = vmatprep.mubr.msk.bf16.mxu0 %vm8942_vm1, %v8941_v1 }
 0xa03   : > { %v1911_v13 = vpop.f32.mrf.mxu1 }
 0xa04   : > { %v1912_v17 = vadd.f32 %v6973_v14, %v1911_v13  ;;  %v8600_v13 = vld [vmem:[%s10819_s7 + $0x70] sm:$0xff]  }
 0xa05   : > { %v7983_v15 = vpop.f32.mrf.mxu1 }
 0xa07   : > { %v1914_v16 = vpop.f32.mrf.mxu1 }
 0xa08   : > { %v1915_v18 = vadd.f32 %v6973_v14, %v1914_v16  ;;  %v8601_v14 = vld [vmem:[%s10819_s7 + $0x68] sm:$0xff]   ;;  %v8602_v16 = vld [vmem:[%s10819_s7 + $0x60] sm:$0xff]  }
 0xa09   : > { %v7984_v19 = vpop.f32.mrf.mxu1 }
 0xa0a   : > { %v1990_v21 = vpack.c.bf16 %v1915_v18, %v1912_v17  ;;  %v6994_v17 = vld [vmem:[%s10823_s6 + $0x3] ss:$0 sm:$0xff] }
 0xa0c   : > { %7992 = vmatpush3.bf16.msra.mxu0 %v1990_v21 }
 0xa0d   : > { %8003 = vmatprep.subr.bf16.mxu0 %v8941_v1 }
 0xabc   : > { %v1960_v22 = vpop.f32.mrf.mxu0 }
 0xabd   : > { %v1961_v23 = vadd.f32 %v1960_v22, %v9299_v50 }
 0xabe   : > { %v7989_v24 = vpop.f32.mrf.mxu0 }
 0xabf   : > { %v1967_v26 = vsel %vm1116_vm10, %v1961_v23, -inf }
 0xac0   : > { %1968 = vmax.xlane.f32.xlu1 %v1967_v26  ;;  %v1963_v27 = vpop.f32.mrf.mxu0 }
 0xac1   : > { %v1964_v28 = vadd.f32 %v1963_v27, %v9303_v53  ;;  %v7024_v27 = vld [vmem:[%s10771_s10 + $0x3] ss:$0 sm:$0xff] }
 0xac2   : > { %v7990_v29 = vpop.f32.mrf.mxu0 }
 0xac3   : > { %v1970_v30 = vsel %vm1116_vm10, %v1964_v28, -inf }
 0xac4   : > { %1971 = vmax.xlane.f32.xlu0 %v1970_v30 }
 0xb49   : > { %v1969_v31 = vpop.xlane.xlu1 %1968 }
 0xb4a   : > { %v1973_v32 = vsub.f32 %v1961_v23, %v1969_v31 }
 0xb4c   : > { %v1975_v33 = vmul.f32 1.442695, %v1973_v32 }
 0xb4d   : > { %v1972_v34 = vpop.xlane.xlu0 %1971 }
 0xb4e   : > { %8786 = vpow2.f32 %v1975_v33  ;;  %v1974_v35 = vsub.f32 %v1964_v28, %v1972_v34  ;;  %v1660_v34 = vadd.f32 %v9409_v38, %v9458_v60 }
 0xb50   : > { %v1977_v36 = vmul.f32 1.442695, %v1974_v35 }
 0xb52   : > { %8788 = vpow2.f32 %v1977_v36 }
 0xb5b   : > { %v8787_v37 = vpop.eup %8786 }
 0xb5c   : > { %v1979_v39 = vsel %vm1116_vm10, %v8787_v37, 0.0 }
 0xb5d   : > { %1980 = vadd.xlane.f32.xlu1 %v1979_v39  ;;  %v1663_v39 = vadd.f32 %v9417_v41, %v9460_v62 }
 0xb5f   : > { %v8789_v40 = vpop.eup %8788 }
 0xb60   : > { %v1982_v42 = vsel %vm1116_vm10, %v8789_v40, 0.0 }
 0xb61   : > { %1983 = vadd.xlane.f32.xlu0 %v1982_v42 }
 0xbe6   : > { %v1981_v43 = vpop.xlane.xlu1 %1980 }
 0xbe7   : > { %8790 = vrcp.f32 %v1981_v43 }
 0xbea   : > { %v1984_v44 = vpop.xlane.xlu0 %1983 }
 0xbeb   : > { %8792 = vrcp.f32 %v1984_v44 }
 0xbf4   : > { %v8791_v45 = vpop.eup %8790 }
 0xbf5   : > { %v1987_v49 = vmul.f32 %v8791_v45, %v8787_v37  ;;  %v7009_v45 = vld [vmem:[%s10769_s8 + $0x3] ss:$0 sm:$0xff] }
 0xbf8   : > { %v8793_v48 = vpop.eup %8792 }
 0xbf9   : > { %v1988_v51 = vmul.f32 %v8793_v48, %v8789_v40 }
 0xbfb   : > { %v1989_v52 = vpack.c.bf16 %v1988_v51, %v1987_v49 }
 0xbfd   : > { %7994 = vmatmul.mubr.msk.bf16.vlgmr.msra.gmra.mxu0 %vm1116_vm10, %v1989_v52 }
 0xbfe   : > { %8004 = vmatpush3.bf16.msra.mxu0 %v2134_v54  ;;  %8011 = vmatprep.mubr.msk.bf16.mxu0 %vm8942_vm1, %v8941_v1 }
 0xbff   : > { %8005 = vmatprep.subr.bf16.mxu0 %v8941_v1 }
 0xc02   : > { %8006 = vmatpush3.bf16.msra.mxu0 %v8591_v11 }
 0xc03   : > { %8007 = vmatprep.subr.bf16.mxu0 %v8941_v1 }
 0xc06   : > { %8008 = vmatpush3.bf16.msra.mxu0 %v8592_v55 }
 0xc07   : > { %8009 = vmatprep.subr.bf16.mxu0 %v8941_v1 }
 0xc0a   : > { %8010 = vmatpush3.bf16.msra.mxu0 %v8593_v56 }
 0xc0b   : > { %8027 = vmatprep.subr.bf16.mxu0 %v8941_v1 }
 0xc0d   : > { %8012 = vmatmul.mubr.msk.bf16.vlgmr.msra.gmra.mxu0 %vm771_vm5, %v9208_v3 }
 0xc0e   : > { %8028 = vmatpush3.bf16.msra.mxu0 %v2302_v58  ;;  %8035 = vmatprep.mubr.msk.bf16.mxu0 %vm8942_vm1, %v8941_v1 }
 0xc0f   : > { %8029 = vmatprep.subr.bf16.mxu0 %v8941_v1 }
 0xc12   : > { %8030 = vmatpush3.bf16.msra.mxu0 %v8595_v59 }
 0xc13   : > { %8031 = vmatprep.subr.bf16.mxu0 %v8941_v1 }
 0xc16   : > { %8032 = vmatpush3.bf16.msra.mxu0 %v8596_v12 }
 0xc17   : > { %8033 = vmatprep.subr.bf16.mxu0 %v8941_v1 }
 0xc1a   : > { %8034 = vmatpush3.bf16.msra.mxu0 %v8597_v61 }
 0xc1b   : > { %8051 = vmatprep.subr.bf16.mxu0 %v8941_v1 }
 0xc1d   : > { %8036 = vmatmul.mubr.msk.bf16.vlgmr.msra.gmra.mxu0 %vm771_vm5, %v9208_v3 }
 0xc1e   : > { %8053 = vmatprep.mubr.msk.bf16.mxu0 %vm8942_vm1, %v8941_v1 }
 0xcbd   : > { %v2028_v4 = vpop.f32.mrf.mxu0 }
 0xcbf   : > { %v7995_v6 = vpop.f32.mrf.mxu0 }
 0xcc1   : > { %v2031_v7 = vpop.f32.mrf.mxu0 }
 0xcc2   : > { %v2035_v8 = vpack.c.bf16 %v2031_v7, %v2028_v4 }
 0xcc3   : > { %v7996_v10 = vpop.f32.mrf.mxu0 }
 0xcc4   : > { %8000 = vmatmul.mubr.msk.bf16.vlgmr.msra.gmra.mxu1 %vm1068_vm7, %v2035_v8 }
 0xcc5   : > { %8016 = vmatpush3.bf16.msra.mxu1 %v2218_v9  ;;  %8023 = vmatprep.mubr.msk.bf16.mxu1 %vm8942_vm1, %v8941_v1 }
 0xcc6   : > { %8017 = vmatprep.subr.bf16.mxu1 %v8941_v1 }
 0xcc9   : > { %8018 = vmatpush3.bf16.msra.mxu1 %v8600_v13 }
 0xcca   : > { %8019 = vmatprep.subr.bf16.mxu1 %v8941_v1 }
 0xccd   : > { %v2170_v15 = vpop.f32.mrf.mxu0  ;;  %8020 = vmatpush3.bf16.msra.mxu1 %v8601_v14  ;;  %v8603_v14 = vld [vmem:[%s10818_s29 + $0x98] sm:$0x3f]  }
 0xcce   : > { %8021 = vmatprep.subr.bf16.mxu1 %v8941_v1  ;;  %v2171_v21 = vadd.f32 %v6994_v17, %v2170_v15 }
 0xccf   : > { %v8013_v18 = vpop.f32.mrf.mxu0 }
 0xcd1   : > { %v2173_v19 = vpop.f32.mrf.mxu0  ;;  %8022 = vmatpush3.bf16.msra.mxu1 %v8602_v16 }
 0xcd2   : > { %v2174_v22 = vadd.f32 %v6994_v17, %v2173_v19  ;;  %8039 = vmatprep.subr.bf16.mxu1 %v8941_v1  ;;  %v2561_v19 = vsel %vm857_vm6, %v8603_v14, 0 }
 0xcd3   : > { %v8014_v23 = vpop.f32.mrf.mxu0 }
 0xcd4   : > { %v2345_v24 = vpack.c.bf16 %v2174_v22, %v2171_v21  ;;  %8024 = vmatmul.mubr.msk.bf16.vlgmr.msra.gmra.mxu1 %vm771_vm5, %v9208_v3  ;;  %v8604_v21 = vld [vmem:[%s10818_s29 + $0x90] sm:$0xff]   ;;  %v8605_v22 = vld [vmem:[%s10818_s29 + $0x88] sm:$0xff]   ;;  %v8606_v23 = vld [vmem:[%s10818_s29 + $0x80] sm:$0xff]  }
 0xcd5   : > { %8041 = vmatprep.mubr.msk.bf16.mxu1 %vm8942_vm1, %v8941_v1 }
 0xcdd   : > { %v2338_v26 = vpop.f32.mrf.mxu0 }
 0xcde   : > { %v2339_v30 = vadd.f32 %v7024_v27, %v2338_v26 }
 0xcdf   : > { %v8037_v28 = vpop.f32.mrf.mxu0 }
 0xce0   : > { %v8609_v28 = vld [vmem:[%s10770_s9 + $0x88] sm:$0xff]  }
 0xce1   : > { %v2341_v29 = vpop.f32.mrf.mxu0 }
 0xce2   : > { %v2342_v31 = vadd.f32 %v7024_v27, %v2341_v29  ;;  %v8608_v27 = vld [vmem:[%s10770_s9 + $0x90] sm:$0xff]   ;;  %v8610_v29 = vld [vmem:[%s10770_s9 + $0x80] sm:$0xff]  }
 0xce3   : > { %v8038_v32 = vpop.f32.mrf.mxu0 }
 0xce4   : > { %v2417_v33 = vpack.c.bf16 %v2342_v31, %v2339_v30  ;;  %v8611_v30 = vld [vmem:[%s10772_s11 + $0x18] sm:$0x1f]  }
 0xce5   : > { %v2475_v31 = vsel %vm1569_vm11, %v8611_v30, 0 }
 0xce6   : > { %8052 = vmatpush3.bf16.msra.mxu0 %v2475_v31 }
 0xce7   : > { %8069 = vmatprep.subr.bf16.mxu0 %v8941_v1 }
 0xd84   : > { %v2084_v35 = vpop.f32.mrf.mxu1 }
 0xd85   : > { %v9560_v36 = vadd.f32 %v2084_v35, %v1660_v34 }
 0xd86   : > { %v8001_v37 = vpop.f32.mrf.mxu1 }
 0xd88   : > { %v2087_v40 = vpop.f32.mrf.mxu1 }
 0xd89   : > { %v9564_v42 = vadd.f32 %v2087_v40, %v1663_v39 }
 0xd8a   : > { %v8002_v43 = vpop.f32.mrf.mxu1 }
 0xd8b   : > { %v8613_v43 = vld [vmem:[%s10819_s7 + $0x90] sm:$0xff]  }
 0xd94   : > { %v2254_v44 = vpop.f32.mrf.mxu1 }
 0xd95   : > { %v2255_v49 = vadd.f32 %v7009_v45, %v2254_v44  ;;  %v8614_v44 = vld [vmem:[%s10819_s7 + $0x88] sm:$0xff]  }
 0xd96   : > { %v8025_v46 = vpop.f32.mrf.mxu1 }
 0xd97   : > { %v8615_v46 = vld [vmem:[%s10819_s7 + $0x80] sm:$0xff]  }
 0xd98   : > { %v2257_v48 = vpop.f32.mrf.mxu1 }
 0xd99   : > { %v2258_v38 = vadd.f32 %v7009_v45, %v2257_v48  ;;  %v7045_v48 = vld [vmem:[%s10823_s6 + $0x4] ss:$0 sm:$0xff] }
 0xd9a   : > { %v8026_v60 = vpop.f32.mrf.mxu1 }
 0xd9b   : > { %v2346_v51 = vpack.c.bf16 %v2258_v38, %v2255_v49 }
 0xd9d   : > { %v2351_v52 = vsel %vm1068_vm7, %v2346_v51, 0 }
 0xd9e   : > { %8040 = vmatpush3.bf16.xpose.msra.mxu1 %v2351_v52 }
 0xd9f   : > { %8045 = vmatprep.subr.bf16.mxu1 %v8941_v1 }
 0xda5   : > { %8042 = vmatmul.mubr.msk.bf16.vlgmr.msra.gmra.mxu1 %vm1068_vm7, %v2345_v24  ;;  %v8607_v24 = vld [vmem:[%s10770_s9 + $0x98] sm:$0x3f]  }
 0xda6   : > { %8046 = vmatpush3.bf16.msra.mxu1 %v2417_v33  ;;  %8047 = vmatprep.mubr.msk.bf16.mxu1 %vm8942_vm1, %v8941_v1  ;;  %v2729_v26 = vsel %vm857_vm6, %v8607_v24, 0  ;;  %v8612_v33 = vld [vmem:[%s10819_s7 + $0x98] sm:$0x3f]  }
 0xda7   : > { %8057 = vmatprep.subr.bf16.mxu1 %v8941_v1  ;;  %v2645_v39 = vsel %vm857_vm6, %v8612_v33, 0 }
 0xe65   : > { %v2387_v41 = vpop.f32.mrf.mxu1 }
 0xe66   : > { %v2388_v62 = vadd.f32 %v2387_v41, %v9299_v50 }
 0xe67   : > { %v8043_v54 = vpop.f32.mrf.mxu1 }
 0xe68   : > { %v2394_v11 = vsel %vm1116_vm10, %v2388_v62, -inf  ;;  %v7075_v54 = vld [vmem:[%s10771_s10 + $0x4] ss:$0 sm:$0xff] }
 0xe69   : > { %2395 = vmax.xlane.f32.xlu1 %v2394_v11  ;;  %v2390_v55 = vpop.f32.mrf.mxu1 }
 0xe6a   : > { %v2391_v56 = vadd.f32 %v2390_v55, %v9303_v53 }
 0xe6b   : > { %v8044_v57 = vpop.f32.mrf.mxu1 }
 0xe6c   : > { %v2397_v58 = vsel %vm1116_vm10, %v2391_v56, -inf }
 0xe6d   : > { %2398 = vmax.xlane.f32.xlu0 %v2397_v58 }
 0xef2   : > { %v2396_v59 = vpop.xlane.xlu1 %2395 }
 0xef3   : > { %v2400_v12 = vsub.f32 %v2388_v62, %v2396_v59 }
 0xef5   : > { %v2402_v61 = vmul.f32 1.442695, %v2400_v12 }
 0xef6   : > { %v2399_v63 = vpop.xlane.xlu0 %2398 }
 0xef7   : > { %8794 = vpow2.f32 %v2402_v61  ;;  %v2401_v2 = vsub.f32 %v2391_v56, %v2399_v63 }
 0xef9   : > { %v2404_v4 = vmul.f32 1.442695, %v2401_v2 }
 0xefb   : > { %8796 = vpow2.f32 %v2404_v4 }
 0xf04   : > { %v8795_v5 = vpop.eup %8794 }
 0xf05   : > { %v2406_v6 = vsel %vm1116_vm10, %v8795_v5, 0.0 }
 0xf06   : > { %2407 = vadd.xlane.f32.xlu1 %v2406_v6 }
 0xf08   : > { %v8797_v7 = vpop.eup %8796 }
 0xf09   : > { %v2409_v8 = vsel %vm1116_vm10, %v8797_v7, 0.0 }
 0xf0a   : > { %2410 = vadd.xlane.f32.xlu0 %v2409_v8 }
 0xf8f   : > { %v2408_v9 = vpop.xlane.xlu1 %2407 }
 0xf90   : > { %8798 = vrcp.f32 %v2408_v9 }
 0xf93   : > { %v2411_v10 = vpop.xlane.xlu0 %2410 }
 0xf94   : > { %8800 = vrcp.f32 %v2411_v10 }
 0xf9d   : > { %v8799_v13 = vpop.eup %8798 }
 0xf9e   : > { %v2414_v16 = vmul.f32 %v8799_v13, %v8795_v5 }
 0xfa1   : > { %v8801_v15 = vpop.eup %8800 }
 0xfa2   : > { %v2415_v17 = vmul.f32 %v8801_v15, %v8797_v7  ;;  %v7060_v7 = vld [vmem:[%s10769_s8 + $0x4] ss:$0 sm:$0xff] }
 0xfa4   : > { %v2416_v18 = vpack.c.bf16 %v2415_v17, %v2414_v16 }
 0xfa6   : > { %8048 = vmatmul.mubr.msk.bf16.vlgmr.msra.gmra.mxu1 %vm1116_vm10, %v2416_v18 }
 0xfa7   : > { %8058 = vmatpush3.bf16.msra.mxu1 %v2561_v19  ;;  %8065 = vmatprep.mubr.msk.bf16.mxu1 %vm8942_vm1, %v8941_v1 }
 0xfa8   : > { %8059 = vmatprep.subr.bf16.mxu1 %v8941_v1 }
 0xfab   : > { %8060 = vmatpush3.bf16.msra.mxu1 %v8604_v21 }
 0xfac   : > { %8061 = vmatprep.subr.bf16.mxu1 %v8941_v1 }
 0xfaf   : > { %8062 = vmatpush3.bf16.msra.mxu1 %v8605_v22 }
 0xfb0   : > { %8063 = vmatprep.subr.bf16.mxu1 %v8941_v1 }
 0xfb3   : > { %8064 = vmatpush3.bf16.msra.mxu1 %v8606_v23 }
 0xfb4   : > { %8081 = vmatprep.subr.bf16.mxu1 %v8941_v1 }
 0xfb6   : > { %8066 = vmatmul.mubr.msk.bf16.vlgmr.msra.gmra.mxu1 %vm771_vm5, %v9208_v3 }
 0xfb7   : > { %8082 = vmatpush3.bf16.msra.mxu1 %v2729_v26  ;;  %8089 = vmatprep.mubr.msk.bf16.mxu1 %vm8942_vm1, %v8941_v1 }
 0xfb8   : > { %8083 = vmatprep.subr.bf16.mxu1 %v8941_v1 }
 0xfbb   : > { %8084 = vmatpush3.bf16.msra.mxu1 %v8608_v27 }
 0xfbc   : > { %8085 = vmatprep.subr.bf16.mxu1 %v8941_v1 }
 0xfbf   : > { %8086 = vmatpush3.bf16.msra.mxu1 %v8609_v28 }
 0xfc0   : > { %8087 = vmatprep.subr.bf16.mxu1 %v8941_v1 }
 0xfc3   : > { %8088 = vmatpush3.bf16.msra.mxu1 %v8610_v29 }
 0xfc4   : > { %8105 = vmatprep.subr.bf16.mxu1 %v8941_v1 }
 0xfc6   : > { %8090 = vmatmul.mubr.msk.bf16.vlgmr.msra.gmra.mxu1 %vm771_vm5, %v9208_v3 }
 0xfc7   : > { %8107 = vmatprep.mubr.msk.bf16.mxu1 %vm8942_vm1, %v8941_v1 }
0x1066   : > { %v2455_v32 = vpop.f32.mrf.mxu1 }
0x1068   : > { %v8049_v34 = vpop.f32.mrf.mxu1 }
0x106a   : > { %v2458_v35 = vpop.f32.mrf.mxu1 }
0x106b   : > { %v2462_v37 = vpack.c.bf16 %v2458_v35, %v2455_v32 }
0x106c   : > { %v8050_v40 = vpop.f32.mrf.mxu1 }
0x106d   : > { %8054 = vmatmul.mubr.msk.bf16.vlgmr.msra.gmra.mxu0 %vm1068_vm7, %v2462_v37  ;;  %v8616_v40 = vld [vmem:[%s10818_s29 + $0xb8] sm:$0x3f]  }
0x106e   : > { %8070 = vmatpush3.bf16.msra.mxu0 %v2645_v39  ;;  %8077 = vmatprep.mubr.msk.bf16.mxu0 %vm8942_vm1, %v8941_v1 }
0x106f   : > { %8071 = vmatprep.subr.bf16.mxu0 %v8941_v1 }
0x1072   : > { %8072 = vmatpush3.bf16.msra.mxu0 %v8613_v43 }
0x1073   : > { %8073 = vmatprep.subr.bf16.mxu0 %v8941_v1 }
0x1076   : > { %v2597_v45 = vpop.f32.mrf.mxu1  ;;  %8074 = vmatpush3.bf16.msra.mxu0 %v8614_v44 }
0x1077   : > { %8075 = vmatprep.subr.bf16.mxu0 %v8941_v1  ;;  %v2598_v60 = vadd.f32 %v7045_v48, %v2597_v45 }
0x1078   : > { %v8067_v49 = vpop.f32.mrf.mxu1 }
0x1079   : > { %v8617_v49 = vld [vmem:[%s10818_s29 + $0xb0] sm:$0xff]  }
0x107a   : > { %v2600_v38 = vpop.f32.mrf.mxu1  ;;  %8076 = vmatpush3.bf16.msra.mxu0 %v8615_v46 }
0x107b   : > { %v2601_v51 = vadd.f32 %v7045_v48, %v2600_v38  ;;  %8093 = vmatprep.subr.bf16.mxu0 %v8941_v1  ;;  %v2988_v48 = vsel %vm857_vm6, %v8616_v40, 0  ;;  %v8618_v38 = vld [vmem:[%s10818_s29 + $0xa8] sm:$0xff]  }
0x107c   : > { %v8068_v52 = vpop.f32.mrf.mxu1 }
0x107d   : > { %v2772_v41 = vpack.c.bf16 %v2601_v51, %v2598_v60  ;;  %8078 = vmatmul.mubr.msk.bf16.vlgmr.msra.gmra.mxu0 %vm771_vm5, %v9208_v3  ;;  %v8619_v60 = vld [vmem:[%s10818_s29 + $0xa0] sm:$0xff]   ;;  %v8620_v51 = vld [vmem:[%s10770_s9 + $0xb8] sm:$0x3f]  }
0x107e   : > { %8095 = vmatprep.mubr.msk.bf16.mxu0 %vm8942_vm1, %v8941_v1  ;;  %v3156_v52 = vsel %vm857_vm6, %v8620_v51, 0 }
0x1086   : > { %v2765_v62 = vpop.f32.mrf.mxu1 }
0x1087   : > { %v2766_v56 = vadd.f32 %v7075_v54, %v2765_v62  ;;  %v8622_v62 = vld [vmem:[%s10770_s9 + $0xa8] sm:$0xff]  }
0x1088   : > { %v8091_v11 = vpop.f32.mrf.mxu1 }
0x1089   : > { %v8624_v11 = vld [vmem:[%s10772_s11 + $0x20] sm:$0x1f]  }
0x108a   : > { %v2768_v55 = vpop.f32.mrf.mxu1 }
0x108b   : > { %v2769_v57 = vadd.f32 %v7075_v54, %v2768_v55  ;;  %v8623_v54 = vld [vmem:[%s10770_s9 + $0xa0] sm:$0xff]   ;;  %v2902_v55 = vsel %vm1569_vm11, %v8624_v11, 0 }
0x108c   : > { %v8092_v58 = vpop.f32.mrf.mxu1  ;;  %8106 = vmatpush3.bf16.msra.mxu1 %v2902_v55 }
0x108d   : > { %v2844_v59 = vpack.c.bf16 %v2769_v57, %v2766_v56  ;;  %8123 = vmatprep.subr.bf16.mxu1 %v8941_v1  ;;  %v8625_v57 = vld [vmem:[%s10819_s7 + $0xb8] sm:$0x3f]  }
0x112d   : > { %v2511_v12 = vpop.f32.mrf.mxu0 }
0x112e   : > { %v9662_v61 = vadd.f32 %v2511_v12, %v9560_v36 }
0x112f   : > { %v8055_v63 = vpop.f32.mrf.mxu0 }
0x1130   : > { %v3072_v63 = vsel %vm857_vm6, %v8625_v57, 0 }
0x1131   : > { %v2514_v2 = vpop.f32.mrf.mxu0 }
0x1132   : > { %v9665_v4 = vadd.f32 %v2514_v2, %v9564_v42 }
0x1133   : > { %v8056_v5 = vpop.f32.mrf.mxu0 }
0x1134   : > { %v8626_v5 = vld [vmem:[%s10819_s7 + $0xb0] sm:$0xff]  }
0x113d   : > { %v2681_v6 = vpop.f32.mrf.mxu0 }
0x113e   : > { %v2682_v10 = vadd.f32 %v7060_v7, %v2681_v6  ;;  %v8627_v6 = vld [vmem:[%s10819_s7 + $0xa8] sm:$0xff]  }
0x113f   : > { %v8079_v8 = vpop.f32.mrf.mxu0 }
0x1140   : > { %v8628_v8 = vld [vmem:[%s10819_s7 + $0xa0] sm:$0xff]  }
0x1141   : > { %v2684_v9 = vpop.f32.mrf.mxu0 }
0x1142   : > { %v2685_v13 = vadd.f32 %v7060_v7, %v2684_v9  ;;  %v7096_v9 = vld [vmem:[%s10823_s6 + $0x5] ss:$0 sm:$0xff] }
0x1143   : > { %v8080_v14 = vpop.f32.mrf.mxu0 }
0x1144   : > { %v2773_v15 = vpack.c.bf16 %v2685_v13, %v2682_v10 }
0x1146   : > { %v2778_v36 = vsel %vm1068_vm7, %v2773_v15, 0 }
0x1147   : > { %8094 = vmatpush3.bf16.xpose.msra.mxu0 %v2778_v36 }
0x1148   : > { %8099 = vmatprep.subr.bf16.mxu0 %v8941_v1 }
0x114e   : > { %8096 = vmatmul.mubr.msk.bf16.vlgmr.msra.gmra.mxu0 %vm1068_vm7, %v2772_v41  ;;  %v8621_v41 = vld [vmem:[%s10770_s9 + $0xb0] sm:$0xff]  }
0x114f   : > { %8100 = vmatpush3.bf16.msra.mxu0 %v2844_v59  ;;  %8101 = vmatprep.mubr.msk.bf16.mxu0 %vm8942_vm1, %v8941_v1 }
0x1150   : > { %8111 = vmatprep.subr.bf16.mxu0 %v8941_v1 }
0x120e   : > { %v2814_v42 = vpop.f32.mrf.mxu0 }
0x120f   : > { %v2815_v16 = vadd.f32 %v2814_v42, %v9299_v50 }
0x1210   : > { %v8097_v17 = vpop.f32.mrf.mxu0 }
0x1211   : > { %v2821_v18 = vsel %vm1116_vm10, %v2815_v16, -inf  ;;  %v7126_v17 = vld [vmem:[%s10771_s10 + $0x5] ss:$0 sm:$0xff] }
0x1212   : > { %2822 = vmax.xlane.f32.xlu1 %v2821_v18  ;;  %v2817_v19 = vpop.f32.mrf.mxu0 }
0x1213   : > { %v2818_v21 = vadd.f32 %v2817_v19, %v9303_v53 }
0x1214   : > { %v8098_v22 = vpop.f32.mrf.mxu0 }
0x1215   : > { %v2824_v23 = vsel %vm1116_vm10, %v2818_v21, -inf }
0x1216   : > { %2825 = vmax.xlane.f32.xlu0 %v2824_v23 }
0x129b   : > { %v2823_v24 = vpop.xlane.xlu1 %2822 }
0x129c   : > { %v2827_v26 = vsub.f32 %v2815_v16, %v2823_v24 }
0x129e   : > { %v2829_v27 = vmul.f32 1.442695, %v2827_v26 }
0x129f   : > { %v2826_v28 = vpop.xlane.xlu0 %2825 }
0x12a0   : > { %8802 = vpow2.f32 %v2829_v27  ;;  %v2828_v29 = vsub.f32 %v2818_v21, %v2826_v28 }
0x12a2   : > { %v2831_v30 = vmul.f32 1.442695, %v2828_v29 }
0x12a4   : > { %8804 = vpow2.f32 %v2831_v30 }
0x12ad   : > { %v8803_v31 = vpop.eup %8802 }
0x12ae   : > { %v2833_v32 = vsel %vm1116_vm10, %v8803_v31, 0.0 }
0x12af   : > { %2834 = vadd.xlane.f32.xlu1 %v2833_v32  ;;  %v7111_v32 = vld [vmem:[%s10769_s8 + $0x5] ss:$0 sm:$0xff] }
0x12b1   : > { %v8805_v33 = vpop.eup %8804 }
0x12b2   : > { %v2836_v34 = vsel %vm1116_vm10, %v8805_v33, 0.0 }
0x12b3   : > { %2837 = vadd.xlane.f32.xlu0 %v2836_v34 }
0x1338   : > { %v2835_v35 = vpop.xlane.xlu1 %2834 }
0x1339   : > { %8806 = vrcp.f32 %v2835_v35 }
0x133c   : > { %v2838_v37 = vpop.xlane.xlu0 %2837 }
0x133d   : > { %8808 = vrcp.f32 %v2838_v37 }
0x1346   : > { %v8807_v39 = vpop.eup %8806 }
0x1347   : > { %v2841_v44 = vmul.f32 %v8807_v39, %v8803_v31 }
0x134a   : > { %v8809_v43 = vpop.eup %8808 }
0x134b   : > { %v2842_v45 = vmul.f32 %v8809_v43, %v8805_v33 }
0x134d   : > { %v2843_v46 = vpack.c.bf16 %v2842_v45, %v2841_v44 }
0x134f   : > { %8102 = vmatmul.mubr.msk.bf16.vlgmr.msra.gmra.mxu0 %vm1116_vm10, %v2843_v46 }
0x1350   : > { %8112 = vmatpush3.bf16.msra.mxu0 %v2988_v48  ;;  %8119 = vmatprep.mubr.msk.bf16.mxu0 %vm8942_vm1, %v8941_v1 }
0x1351   : > { %8113 = vmatprep.subr.bf16.mxu0 %v8941_v1 }
0x1354   : > { %8114 = vmatpush3.bf16.msra.mxu0 %v8617_v49 }
0x1355   : > { %8115 = vmatprep.subr.bf16.mxu0 %v8941_v1 }
0x1358   : > { %8116 = vmatpush3.bf16.msra.mxu0 %v8618_v38 }
0x1359   : > { %8117 = vmatprep.subr.bf16.mxu0 %v8941_v1 }
0x135c   : > { %8118 = vmatpush3.bf16.msra.mxu0 %v8619_v60 }
0x135d   : > { %8135 = vmatprep.subr.bf16.mxu0 %v8941_v1 }
0x135f   : > { %8120 = vmatmul.mubr.msk.bf16.vlgmr.msra.gmra.mxu0 %vm771_vm5, %v9208_v3 }
0x1360   : > { %8136 = vmatpush3.bf16.msra.mxu0 %v3156_v52  ;;  %8143 = vmatprep.mubr.msk.bf16.mxu0 %vm8942_vm1, %v8941_v1 }
0x1361   : > { %8137 = vmatprep.subr.bf16.mxu0 %v8941_v1 }
0x1364   : > { %8138 = vmatpush3.bf16.msra.mxu0 %v8621_v41 }
0x1365   : > { %8139 = vmatprep.subr.bf16.mxu0 %v8941_v1 }
0x1368   : > { %8140 = vmatpush3.bf16.msra.mxu0 %v8622_v62 }
0x1369   : > { %8141 = vmatprep.subr.bf16.mxu0 %v8941_v1 }
0x136c   : > { %8142 = vmatpush3.bf16.msra.mxu0 %v8623_v54 }
0x136d   : > { %8159 = vmatprep.subr.bf16.mxu0 %v8941_v1 }
0x136f   : > { %8144 = vmatmul.mubr.msk.bf16.vlgmr.msra.gmra.mxu0 %vm771_vm5, %v9208_v3 }
0x1370   : > { %8161 = vmatprep.mubr.msk.bf16.mxu0 %vm8942_vm1, %v8941_v1 }
0x140f   : > { %v2882_v56 = vpop.f32.mrf.mxu0 }
0x1411   : > { %v8103_v58 = vpop.f32.mrf.mxu0 }
0x1413   : > { %v2885_v59 = vpop.f32.mrf.mxu0 }
0x1414   : > { %v2889_v12 = vpack.c.bf16 %v2885_v59, %v2882_v56 }
0x1415   : > { %v8104_v2 = vpop.f32.mrf.mxu0 }
0x1416   : > { %8108 = vmatmul.mubr.msk.bf16.vlgmr.msra.gmra.mxu1 %vm1068_vm7, %v2889_v12 }
0x1417   : > { %8124 = vmatpush3.bf16.msra.mxu1 %v3072_v63  ;;  %8131 = vmatprep.mubr.msk.bf16.mxu1 %vm8942_vm1, %v8941_v1 }
0x1418   : > { %8125 = vmatprep.subr.bf16.mxu1 %v8941_v1 }
0x141b   : > { %8126 = vmatpush3.bf16.msra.mxu1 %v8626_v5 }
0x141c   : > { %8127 = vmatprep.subr.bf16.mxu1 %v8941_v1 }
0x141f   : > { %v3024_v7 = vpop.f32.mrf.mxu0  ;;  %8128 = vmatpush3.bf16.msra.mxu1 %v8627_v6 }
0x1420   : > { %8129 = vmatprep.subr.bf16.mxu1 %v8941_v1  ;;  %v3025_v14 = vadd.f32 %v7096_v9, %v3024_v7  ;;  %v8629_v7 = vld [vmem:[%s10772_s11 + $0x28] sm:$0x1f]  }
0x1421   : > { %v8121_v10 = vpop.f32.mrf.mxu0 }
0x1423   : > { %v3027_v13 = vpop.f32.mrf.mxu0  ;;  %8130 = vmatpush3.bf16.msra.mxu1 %v8628_v8  ;;  %v3329_v8 = vsel %vm1569_vm11, %v8629_v7, 0  ;;  %v7139_v7 = vld [vmem:[%s10774_s13] ss:$0 sm:$0xff] }
0x1424   : > { %v3028_v15 = vadd.f32 %v7096_v9, %v3027_v13  ;;  %8147 = vmatprep.subr.bf16.mxu1 %v8941_v1  ;;  %8160 = vmatpush3.bf16.msra.mxu0 %v3329_v8 }
0x1425   : > { %v8122_v36 = vpop.f32.mrf.mxu0  ;;  %3677 = vmatprep.subr.bf16.mxu0 %v8940_v0 }
0x1426   : > { %v3199_v42 = vpack.c.bf16 %v3028_v15, %v3025_v14  ;;  %8132 = vmatmul.mubr.msk.bf16.vlgmr.msra.gmra.mxu1 %vm771_vm5, %v9208_v3 }
0x1427   : > { %8149 = vmatprep.mubr.msk.bf16.mxu1 %vm8942_vm1, %v8941_v1 }
0x142f   : > { %v3192_v16 = vpop.f32.mrf.mxu0 }
0x1430   : > { %v3193_v21 = vadd.f32 %v7126_v17, %v3192_v16  ;;  %v7138_v16 = vld [vmem:[%s10773_s12] ss:$0 sm:$0xff] }
0x1431   : > { %v8145_v18 = vpop.f32.mrf.mxu0 }
0x1433   : > { %v3195_v19 = vpop.f32.mrf.mxu0 }
0x1434   : > { %v3196_v22 = vadd.f32 %v7126_v17, %v3195_v19 }
0x1435   : > { %v8146_v23 = vpop.f32.mrf.mxu0 }
0x1436   : > { %v3271_v24 = vpack.c.bf16 %v3196_v22, %v3193_v21 }
0x14d6   : > { %v2938_v26 = vpop.f32.mrf.mxu1 }
0x14d7   : > { %v9763_v27 = vadd.f32 %v2938_v26, %v9662_v61 }
0x14d8   : > { %v8109_v28 = vpop.f32.mrf.mxu1 }
0x14da   : > { %v2941_v3 = vpop.f32.mrf.mxu1 }
0x14db   : > { %v9766_v29 = vadd.f32 %v2941_v3, %v9665_v4 }
0x14dc   : > { %v8110_v30 = vpop.f32.mrf.mxu1 }
0x14e6   : > { %v3108_v31 = vpop.f32.mrf.mxu1 }
0x14e7   : > { %v3109_v35 = vadd.f32 %v7111_v32, %v3108_v31 }
0x14e8   : > { %v8133_v33 = vpop.f32.mrf.mxu1 }
0x14ea   : > { %v3111_v34 = vpop.f32.mrf.mxu1 }
0x14eb   : > { %v3112_v37 = vadd.f32 %v7111_v32, %v3111_v34 }
0x14ec   : > { %v8134_v39 = vpop.f32.mrf.mxu1 }
0x14ed   : > { %v3200_v40 = vpack.c.bf16 %v3112_v37, %v3109_v35  ;;  %v8630_v37 = vld [vmem:[%s10776_s15 + $0x34] ss:$8 sps:$4 sm:$0x3f]   ;;  %v8632_v39 = vld [vmem:[%s10776_s15 + $0x30] ss:$8 sps:$4 sm:$0x3f]  }
0x14ef   : > { %v3205_v61 = vsel %vm1068_vm7, %v3200_v40, 0  ;;  %v3492_v40 = vsel %vm857_vm6, %v8632_v39, 0 }
0x14f0   : > { %8148 = vmatpush3.bf16.xpose.msra.mxu1 %v3205_v61  ;;  %v8635_v61 = vld [vmem:[%s10776_s15 + $0x24] ss:$8 sps:$4 sm:$0xff]  }
0x14f1   : > { %8153 = vmatprep.subr.bf16.mxu1 %v8941_v1 }
0x14f7   : > { %8150 = vmatmul.mubr.msk.bf16.vlgmr.msra.gmra.mxu1 %vm1068_vm7, %v3199_v42 }
0x14f8   : > { %8154 = vmatpush3.bf16.msra.mxu1 %v3271_v24  ;;  %8155 = vmatprep.mubr.msk.bf16.mxu1 %vm8942_vm1, %v8941_v1 }
0x14f9   : > { %7149 = vmatprep.subr.msk.bf16.mxu1 %vm857_vm6, %v8630_v37 }
0x15b7   : > { %v3241_v4 = vpop.f32.mrf.mxu1 }
0x15b8   : > { %v3242_v43 = vadd.f32 %v3241_v4, %v9299_v50  ;;  %v8633_v4 = vld [vmem:[%s10776_s15 + $0x20] ss:$8 sps:$4 sm:$0xff]  }
0x15b9   : > { %v8151_v44 = vpop.f32.mrf.mxu1 }
0x15ba   : > { %v3248_v45 = vsel %vm1116_vm10, %v3242_v43, -inf  ;;  %v8636_v44 = vld [vmem:[%s10776_s15 + $0x10] ss:$8 sps:$4 sm:$0xff]  }
0x15bb   : > { %3249 = vmax.xlane.f32.xlu1 %v3248_v45  ;;  %v3244_v46 = vpop.f32.mrf.mxu1  ;;  %v8641_v45 = vld [vmem:[%s10776_s15 + $0x4] ss:$8 sps:$4 sm:$0xff]  }
0x15bc   : > { %v3245_v48 = vadd.f32 %v3244_v46, %v9303_v53  ;;  %v8639_v46 = vld [vmem:[%s10776_s15] ss:$8 sps:$4 sm:$0xff]  }
0x15bd   : > { %v8152_v49 = vpop.f32.mrf.mxu1 }
0x15be   : > { %v3251_v38 = vsel %vm1116_vm10, %v3245_v48, -inf  ;;  %v8643_v49 = vld [vmem:[%s10778_s17 + $0x30] sm:$0xff]  }
0x15bf   : > { %3252 = vmax.xlane.f32.xlu0 %v3251_v38  ;;  %v8644_v38 = vld [vmem:[%s10778_s17 + $0x28] sm:$0xff]  }
0x1644   : > { %v3250_v60 = vpop.xlane.xlu1 %3249 }
0x1645   : > { %v3254_v51 = vsub.f32 %v3242_v43, %v3250_v60  ;;  %v8638_v43 = vld [vmem:[%s10776_s15 + $0x14] ss:$8 sps:$4 sm:$0xff]   ;;  %v8645_v60 = vld [vmem:[%s10778_s17 + $0x20] sm:$0xff]  }
0x1647   : > { %v3256_v52 = vmul.f32 1.442695, %v3254_v51  ;;  %v8646_v51 = vld [vmem:[%s10778_s17 + $0x18] sm:$0xff]  }
0x1648   : > { %v3253_v41 = vpop.xlane.xlu0 %3252 }
0x1649   : > { %8810 = vpow2.f32 %v3256_v52  ;;  %v3255_v62 = vsub.f32 %v3245_v48, %v3253_v41  ;;  %v8642_v48 = vld [vmem:[%s10778_s17 + $0x38] sm:$0xff]   ;;  %v8647_v52 = vld [vmem:[%s10778_s17 + $0x10] sm:$0xff]   ;;  %v8648_v41 = vld [vmem:[%s10778_s17 + $0x8] sm:$0xff]  }
0x164b   : > { %v3258_v54 = vmul.f32 1.442695, %v3255_v62  ;;  %v8649_v62 = vld [vmem:[%s10778_s17] sm:$0xff]  }
0x164d   : > { %8812 = vpow2.f32 %v3258_v54  ;;  %v8650_v54 = vld [vmem:[%s10778_s17 + $0x70] sm:$0xff]  }
0x1656   : > { %v8811_v11 = vpop.eup %8810 }
0x1657   : > { %v3260_v55 = vsel %vm1116_vm10, %v8811_v11, 0.0 }
0x1658   : > { %3261 = vadd.xlane.f32.xlu1 %v3260_v55  ;;  %v8652_v55 = vld [vmem:[%s10778_s17 + $0x60] sm:$0xff]  }
0x165a   : > { %v8813_v56 = vpop.eup %8812 }
0x165b   : > { %v3263_v57 = vsel %vm1116_vm10, %v8813_v56, 0.0 }
0x165c   : > { %3264 = vadd.xlane.f32.xlu0 %v3263_v57 }
0x16e1   : > { %v3262_v58 = vpop.xlane.xlu1 %3261 }
0x16e2   : > { %8814 = vrcp.f32 %v3262_v58 }
0x16e5   : > { %v3265_v59 = vpop.xlane.xlu0 %3264 }
0x16e6   : > { %8816 = vrcp.f32 %v3265_v59 }
0x16ef   : > { %v8815_v12 = vpop.eup %8814 }
0x16f0   : > { %v3268_v2 = vmul.f32 %v8815_v12, %v8811_v11  ;;  %v8651_v11 = vld [vmem:[%s10778_s17 + $0x68] sm:$0xff]  }
0x16f3   : > { %v8817_v63 = vpop.eup %8816 }
0x16f4   : > { %v3269_v5 = vmul.f32 %v8817_v63, %v8813_v56  ;;  %v8653_v56 = vld [vmem:[%s10778_s17 + $0x58] sm:$0xff]  }
0x16f6   : > { %v3270_v6 = vpack.c.bf16 %v3269_v5, %v3268_v2 }
0x16f8   : > { %8156 = vmatmul.mubr.msk.bf16.vlgmr.msra.gmra.mxu1 %vm1116_vm10, %v3270_v6 }
0x16f9   : > { %3529 = vmatprep.mubr.bf16.mxu1 %v8940_v0  ;;  %3506 = vmatpush1.bf16.msra.mxu1 %v3492_v40 }
0x16fa   : > { %3507 = vmatprep.subr.bf16.mxu1 %v8635_v61  ;;  %v7151_v61 = vld [vmem:[%s10779_s18] ss:$0 sm:$0xff] }
0x16fd   : > { %3508 = vmatpush1.bf16.msra.mxu1 %v8633_v4 }
0x16fe   : > { %3509 = vmatprep.subr.bf16.mxu1 %v8638_v43 }
0x1701   : > { %3510 = vmatpush1.bf16.msra.mxu1 %v8636_v44 }
0x1702   : > { %3511 = vmatprep.subr.bf16.mxu1 %v8641_v45 }
0x1705   : > { %3512 = vmatpush1.bf16.msra.mxu1 %v8639_v46 }
0x1706   : > { %8165 = vmatprep.subr.bf16.mxu1 %v8941_v1 }
0x17b8   : > { %v3309_v9 = vpop.f32.mrf.mxu1 }
0x17ba   : > { %v8157_v10 = vpop.f32.mrf.mxu1 }
0x17bc   : > { %v3312_v13 = vpop.f32.mrf.mxu1 }
0x17bd   : > { %v3316_v14 = vpack.c.bf16 %v3312_v13, %v3309_v9  ;;  %v7140_v13 = vld [vmem:[%s10775_s14] ss:$0 sm:$0xff] }
0x17be   : > { %v8158_v15 = vpop.f32.mrf.mxu1 }
0x17bf   : > { %8162 = vmatmul.mubr.msk.bf16.vlgmr.msra.gmra.mxu0 %vm1068_vm7, %v3316_v14 }
0x17c0   : > { %3678 = vmatpush1.bf16.msra.mxu0 %v8642_v48 }
0x17c1   : > { %3679 = vmatprep.subr.bf16.mxu0 %v8940_v0 }
0x17c4   : > { %3680 = vmatpush1.bf16.msra.mxu0 %v8643_v49 }
0x17c5   : > { %3681 = vmatprep.subr.bf16.mxu0 %v8940_v0 }
0x17c8   : > { %3682 = vmatpush1.bf16.msra.mxu0 %v8644_v38 }
0x17c9   : > { %3683 = vmatprep.subr.bf16.mxu0 %v8940_v0 }
0x17cc   : > { %3684 = vmatpush1.bf16.msra.mxu0 %v8645_v60 }
0x17cd   : > { %3685 = vmatprep.subr.bf16.mxu0 %v8940_v0 }
0x17d0   : > { %3686 = vmatpush1.bf16.msra.mxu0 %v8646_v51 }
0x17d1   : > { %3687 = vmatprep.subr.bf16.mxu0 %v8940_v0 }
0x17d4   : > { %3688 = vmatpush1.bf16.msra.mxu0 %v8647_v52 }
0x17d5   : > { %3689 = vmatprep.subr.bf16.mxu0 %v8940_v0 }
0x17d8   : > { %3690 = vmatpush1.bf16.msra.mxu0 %v8648_v41 }
0x17d9   : > { %3691 = vmatprep.subr.bf16.mxu0 %v8940_v0 }
0x17dc   : > { %3692 = vmatpush1.bf16.msra.mxu0 %v8649_v62 }
0x17dd   : > { %3695 = vmatprep.subr.bf16.mxu0 %v8940_v0 }
0x17e0   : > { %3696 = vmatpush2.bf16.msra.mxu0 %v8650_v54 }
0x17e1   : > { %3697 = vmatprep.subr.bf16.mxu0 %v8940_v0 }
0x17e4   : > { %3698 = vmatpush2.bf16.msra.mxu0 %v8651_v11 }
0x17e5   : > { %3699 = vmatprep.subr.bf16.mxu0 %v8940_v0 }
0x17e8   : > { %3700 = vmatpush2.bf16.msra.mxu0 %v8652_v55 }
0x17e9   : > { %3701 = vmatprep.subr.bf16.mxu0 %v8940_v0 }
0x17ec   : > { %3702 = vmatpush2.bf16.msra.mxu0 %v8653_v56 }
0x17ed   : > { %3703 = vmatprep.subr.bf16.mxu0 %v8940_v0 }
0x187f   : > { %v3365_v36 = vpop.f32.mrf.mxu0 }
0x1880   : > { %v3372_v42 = vadd.f32 %v3365_v36, %v9763_v27 }
0x1881   : > { %v8163_v17 = vpop.f32.mrf.mxu0 }
0x1882   : > { %v3374_v18 = vadd.f32 %v3372_v42, %v9150_v20  ;;  %v8655_v17 = vld [vmem:[%s10778_s17 + $0x48] sm:$0xff]  }
0x1883   : > { %v3368_v19 = vpop.f32.mrf.mxu0 }
0x1884   : > { %v9795_v21 = vadd.f32 %v7138_v16, %v3374_v18  ;;  %v3373_v22 = vadd.f32 %v3368_v19, %v9766_v29  ;;  %v8656_v18 = vld [vmem:[%s10778_s17 + $0x40] sm:$0xff]   ;;  %v3446_v19 = vsub.s32 1, %v9294_v47 }
0x1885   : > { %v8164_v23 = vpop.f32.mrf.mxu0 }
0x1886   : > { %v3375_v24 = vadd.f32 %v3373_v22, %v9157_v25  ;;  %v3387_v26 = vsel %vm771_vm5, %v9795_v21, 0.0  ;;  %v3442_v22 = vsub.s32 0, %v9294_v47  ;;  %v3438_v23 = vld [vmem:[%s10777_s16] sm:$0x3]  ;;  %v8763_v47 = vld [vmem:[%s10780_s19 + $0x10] sm:$0xff]  }
0x1887   : > { %3388 = vadd.xlane.f32.xlu1 %v3387_v26  ;;  %v3447_v26 = vrot.slane %v3438_v23, %v3446_v19 }
0x1888   : > { %v9801_v27 = vadd.f32 %v7138_v16, %v3375_v24  ;;  %v8654_v16 = vld [vmem:[%s10778_s17 + $0x50] sm:$0xff]  }
0x1889   : > { %3704 = vmatpush2.bf16.msra.mxu0 %v8654_v16 }
0x188a   : > { %v3390_v28 = vsel %vm771_vm5, %v9801_v27, 0.0  ;;  %3705 = vmatprep.subr.bf16.mxu0 %v8940_v0 }
0x188b   : > { %3391 = vadd.xlane.f32.xlu0 %v3390_v28  ;;  %v3443_v28 = vrot.slane %v3438_v23, %v3442_v22  ;;  %v8661_v23 = vld [vmem:[%s10819_s7 + $0xd8] sm:$0x3f]  }
0x188d   : > { %3706 = vmatpush2.bf16.msra.mxu0 %v8655_v17  ;;  %v7171_v17 = vld [vmem:[%s10822_s4 + $0x1] ss:$0 sm:$0xff]  ;;  %s10719_s4 = scalar_lea.hbm %s10824_s22, %s7563_s21 }
0x188e   : > { %3707 = vmatprep.subr.bf16.mxu0 %v8940_v0 }
0x1891   : > { %3708 = vmatpush2.bf16.msra.mxu0 %v8656_v18 }
0x1892   : > { %8201 = vmatprep.subr.bf16.mxu0 %v8941_v1 }
0x1910   : > { %v3389_v3 = vpop.xlane.xlu1 %3388 }
0x1911   : > { %v3393_v20 = vmul.f32 0.016666668, %v3389_v3 }
0x1913   : > { %v9806_v30 = vsub.f32 %v9795_v21, %v3393_v20 }
0x1914   : > { %v3392_v31 = vpop.xlane.xlu0 %3391 }
0x1915   : > { %v3394_v29 = vmul.f32 0.016666668, %v3392_v31  ;;  %v3397_v25 = vmul.f32 %v9806_v30, %v9806_v30 }
0x1917   : > { %v9811_v32 = vsub.f32 %v9801_v27, %v3394_v29  ;;  %v3399_v33 = vsel %vm771_vm5, %v3397_v25, 0.0 }
0x1918   : > { %3400 = vadd.xlane.f32.xlu1 %v3399_v33 }
0x1919   : > { %v3398_v34 = vmul.f32 %v9811_v32, %v9811_v32 }
0x191b   : > { %v3402_v35 = vsel %vm771_vm5, %v3398_v34, 0.0 }
0x191c   : > { %3403 = vadd.xlane.f32.xlu0 %v3402_v35 }
0x19a1   : > { %v3401_v57 = vpop.xlane.xlu1 %3400 }
0x19a2   : > { %v3405_v58 = vmul.f32 0.016666668, %v3401_v57 }
0x19a4   : > { %v3407_v59 = vadd.f32 1e-05, %v3405_v58  ;;  %v8657_v58 = vld [vmem:[%s10818_s29 + $0xd8] sm:$0x3f]  }
0x19a5   : > { %v3404_v12 = vpop.xlane.xlu0 %3403 }
0x19a6   : > { %8818 = vrsqrt.f32 %v3407_v59  ;;  %v3406_v63 = vmul.f32 0.016666668, %v3404_v12  ;;  %v3811_v59 = vsel %vm857_vm6, %v8657_v58, 0  ;;  %v8658_v12 = vld [vmem:[%s10818_s29 + $0xd0] sm:$0xff]  }
0x19a8   : > { %v3408_v2 = vadd.f32 1e-05, %v3406_v63  ;;  %v8659_v63 = vld [vmem:[%s10818_s29 + $0xc8] sm:$0xff]  }
0x19aa   : > { %8820 = vrsqrt.f32 %v3408_v2  ;;  %v8660_v2 = vld [vmem:[%s10818_s29 + $0xc0] sm:$0xff]  }
0x19b3   : > { %v8819_v5 = vpop.eup %8818 }
0x19b4   : > { %v3411_v6 = vmul.f32 %v8819_v5, %v9806_v30 }
0x19b6   : > { %v3419_v10 = vmul.f32 %v7139_v7, %v3411_v6 }
0x19b7   : > { %v8821_v8 = vpop.eup %8820 }
0x19b8   : > { %v3412_v9 = vmul.f32 %v8821_v8, %v9811_v32  ;;  %v3427_v15 = vadd.f32 %v7140_v13, %v3419_v10 }
0x19ba   : > { %v3420_v14 = vmul.f32 %v7139_v7, %v3412_v9 }
0x19bc   : > { %v3428_v36 = vadd.f32 %v7140_v13, %v3420_v14 }
0x19be   : > { %v3429_v42 = vpack.c.bf16 %v3428_v36, %v3427_v15  ;;  %v7170_v15 = vld [vmem:[%s10821_s30 + $0x1] ss:$0 sm:$0xff] }
0x19c0   : > { %7150 = vmatmul.mubr.msk.bf16.vlgmr.msra.gmra.mxu1 %vm771_vm5, %v3429_v42 }
0x19c1   : > { %8173 = vmatprep.mubr.msk.bf16.mxu1 %vm8942_vm1, %v8941_v1  ;;  %8166 = vmatpush3.bf16.msra.mxu1 %v3811_v59 }
0x19c2   : > { %8167 = vmatprep.subr.bf16.mxu1 %v8941_v1 }
0x19c5   : > { %8168 = vmatpush3.bf16.msra.mxu1 %v8658_v12 }
0x19c6   : > { %8169 = vmatprep.subr.bf16.mxu1 %v8941_v1 }
0x19c9   : > { %8170 = vmatpush3.bf16.msra.mxu1 %v8659_v63 }
0x19ca   : > { %8171 = vmatprep.subr.bf16.mxu1 %v8941_v1 }
0x19cd   : > { %8172 = vmatpush3.bf16.msra.mxu1 %v8660_v2  ;;  %v8671_v2 = vld [vmem:[%s10818_s29 + $0xe8] sm:$0xff]  }
0x19ce   : > { %8177 = vmatprep.subr.bf16.mxu1 %v8941_v1 }
0x1a80   : > { %v3531_v24 = vpop.f32.mrf.mxu1 }
0x1a81   : > { %v3532_v29 = vadd.f32 %v3531_v24, %v3443_v28 }
0x1a82   : > { %v3533_v3 = vpop.f32.mrf.mxu1 }
0x1a83   : > { %v3534_v30 = vadd.f32 %v3533_v3, %v3447_v26  ;;  %v3540_v37 = vmax.f32 %v3532_v29, 0.0  ;;  %v3895_v3 = vsel %vm857_vm6, %v8661_v23, 0  ;;  %v8665_v29 = vld [vmem:[%s10770_s9 + $0xd8] sm:$0x3f]  }
0x1a84   : > { %v3535_v20 = vpop.f32.mrf.mxu1 }
0x1a85   : > { %v3536_v31 = vadd.f32 %v3535_v20, %v3443_v28  ;;  %v3541_v34 = vmax.f32 %v3534_v30, 0.0  ;;  %v8662_v20 = vld [vmem:[%s10819_s7 + $0xd0] sm:$0xff]   ;;  %v8663_v30 = vld [vmem:[%s10819_s7 + $0xc8] sm:$0xff]  }
0x1a86   : > { %v3537_v25 = vpop.f32.mrf.mxu1 }
0x1a87   : > { %v3538_v32 = vadd.f32 %v3537_v25, %v3447_v26  ;;  %v3542_v33 = vmax.f32 %v3536_v31, 0.0  ;;  %v8664_v31 = vld [vmem:[%s10819_s7 + $0xc0] sm:$0xff]   ;;  %v3979_v25 = vsel %vm857_vm6, %v8665_v29, 0 }
0x1a89   : > { %v3543_v35 = vmax.f32 %v3538_v32, 0.0  ;;  %v3544_v40 = vpack.c.bf16 %v3542_v33, %v3540_v37  ;;  %v8666_v32 = vld [vmem:[%s10770_s9 + $0xd0] sm:$0xff]   ;;  %v8667_v33 = vld [vmem:[%s10770_s9 + $0xc8] sm:$0xff]  }
0x1a8b   : > { %v3545_v39 = vpack.c.bf16 %v3543_v35, %v3541_v34  ;;  %v8668_v34 = vld [vmem:[%s10770_s9 + $0xc0] sm:$0xff]  }
0x1a8d   : > { %7167 = vmatprep.mubr.msk.bf16.mxu0 %vm3673_vm12, %v3545_v39 }
0x1a8e   : > { %3710 = vmatmul.mubr.bf16.vlgmr.msra.gmra.mxu0 %v3544_v40 }
0x1a8f   : > { %8203 = vmatprep.mubr.msk.bf16.mxu0 %vm8942_vm1, %v8941_v1 }
0x1b4e   : > { %v3711_v4 = vpop.f32.mrf.mxu0 }
0x1b4f   : > { %v3712_v43 = vadd.f32 %v7151_v61, %v3711_v4  ;;  %v7196_v4 = vld [vmem:[%s10769_s8 + $0x6] ss:$0 sm:$0xff] }
0x1b50   : > { %v3713_v44 = vpop.f32.mrf.mxu0 }
0x1b51   : > { %v9931_v45 = vadd.f32 %v3712_v43, %v9795_v21 }
0x1b52   : > { %v3714_v46 = vpop.f32.mrf.mxu0 }
0x1b53   : > { %v3715_v48 = vadd.f32 %v7151_v61, %v3714_v46  ;;  %v3724_v49 = vsel %vm771_vm5, %v9931_v45, 0.0 }
0x1b54   : > { %v3716_v38 = vpop.f32.mrf.mxu0  ;;  %3725 = vadd.xlane.f32.xlu1 %v3724_v49 }
0x1b55   : > { %v9936_v60 = vadd.f32 %v3715_v48, %v9801_v27 }
0x1b57   : > { %v3727_v51 = vsel %vm771_vm5, %v9936_v60, 0.0 }
0x1b58   : > { %3728 = vadd.xlane.f32.xlu0 %v3727_v51 }
0x1bdd   : > { %v3726_v52 = vpop.xlane.xlu1 %3725 }
0x1bde   : > { %v3730_v41 = vmul.f32 0.016666668, %v3726_v52  ;;  %v7181_v52 = vld [vmem:[%s10823_s6 + $0x6] ss:$0 sm:$0xff] }
0x1be0   : > { %v3732_v62 = vsub.f32 %v9931_v45, %v3730_v41 }
0x1be1   : > { %v3729_v21 = vpop.xlane.xlu0 %3728 }
0x1be2   : > { %v3731_v54 = vmul.f32 0.016666668, %v3729_v21  ;;  %v3734_v11 = vmul.f32 %v3732_v62, %v3732_v62 }
0x1be4   : > { %v3733_v55 = vsub.f32 %v9936_v60, %v3731_v54  ;;  %v3736_v56 = vsel %vm771_vm5, %v3734_v11, 0.0 }
0x1be5   : > { %3737 = vadd.xlane.f32.xlu1 %v3736_v56  ;;  %v7211_v56 = vld [vmem:[%s10771_s10 + $0x6] ss:$0 sm:$0xff] }
0x1be6   : > { %v3735_v57 = vmul.f32 %v3733_v55, %v3733_v55 }
0x1be8   : > { %v3739_v27 = vsel %vm771_vm5, %v3735_v57, 0.0 }
0x1be9   : > { %3740 = vadd.xlane.f32.xlu0 %v3739_v27  ;;  %v8670_v27 = vld [vmem:[%s10818_s29 + $0xf0] sm:$0xff]  }
0x1c6e   : > { %v3738_v5 = vpop.xlane.xlu1 %3737 }
0x1c6f   : > { %v3742_v6 = vmul.f32 0.016666668, %v3738_v5 }
0x1c71   : > { %v3744_v7 = vadd.f32 1e-05, %v3742_v6  ;;  %v8672_v6 = vld [vmem:[%s10818_s29 + $0xe0] sm:$0xff]  }
0x1c72   : > { %v3741_v8 = vpop.xlane.xlu0 %3740 }
0x1c73   : > { %8822 = vrsqrt.f32 %v3744_v7  ;;  %v3743_v9 = vmul.f32 0.016666668, %v3741_v8  ;;  %v8673_v7 = vld [vmem:[%s10770_s9 + $0xf8] sm:$0x3f]  }
0x1c74   : > { %v4352_v8 = vsel %vm857_vm6, %v8673_v7, 0 }
0x1c75   : > { %v3745_v10 = vadd.f32 1e-05, %v3743_v9  ;;  %v8674_v9 = vld [vmem:[%s10770_s9 + $0xf0] sm:$0xff]  }
0x1c77   : > { %8824 = vrsqrt.f32 %v3745_v10  ;;  %v8675_v10 = vld [vmem:[%s10770_s9 + $0xe8] sm:$0xff]  }
0x1c80   : > { %v8823_v13 = vpop.eup %8822 }
0x1c81   : > { %v3748_v14 = vmul.f32 %v8823_v13, %v3732_v62  ;;  %v8669_v62 = vld [vmem:[%s10818_s29 + $0xf8] sm:$0x3f]   ;;  %v8676_v13 = vld [vmem:[%s10770_s9 + $0xe0] sm:$0xff]  }
0x1c82   : > { %v4184_v11 = vsel %vm857_vm6, %v8669_v62, 0 }
0x1c83   : > { %v3756_v42 = vmul.f32 %v7170_v15, %v3748_v14 }
0x1c84   : > { %v8825_v36 = vpop.eup %8824 }
0x1c85   : > { %v3749_v16 = vmul.f32 %v8825_v36, %v3733_v55  ;;  %v3764_v24 = vadd.f32 %v7171_v17, %v3756_v42 }
0x1c87   : > { %v3757_v18 = vmul.f32 %v7170_v15, %v3749_v16 }
0x1c89   : > { %v3765_v26 = vadd.f32 %v7171_v17, %v3757_v18 }
0x1c8b   : > { %v9970_v28 = vpack.c.bf16 %v3765_v26, %v3764_v24  ;;  %v7230_v26 = vld [vmem:[%s10823_s6 + $0x7] ss:$0 sm:$0xff] }
0x1c8d   : > { %8174 = vmatmul.mubr.msk.bf16.vlgmr.msra.gmra.mxu1 %vm771_vm5, %v9970_v28 }
0x1c8e   : > { %8178 = vmatpush3.bf16.msra.mxu1 %v3895_v3  ;;  %8185 = vmatprep.mubr.msk.bf16.mxu1 %vm8942_vm1, %v8941_v1 }
0x1c8f   : > { %8179 = vmatprep.subr.bf16.mxu1 %v8941_v1 }
0x1c92   : > { %8180 = vmatpush3.bf16.msra.mxu1 %v8662_v20 }
0x1c93   : > { %8181 = vmatprep.subr.bf16.mxu1 %v8941_v1 }
0x1c96   : > { %8182 = vmatpush3.bf16.msra.mxu1 %v8663_v30 }
0x1c97   : > { %8183 = vmatprep.subr.bf16.mxu1 %v8941_v1 }
0x1c9a   : > { %8184 = vmatpush3.bf16.msra.mxu1 %v8664_v31 }
0x1c9b   : > { %8189 = vmatprep.subr.bf16.mxu1 %v8941_v1 }
0x1c9d   : > { %8186 = vmatmul.mubr.msk.bf16.vlgmr.msra.gmra.mxu1 %vm771_vm5, %v9970_v28 }
0x1c9e   : > { %8190 = vmatpush3.bf16.msra.mxu1 %v3979_v25  ;;  %8197 = vmatprep.mubr.msk.bf16.mxu1 %vm8942_vm1, %v8941_v1 }
0x1c9f   : > { %8191 = vmatprep.subr.bf16.mxu1 %v8941_v1 }
0x1ca2   : > { %8192 = vmatpush3.bf16.msra.mxu1 %v8666_v32 }
0x1ca3   : > { %8193 = vmatprep.subr.bf16.mxu1 %v8941_v1 }
0x1ca6   : > { %8194 = vmatpush3.bf16.msra.mxu1 %v8667_v33  ;;  %v7260_v33 = vld [vmem:[%s10771_s10 + $0x7] ss:$0 sm:$0xff] }
0x1ca7   : > { %8195 = vmatprep.subr.bf16.mxu1 %v8941_v1 }
0x1caa   : > { %8196 = vmatpush3.bf16.msra.mxu1 %v8668_v34 }
0x1cab   : > { %8207 = vmatprep.subr.bf16.mxu1 %v8941_v1 }
0x1cad   : > { %8198 = vmatmul.mubr.msk.bf16.vlgmr.msra.gmra.mxu1 %vm771_vm5, %v9970_v28 }
0x1cae   : > { %8209 = vmatprep.mubr.msk.bf16.mxu1 %vm8942_vm1, %v8941_v1 }
0x1d4d   : > { %v3847_v35 = vpop.f32.mrf.mxu1 }
0x1d4e   : > { %v3848_v21 = vadd.f32 %v7181_v52, %v3847_v35 }
0x1d4f   : > { %v8175_v37 = vpop.f32.mrf.mxu1 }
0x1d51   : > { %v3850_v39 = vpop.f32.mrf.mxu1 }
0x1d52   : > { %v3851_v41 = vadd.f32 %v7181_v52, %v3850_v39 }
0x1d53   : > { %v8176_v40 = vpop.f32.mrf.mxu1 }
0x1d54   : > { %v4022_v54 = vpack.c.bf16 %v3851_v41, %v3848_v21 }
0x1d5d   : > { %v3931_v61 = vpop.f32.mrf.mxu1 }
0x1d5e   : > { %v3932_v46 = vadd.f32 %v7196_v4, %v3931_v61 }
0x1d5f   : > { %v8187_v43 = vpop.f32.mrf.mxu1 }
0x1d61   : > { %v3934_v44 = vpop.f32.mrf.mxu1 }
0x1d62   : > { %v3935_v48 = vadd.f32 %v7196_v4, %v3934_v44 }
0x1d63   : > { %v8188_v49 = vpop.f32.mrf.mxu1 }
0x1d64   : > { %v4023_v38 = vpack.c.bf16 %v3935_v48, %v3932_v46 }
0x1d66   : > { %v4028_v51 = vsel %vm1068_vm7, %v4023_v38, 0 }
0x1d67   : > { %8202 = vmatpush3.bf16.xpose.msra.mxu0 %v4028_v51 }
0x1d68   : > { %8213 = vmatprep.subr.bf16.mxu0 %v8941_v1 }
0x1d6d   : > { %v4015_v55 = vpop.f32.mrf.mxu1 }
0x1d6e   : > { %8204 = vmatmul.mubr.msk.bf16.vlgmr.msra.gmra.mxu0 %vm1068_vm7, %v4022_v54  ;;  %v4016_v59 = vadd.f32 %v7211_v56, %v4015_v55 }
0x1d6f   : > { %v8199_v57 = vpop.f32.mrf.mxu1  ;;  %8214 = vmatpush3.bf16.msra.mxu0 %v4184_v11  ;;  %8221 = vmatprep.mubr.msk.bf16.mxu0 %vm8942_vm1, %v8941_v1  ;;  %v8677_v11 = vld [vmem:[%s10819_s7 + $0xf8] sm:$0x3f]  }
0x1d70   : > { %8215 = vmatprep.subr.bf16.mxu0 %v8941_v1 }
0x1d71   : > { %v4018_v58 = vpop.f32.mrf.mxu1 }
0x1d72   : > { %v4019_v12 = vadd.f32 %v7211_v56, %v4018_v58  ;;  %v4268_v58 = vsel %vm857_vm6, %v8677_v11, 0  ;;  %v8685_v11 = vld [vmem:[%s10819_s7 + $0x100] sm:$0xff]  }
0x1d73   : > { %v8200_v63 = vpop.f32.mrf.mxu1  ;;  %8216 = vmatpush3.bf16.msra.mxu0 %v8670_v27 }
0x1d74   : > { %v4094_v5 = vpack.c.bf16 %v4019_v12, %v4016_v59  ;;  %8217 = vmatprep.subr.bf16.mxu0 %v8941_v1  ;;  %v8678_v59 = vld [vmem:[%s10819_s7 + $0xf0] sm:$0xff]   ;;  %v8679_v12 = vld [vmem:[%s10819_s7 + $0xe8] sm:$0xff]   ;;  %v8680_v63 = vld [vmem:[%s10819_s7 + $0xe0] sm:$0xff]  }
0x1d76   : > { %8208 = vmatpush3.bf16.msra.mxu1 %v4094_v5 }
0x1d77   : > { %8218 = vmatpush3.bf16.msra.mxu0 %v8671_v2  ;;  %8225 = vmatprep.subr.bf16.mxu1 %v8941_v1 }
0x1d78   : > { %8219 = vmatprep.subr.bf16.mxu0 %v8941_v1 }
0x1d7b   : > { %8220 = vmatpush3.bf16.msra.mxu0 %v8672_v6 }
0x1d7c   : > { %8237 = vmatprep.subr.bf16.mxu0 %v8941_v1 }
0x1d7e   : > { %8222 = vmatmul.mubr.msk.bf16.vlgmr.msra.gmra.mxu0 %vm771_vm5, %v9970_v28 }
0x1d7f   : > { %8238 = vmatpush3.bf16.msra.mxu0 %v4352_v8  ;;  %8245 = vmatprep.mubr.msk.bf16.mxu0 %vm8942_vm1, %v8941_v1 }
0x1d80   : > { %8239 = vmatprep.subr.bf16.mxu0 %v8941_v1 }
0x1d83   : > { %8240 = vmatpush3.bf16.msra.mxu0 %v8674_v9 }
0x1d84   : > { %8241 = vmatprep.subr.bf16.mxu0 %v8941_v1 }
0x1d87   : > { %8242 = vmatpush3.bf16.msra.mxu0 %v8675_v10  ;;  %v7245_v10 = vld [vmem:[%s10769_s8 + $0x7] ss:$0 sm:$0xff] }
0x1d88   : > { %8243 = vmatprep.subr.bf16.mxu0 %v8941_v1 }
0x1d8b   : > { %8244 = vmatpush3.bf16.msra.mxu0 %v8676_v13 }
0x1d8c   : > { %8261 = vmatprep.subr.bf16.mxu0 %v8941_v1 }
0x1d8e   : > { %8246 = vmatmul.mubr.msk.bf16.vlgmr.msra.gmra.mxu0 %vm771_vm5, %v9970_v28 }
0x1d8f   : > { %8263 = vmatprep.mubr.msk.bf16.mxu0 %vm8942_vm1, %v8941_v1 }
0x1e2e   : > { %v4064_v14 = vpop.f32.mrf.mxu0 }
0x1e2f   : > { %v4065_v15 = vadd.f32 %v4064_v14, %v9299_v50 }
0x1e30   : > { %v8205_v36 = vpop.f32.mrf.mxu0 }
0x1e31   : > { %v4071_v42 = vsel %vm1116_vm10, %v4065_v15, -inf }
0x1e32   : > { %4072 = vmax.xlane.f32.xlu1 %v4071_v42  ;;  %v4067_v16 = vpop.f32.mrf.mxu0 }
0x1e33   : > { %v4068_v17 = vadd.f32 %v4067_v16, %v9303_v53 }
0x1e34   : > { %v8206_v18 = vpop.f32.mrf.mxu0 }
0x1e35   : > { %v4074_v23 = vsel %vm1116_vm10, %v4068_v17, -inf }
0x1e36   : > { %4075 = vmax.xlane.f32.xlu0 %v4074_v23 }
0x1e3e   : > { %v4220_v24 = vpop.f32.mrf.mxu0 }
0x1e3f   : > { %v10079_v30 = vadd.f32 %v7230_v26, %v4220_v24 }
0x1e40   : > { %v8223_v3 = vpop.f32.mrf.mxu0 }
0x1e42   : > { %v4223_v20 = vpop.f32.mrf.mxu0 }
0x1e43   : > { %v10081_v31 = vadd.f32 %v7230_v26, %v4223_v20 }
0x1e44   : > { %v8224_v29 = vpop.f32.mrf.mxu0 }
0x1e45   : > { %v4395_v25 = vpack.c.bf16 %v10081_v31, %v10079_v30 }
0x1e4e   : > { %v4388_v32 = vpop.f32.mrf.mxu0 }
0x1e4f   : > { %v4389_v37 = vadd.f32 %v7260_v33, %v4388_v32 }
0x1e50   : > { %v8247_v34 = vpop.f32.mrf.mxu0 }
0x1e52   : > { %v4391_v35 = vpop.f32.mrf.mxu0 }
0x1e53   : > { %v4392_v39 = vadd.f32 %v7260_v33, %v4391_v35 }
0x1e54   : > { %v8248_v40 = vpop.f32.mrf.mxu0 }
0x1e55   : > { %v4467_v61 = vpack.c.bf16 %v4392_v39, %v4389_v37 }
0x1ebb   : > { %v4073_v4 = vpop.xlane.xlu1 %4072 }
0x1ebc   : > { %v4077_v43 = vsub.f32 %v4065_v15, %v4073_v4 }
0x1ebe   : > { %v4079_v44 = vmul.f32 1.442695, %v4077_v43 }
0x1ebf   : > { %v4076_v46 = vpop.xlane.xlu0 %4075 }
0x1ec0   : > { %8826 = vpow2.f32 %v4079_v44  ;;  %v4078_v48 = vsub.f32 %v4068_v17, %v4076_v46  ;;  %v8681_v46 = vld [vmem:[%s10772_s11 + $0x30] sm:$0x1f]  }
0x1ec2   : > { %v4081_v49 = vmul.f32 1.442695, %v4078_v48 }
0x1ec4   : > { %8828 = vpow2.f32 %v4081_v49 }
0x1ecd   : > { %v8827_v38 = vpop.eup %8826 }
0x1ece   : > { %v4083_v51 = vsel %vm1116_vm10, %v8827_v38, 0.0 }
0x1ecf   : > { %4084 = vadd.xlane.f32.xlu1 %v4083_v51 }
0x1ed1   : > { %v8829_v52 = vpop.eup %8828 }
0x1ed2   : > { %v4086_v41 = vsel %vm1116_vm10, %v8829_v52, 0.0 }
0x1ed3   : > { %4087 = vadd.xlane.f32.xlu0 %v4086_v41  ;;  %v8682_v41 = vld [vmem:[%s10819_s7 + $0x118] sm:$0x3f]  }
0x1f58   : > { %v4085_v62 = vpop.xlane.xlu1 %4084 }
0x1f59   : > { %8830 = vrcp.f32 %v4085_v62  ;;  %v4745_v62 = vsel %vm857_vm6, %v8682_v41, 0 }
0x1f5c   : > { %v4088_v21 = vpop.xlane.xlu0 %4087 }
0x1f5d   : > { %8832 = vrcp.f32 %v4088_v21  ;;  %v8683_v21 = vld [vmem:[%s10819_s7 + $0x110] sm:$0xff]  }
0x1f66   : > { %v8831_v54 = vpop.eup %8830 }
0x1f67   : > { %v4091_v56 = vmul.f32 %v8831_v54, %v8827_v38  ;;  %v8684_v54 = vld [vmem:[%s10819_s7 + $0x108] sm:$0xff]  }
0x1f6a   : > { %v8833_v55 = vpop.eup %8832 }
0x1f6b   : > { %v4092_v57 = vmul.f32 %v8833_v55, %v8829_v52  ;;  %v4577_v52 = vsel %vm1569_vm11, %v8681_v46, 0  ;;  %v8686_v55 = vld [vmem:[%s10772_s11 + $0x38] sm:$0x1f]   ;;  %v7313_v46 = vld [vmem:[%s10771_s10 + $0x8] ss:$0 sm:$0xff] }
0x1f6d   : > { %v4093_v27 = vpack.c.bf16 %v4092_v57, %v4091_v56  ;;  %v4525_v56 = vsel %vm1569_vm11, %v8686_v55, 0 }
0x1f6e   : > { %8262 = vmatpush3.bf16.msra.mxu0 %v4525_v56 }
0x1f6f   : > { %8210 = vmatmul.mubr.msk.bf16.vlgmr.msra.gmra.mxu1 %vm1116_vm10, %v4093_v27  ;;  %8273 = vmatprep.subr.bf16.mxu0 %v8941_v1  ;;  %v8687_v27 = vld [vmem:[%s10818_s29 + $0x118] sm:$0x3f]  }
0x1f70   : > { %8226 = vmatpush3.bf16.msra.mxu1 %v4268_v58  ;;  %8233 = vmatprep.mubr.msk.bf16.mxu1 %vm8942_vm1, %v8941_v1 }
0x1f71   : > { %8227 = vmatprep.subr.bf16.mxu1 %v8941_v1 }
0x1f74   : > { %8228 = vmatpush3.bf16.msra.mxu1 %v8678_v59 }
0x1f75   : > { %8229 = vmatprep.subr.bf16.mxu1 %v8941_v1 }
0x1f78   : > { %8230 = vmatpush3.bf16.msra.mxu1 %v8679_v12 }
0x1f79   : > { %8231 = vmatprep.subr.bf16.mxu1 %v8941_v1 }
0x1f7c   : > { %8232 = vmatpush3.bf16.msra.mxu1 %v8680_v63  ;;  %v4661_v63 = vsel %vm857_vm6, %v8687_v27, 0 }
0x1f7d   : > { %8249 = vmatprep.subr.bf16.mxu1 %v8941_v1 }
0x1f7f   : > { %8234 = vmatmul.mubr.msk.bf16.vlgmr.msra.gmra.mxu1 %vm771_vm5, %v9970_v28 }
0x1f80   : > { %8251 = vmatprep.mubr.msk.bf16.mxu1 %vm8942_vm1, %v8941_v1 }
0x202f   : > { %v4132_v2 = vpop.f32.mrf.mxu1 }
0x2031   : > { %v8211_v5 = vpop.f32.mrf.mxu1 }
0x2033   : > { %v4135_v6 = vpop.f32.mrf.mxu1 }
0x2034   : > { %v4139_v7 = vpack.c.bf16 %v4135_v6, %v4132_v2  ;;  %v8688_v6 = vld [vmem:[%s10818_s29 + $0x110] sm:$0xff]  }
0x2035   : > { %v8212_v8 = vpop.f32.mrf.mxu1 }
0x203f   : > { %v4304_v9 = vpop.f32.mrf.mxu1 }
0x2040   : > { %v4305_v15 = vadd.f32 %v7245_v10, %v4304_v9  ;;  %v8689_v9 = vld [vmem:[%s10818_s29 + $0x108] sm:$0xff]  }
0x2041   : > { %v8235_v13 = vpop.f32.mrf.mxu1 }
0x2042   : > { %v8690_v13 = vld [vmem:[%s10818_s29 + $0x100] sm:$0xff]  }
0x2043   : > { %v4307_v14 = vpop.f32.mrf.mxu1 }
0x2044   : > { %v4308_v36 = vadd.f32 %v7245_v10, %v4307_v14  ;;  %v8691_v14 = vld [vmem:[%s10770_s9 + $0x118] sm:$0x3f]  }
0x2045   : > { %v8236_v42 = vpop.f32.mrf.mxu1 }
0x2046   : > { %v4396_v16 = vpack.c.bf16 %v4308_v36, %v4305_v15  ;;  %v4829_v15 = vsel %vm857_vm6, %v8691_v14, 0  ;;  %v8692_v42 = vld [vmem:[%s10770_s9 + $0x110] sm:$0xff]  }
0x2048   : > { %v4401_v17 = vsel %vm1068_vm7, %v4396_v16, 0  ;;  %v7298_v16 = vld [vmem:[%s10769_s8 + $0x8] ss:$0 sm:$0xff] }
0x2049   : > { %8250 = vmatpush3.bf16.xpose.msra.mxu1 %v4401_v17 }
0x204a   : > { %8255 = vmatprep.subr.bf16.mxu1 %v8941_v1 }
0x2050   : > { %8252 = vmatmul.mubr.msk.bf16.vlgmr.msra.gmra.mxu1 %vm1068_vm7, %v4395_v25 }
0x2051   : > { %8256 = vmatpush3.bf16.msra.mxu1 %v4467_v61  ;;  %8257 = vmatprep.mubr.msk.bf16.mxu1 %vm8942_vm1, %v8941_v1 }
0x2052   : > { %8267 = vmatprep.subr.bf16.mxu1 %v8941_v1 }
0x2110   : > { %v4437_v18 = vpop.f32.mrf.mxu1 }
0x2111   : > { %v4438_v23 = vadd.f32 %v4437_v18, %v9299_v50 }
0x2112   : > { %v8253_v24 = vpop.f32.mrf.mxu1 }
0x2113   : > { %v4444_v26 = vsel %vm1116_vm10, %v4438_v23, -inf }
0x2114   : > { %4445 = vmax.xlane.f32.xlu1 %v4444_v26  ;;  %v4440_v3 = vpop.f32.mrf.mxu1 }
0x2115   : > { %v4441_v20 = vadd.f32 %v4440_v3, %v9303_v53 }
0x2116   : > { %v8254_v29 = vpop.f32.mrf.mxu1 }
0x2117   : > { %v4447_v30 = vsel %vm1116_vm10, %v4441_v20, -inf  ;;  %v8694_v29 = vld [vmem:[%s10770_s9 + $0x100] sm:$0xff]  }
0x2118   : > { %4448 = vmax.xlane.f32.xlu0 %v4447_v30 }
0x219d   : > { %v4446_v31 = vpop.xlane.xlu1 %4445 }
0x219e   : > { %v4450_v25 = vsub.f32 %v4438_v23, %v4446_v31  ;;  %v8693_v23 = vld [vmem:[%s10770_s9 + $0x108] sm:$0xff]  }
0x21a0   : > { %v4452_v32 = vmul.f32 1.442695, %v4450_v25 }
0x21a1   : > { %v4449_v33 = vpop.xlane.xlu0 %4448 }
0x21a2   : > { %8834 = vpow2.f32 %v4452_v32  ;;  %v4451_v34 = vsub.f32 %v4441_v20, %v4449_v33 }
0x21a4   : > { %v4454_v35 = vmul.f32 1.442695, %v4451_v34 }
0x21a6   : > { %8836 = vpow2.f32 %v4454_v35  ;;  %v7283_v35 = vld [vmem:[%s10823_s6 + $0x8] ss:$0 sm:$0xff] }
0x21af   : > { %v8835_v37 = vpop.eup %8834 }
0x21b0   : > { %v4456_v39 = vsel %vm1116_vm10, %v8835_v37, 0.0 }
0x21b1   : > { %4457 = vadd.xlane.f32.xlu1 %v4456_v39 }
0x21b3   : > { %v8837_v40 = vpop.eup %8836 }
0x21b4   : > { %v4459_v61 = vsel %vm1116_vm10, %v8837_v40, 0.0 }
0x21b5   : > { %4460 = vadd.xlane.f32.xlu0 %v4459_v61 }
0x223a   : > { %v4458_v4 = vpop.xlane.xlu1 %4457 }
0x223b   : > { %8838 = vrcp.f32 %v4458_v4 }
0x223e   : > { %v4461_v43 = vpop.xlane.xlu0 %4460 }
0x223f   : > { %8840 = vrcp.f32 %v4461_v43 }
0x2248   : > { %v8839_v44 = vpop.eup %8838 }
0x2249   : > { %v4464_v49 = vmul.f32 %v8839_v44, %v8835_v37 }
0x224c   : > { %v8841_v48 = vpop.eup %8840 }
0x224d   : > { %v4465_v38 = vmul.f32 %v8841_v48, %v8837_v40 }
0x224f   : > { %v4466_v51 = vpack.c.bf16 %v4465_v38, %v4464_v49 }
0x2251   : > { %8258 = vmatmul.mubr.msk.bf16.vlgmr.msra.gmra.mxu1 %vm1116_vm10, %v4466_v51 }
0x2252   : > { %8268 = vmatpush3.bf16.msra.mxu1 %v4577_v52  ;;  %8269 = vmatprep.mubr.msk.bf16.mxu1 %vm8942_vm1, %v8941_v1 }
0x2253   : > { %8285 = vmatprep.subr.bf16.mxu1 %v8941_v1 }
0x2259   : > { %8270 = vmatmul.mubr.msk.bf16.vlgmr.msra.gmra.mxu1 %vm1068_vm7, %v4139_v7 }
0x225a   : > { %8286 = vmatpush3.bf16.msra.mxu1 %v4745_v62  ;;  %8293 = vmatprep.mubr.msk.bf16.mxu1 %vm8942_vm1, %v8941_v1 }
0x225b   : > { %8287 = vmatprep.subr.bf16.mxu1 %v8941_v1 }
0x225e   : > { %8288 = vmatpush3.bf16.msra.mxu1 %v8683_v21 }
0x225f   : > { %8289 = vmatprep.subr.bf16.mxu1 %v8941_v1 }
0x2262   : > { %8290 = vmatpush3.bf16.msra.mxu1 %v8684_v54 }
0x2263   : > { %8291 = vmatprep.subr.bf16.mxu1 %v8941_v1 }
0x2266   : > { %8292 = vmatpush3.bf16.msra.mxu1 %v8685_v11 }
0x2267   : > { %8309 = vmatprep.subr.bf16.mxu1 %v8941_v1 }
0x2269   : > { %8294 = vmatmul.mubr.msk.bf16.vlgmr.msra.gmra.mxu1 %vm771_vm5, %v9970_v28 }
0x226a   : > { %8311 = vmatprep.mubr.msk.bf16.mxu1 %vm8942_vm1, %v8941_v1 }
0x2311   : > { %v4505_v57 = vpop.f32.mrf.mxu1 }
0x2313   : > { %v8259_v58 = vpop.f32.mrf.mxu1 }
0x2315   : > { %v4508_v59 = vpop.f32.mrf.mxu1 }
0x2316   : > { %v4512_v12 = vpack.c.bf16 %v4508_v59, %v4505_v57 }
0x2317   : > { %v8260_v2 = vpop.f32.mrf.mxu1 }
0x2318   : > { %8264 = vmatmul.mubr.msk.bf16.vlgmr.msra.gmra.mxu0 %vm1068_vm7, %v4512_v12 }
0x2319   : > { %8274 = vmatpush3.bf16.msra.mxu0 %v4661_v63  ;;  %v10174_v5 = vpop.f32.mrf.mxu1  ;;  %8281 = vmatprep.mubr.msk.bf16.mxu0 %vm8942_vm1, %v8941_v1 }
0x231a   : > { %8275 = vmatprep.subr.bf16.mxu0 %v8941_v1 }
0x231b   : > { %v8271_v7 = vpop.f32.mrf.mxu1 }
0x231d   : > { %8276 = vmatpush3.bf16.msra.mxu0 %v8688_v6  ;;  %v10182_v8 = vpop.f32.mrf.mxu1 }
0x231e   : > { %8277 = vmatprep.subr.bf16.mxu0 %v8941_v1 }
0x231f   : > { %v8272_v10 = vpop.f32.mrf.mxu1 }
0x2321   : > { %8278 = vmatpush3.bf16.msra.mxu0 %v8689_v9 }
0x2322   : > { %8279 = vmatprep.subr.bf16.mxu0 %v8941_v1 }
0x2325   : > { %8280 = vmatpush3.bf16.msra.mxu0 %v8690_v13 }
0x2326   : > { %8297 = vmatprep.subr.bf16.mxu0 %v8941_v1 }
0x2328   : > { %8282 = vmatmul.mubr.msk.bf16.vlgmr.msra.gmra.mxu0 %vm771_vm5, %v9970_v28 }
0x2329   : > { %v4781_v36 = vpop.f32.mrf.mxu1  ;;  %8298 = vmatpush3.bf16.msra.mxu0 %v4829_v15  ;;  %8305 = vmatprep.mubr.msk.bf16.mxu0 %vm8942_vm1, %v8941_v1 }
0x232a   : > { %8299 = vmatprep.subr.bf16.mxu0 %v8941_v1  ;;  %v4782_v24 = vadd.f32 %v7298_v16, %v4781_v36 }
0x232b   : > { %v8295_v17 = vpop.f32.mrf.mxu1 }
0x232d   : > { %v4784_v18 = vpop.f32.mrf.mxu1  ;;  %8300 = vmatpush3.bf16.msra.mxu0 %v8692_v42  ;;  %v8695_v42 = vld [vmem:[%s10818_s29 + $0x138] sm:$0x3f]  }
0x232e   : > { %v4785_v26 = vadd.f32 %v7298_v16, %v4784_v18  ;;  %8301 = vmatprep.subr.bf16.mxu0 %v8941_v1 }
0x232f   : > { %v8296_v3 = vpop.f32.mrf.mxu1 }
0x2330   : > { %v4873_v20 = vpack.c.bf16 %v4785_v26, %v4782_v24  ;;  %v5088_v24 = vsel %vm857_vm6, %v8695_v42, 0  ;;  %v8696_v26 = vld [vmem:[%s10818_s29 + $0x130] sm:$0xff]   ;;  %v8697_v3 = vld [vmem:[%s10818_s29 + $0x128] sm:$0xff]  }
0x2331   : > { %8302 = vmatpush3.bf16.msra.mxu0 %v8693_v23 }
0x2332   : > { %v4878_v30 = vsel %vm1068_vm7, %v4873_v20, 0  ;;  %8303 = vmatprep.subr.bf16.mxu0 %v8941_v1  ;;  %v8698_v20 = vld [vmem:[%s10818_s29 + $0x120] sm:$0xff]  }
0x2333   : > { %8310 = vmatpush3.bf16.xpose.msra.mxu1 %v4878_v30 }
0x2334   : > { %8315 = vmatprep.subr.bf16.mxu1 %v8941_v1 }
0x2335   : > { %8304 = vmatpush3.bf16.msra.mxu0 %v8694_v29  ;;  %v8699_v29 = vld [vmem:[%s10770_s9 + $0x138] sm:$0x3f]  }
0x2336   : > { %8321 = vmatprep.subr.bf16.mxu0 %v8941_v1  ;;  %v5256_v30 = vsel %vm857_vm6, %v8699_v29, 0 }
0x2338   : > { %8306 = vmatmul.mubr.msk.bf16.vlgmr.msra.gmra.mxu0 %vm771_vm5, %v9970_v28 }
0x2339   : > { %8323 = vmatprep.mubr.msk.bf16.mxu0 %vm8942_vm1, %v8941_v1 }
0x23d8   : > { %v10223_v31 = vpop.f32.mrf.mxu0 }
0x23da   : > { %v8265_v25 = vpop.f32.mrf.mxu0 }
0x23db   : > { %v8700_v25 = vld [vmem:[%s10770_s9 + $0x130] sm:$0xff]  }
0x23dc   : > { %v10225_v32 = vpop.f32.mrf.mxu0 }
0x23de   : > { %v8266_v33 = vpop.f32.mrf.mxu0 }
0x23df   : > { %v8701_v33 = vld [vmem:[%s10770_s9 + $0x128] sm:$0xff]  }
0x23e8   : > { %v4697_v34 = vpop.f32.mrf.mxu0 }
0x23e9   : > { %v4698_v40 = vadd.f32 %v7283_v35, %v4697_v34  ;;  %v8702_v34 = vld [vmem:[%s10770_s9 + $0x120] sm:$0xff]  }
0x23ea   : > { %v8283_v37 = vpop.f32.mrf.mxu0 }
0x23ec   : > { %v4700_v39 = vpop.f32.mrf.mxu0 }
0x23ed   : > { %v4701_v61 = vadd.f32 %v7283_v35, %v4700_v39  ;;  %v8703_v35 = vld [vmem:[%s10772_s11 + $0x40] sm:$0x1f]  }
0x23ee   : > { %v8284_v4 = vpop.f32.mrf.mxu0  ;;  %v5002_v37 = vsel %vm1569_vm11, %v8703_v35, 0 }
0x23ef   : > { %v4872_v43 = vpack.c.bf16 %v4701_v61, %v4698_v40  ;;  %8322 = vmatpush3.bf16.msra.mxu0 %v5002_v37  ;;  %v8704_v40 = vld [vmem:[%s10819_s7 + $0x138] sm:$0x3f]  }
0x23f0   : > { %8339 = vmatprep.subr.bf16.mxu0 %v8941_v1 }
0x23f1   : > { %8312 = vmatmul.mubr.msk.bf16.vlgmr.msra.gmra.mxu1 %vm1068_vm7, %v4872_v43 }
0x23f2   : > { %8317 = vmatprep.mubr.msk.bf16.mxu1 %vm8942_vm1, %v8941_v1 }
0x23f8   : > { %v4865_v44 = vpop.f32.mrf.mxu0 }
0x23f9   : > { %v4866_v38 = vadd.f32 %v7313_v46, %v4865_v44  ;;  %v5172_v44 = vsel %vm857_vm6, %v8704_v40, 0 }
0x23fa   : > { %v8307_v48 = vpop.f32.mrf.mxu0 }
0x23fb   : > { %v8705_v48 = vld [vmem:[%s10819_s7 + $0x130] sm:$0xff]  }
0x23fc   : > { %v4868_v49 = vpop.f32.mrf.mxu0 }
0x23fd   : > { %v4869_v51 = vadd.f32 %v7313_v46, %v4868_v49  ;;  %v8706_v49 = vld [vmem:[%s10819_s7 + $0x128] sm:$0xff]  }
0x23fe   : > { %v8308_v52 = vpop.f32.mrf.mxu0 }
0x23ff   : > { %v4944_v41 = vpack.c.bf16 %v4869_v51, %v4866_v38  ;;  %v8707_v51 = vld [vmem:[%s10819_s7 + $0x120] sm:$0xff]   ;;  %v7334_v52 = vld [vmem:[%s10823_s6 + $0x9] ss:$0 sm:$0xff] }
0x2401   : > { %8316 = vmatpush3.bf16.msra.mxu1 %v4944_v41 }
0x2402   : > { %8327 = vmatprep.subr.bf16.mxu1 %v8941_v1 }
0x24b1   : > { %v4914_v62 = vpop.f32.mrf.mxu1 }
0x24b2   : > { %v4915_v21 = vadd.f32 %v4914_v62, %v9299_v50 }
0x24b3   : > { %v8313_v54 = vpop.f32.mrf.mxu1 }
0x24b4   : > { %v4921_v11 = vsel %vm1116_vm10, %v4915_v21, -inf }
0x24b5   : > { %4922 = vmax.xlane.f32.xlu1 %v4921_v11  ;;  %v4917_v55 = vpop.f32.mrf.mxu1 }
0x24b6   : > { %v4918_v56 = vadd.f32 %v4917_v55, %v9303_v53 }
0x24b7   : > { %v8314_v57 = vpop.f32.mrf.mxu1 }
0x24b8   : > { %v4924_v27 = vsel %vm1116_vm10, %v4918_v56, -inf  ;;  %v7364_v57 = vld [vmem:[%s10771_s10 + $0x9] ss:$0 sm:$0xff] }
0x24b9   : > { %4925 = vmax.xlane.f32.xlu0 %v4924_v27 }
0x253e   : > { %v4923_v58 = vpop.xlane.xlu1 %4922 }
0x253f   : > { %v4927_v59 = vsub.f32 %v4915_v21, %v4923_v58 }
0x2541   : > { %v4929_v12 = vmul.f32 1.442695, %v4927_v59 }
0x2542   : > { %v4926_v63 = vpop.xlane.xlu0 %4925 }
0x2543   : > { %8842 = vpow2.f32 %v4929_v12  ;;  %v4928_v2 = vsub.f32 %v4918_v56, %v4926_v63 }
0x2545   : > { %v4931_v6 = vmul.f32 1.442695, %v4928_v2 }
0x2547   : > { %8844 = vpow2.f32 %v4931_v6  ;;  %v4614_v6 = vadd.f32 %v10174_v5, %v10223_v31 }
0x2550   : > { %v8843_v7 = vpop.eup %8842 }
0x2551   : > { %v4933_v9 = vsel %vm1116_vm10, %v8843_v7, 0.0 }
0x2552   : > { %4934 = vadd.xlane.f32.xlu1 %v4933_v9 }
0x2554   : > { %v8845_v10 = vpop.eup %8844 }
0x2555   : > { %v4936_v13 = vsel %vm1116_vm10, %v8845_v10, 0.0 }
0x2556   : > { %4937 = vadd.xlane.f32.xlu0 %v4936_v13  ;;  %v4617_v13 = vadd.f32 %v10182_v8, %v10225_v32 }
0x25db   : > { %v4935_v14 = vpop.xlane.xlu1 %4934 }
0x25dc   : > { %8846 = vrcp.f32 %v4935_v14 }
0x25df   : > { %v4938_v15 = vpop.xlane.xlu0 %4937 }
0x25e0   : > { %8848 = vrcp.f32 %v4938_v15 }
0x25e9   : > { %v8847_v36 = vpop.eup %8846 }
0x25ea   : > { %v4941_v17 = vmul.f32 %v8847_v36, %v8843_v7 }
0x25ed   : > { %v8849_v16 = vpop.eup %8848 }
0x25ee   : > { %v4942_v18 = vmul.f32 %v8849_v16, %v8845_v10  ;;  %v7349_v16 = vld [vmem:[%s10769_s8 + $0x9] ss:$0 sm:$0xff] }
0x25f0   : > { %v4943_v23 = vpack.c.bf16 %v4942_v18, %v4941_v17 }
0x25f2   : > { %8318 = vmatmul.mubr.msk.bf16.vlgmr.msra.gmra.mxu1 %vm1116_vm10, %v4943_v23 }
0x25f3   : > { %8328 = vmatpush3.bf16.msra.mxu1 %v5088_v24  ;;  %8335 = vmatprep.mubr.msk.bf16.mxu1 %vm8942_vm1, %v8941_v1 }
0x25f4   : > { %8329 = vmatprep.subr.bf16.mxu1 %v8941_v1 }
0x25f7   : > { %8330 = vmatpush3.bf16.msra.mxu1 %v8696_v26 }
0x25f8   : > { %8331 = vmatprep.subr.bf16.mxu1 %v8941_v1 }
0x25fb   : > { %8332 = vmatpush3.bf16.msra.mxu1 %v8697_v3 }
0x25fc   : > { %8333 = vmatprep.subr.bf16.mxu1 %v8941_v1 }
0x25ff   : > { %8334 = vmatpush3.bf16.msra.mxu1 %v8698_v20 }
0x2600   : > { %8351 = vmatprep.subr.bf16.mxu1 %v8941_v1 }
0x2602   : > { %8336 = vmatmul.mubr.msk.bf16.vlgmr.msra.gmra.mxu1 %vm771_vm5, %v9970_v28 }
0x2603   : > { %8352 = vmatpush3.bf16.msra.mxu1 %v5256_v30  ;;  %8359 = vmatprep.mubr.msk.bf16.mxu1 %vm8942_vm1, %v8941_v1 }
0x2604   : > { %8353 = vmatprep.subr.bf16.mxu1 %v8941_v1 }
0x2607   : > { %8354 = vmatpush3.bf16.msra.mxu1 %v8700_v25 }
0x2608   : > { %8355 = vmatprep.subr.bf16.mxu1 %v8941_v1 }
0x260b   : > { %8356 = vmatpush3.bf16.msra.mxu1 %v8701_v33 }
0x260c   : > { %8357 = vmatprep.subr.bf16.mxu1 %v8941_v1 }
0x260f   : > { %8358 = vmatpush3.bf16.msra.mxu1 %v8702_v34 }
0x2610   : > { %8375 = vmatprep.subr.bf16.mxu1 %v8941_v1 }
0x2612   : > { %8360 = vmatmul.mubr.msk.bf16.vlgmr.msra.gmra.mxu1 %vm771_vm5, %v9970_v28 }
0x2613   : > { %8377 = vmatprep.mubr.msk.bf16.mxu1 %vm8942_vm1, %v8941_v1 }
0x26b2   : > { %v4982_v39 = vpop.f32.mrf.mxu1 }
0x26b4   : > { %v8319_v61 = vpop.f32.mrf.mxu1 }
0x26b6   : > { %v4985_v4 = vpop.f32.mrf.mxu1 }
0x26b7   : > { %v4989_v43 = vpack.c.bf16 %v4985_v4, %v4982_v39 }
0x26b8   : > { %v8320_v46 = vpop.f32.mrf.mxu1 }
0x26b9   : > { %8324 = vmatmul.mubr.msk.bf16.vlgmr.msra.gmra.mxu0 %vm1068_vm7, %v4989_v43 }
0x26ba   : > { %8340 = vmatpush3.bf16.msra.mxu0 %v5172_v44  ;;  %8347 = vmatprep.mubr.msk.bf16.mxu0 %vm8942_vm1, %v8941_v1 }
0x26bb   : > { %8341 = vmatprep.subr.bf16.mxu0 %v8941_v1 }
0x26be   : > { %8342 = vmatpush3.bf16.msra.mxu0 %v8705_v48 }
0x26bf   : > { %8343 = vmatprep.subr.bf16.mxu0 %v8941_v1 }
0x26c2   : > { %v5124_v38 = vpop.f32.mrf.mxu1  ;;  %8344 = vmatpush3.bf16.msra.mxu0 %v8706_v49 }
0x26c3   : > { %8345 = vmatprep.subr.bf16.mxu0 %v8941_v1  ;;  %v5125_v21 = vadd.f32 %v7334_v52, %v5124_v38 }
0x26c4   : > { %v8337_v41 = vpop.f32.mrf.mxu1 }
0x26c6   : > { %v5127_v62 = vpop.f32.mrf.mxu1  ;;  %8346 = vmatpush3.bf16.msra.mxu0 %v8707_v51  ;;  %v8708_v51 = vld [vmem:[%s10818_s29 + $0x158] sm:$0x3f]  }
0x26c7   : > { %v5128_v54 = vadd.f32 %v7334_v52, %v5127_v62  ;;  %8363 = vmatprep.subr.bf16.mxu0 %v8941_v1 }
0x26c8   : > { %v8338_v11 = vpop.f32.mrf.mxu1 }
0x26c9   : > { %v5299_v55 = vpack.c.bf16 %v5128_v54, %v5125_v21  ;;  %8348 = vmatmul.mubr.msk.bf16.vlgmr.msra.gmra.mxu0 %vm771_vm5, %v9970_v28  ;;  %v5515_v54 = vsel %vm857_vm6, %v8708_v51, 0  ;;  %v8709_v11 = vld [vmem:[%s10818_s29 + $0x150] sm:$0xff]  }
0x26ca   : > { %8365 = vmatprep.mubr.msk.bf16.mxu0 %vm8942_vm1, %v8941_v1 }
0x26d2   : > { %v5292_v56 = vpop.f32.mrf.mxu1 }
0x26d3   : > { %v5293_v59 = vadd.f32 %v7364_v57, %v5292_v56  ;;  %v8711_v56 = vld [vmem:[%s10818_s29 + $0x140] sm:$0xff]  }
0x26d4   : > { %v8361_v27 = vpop.f32.mrf.mxu1 }
0x26d6   : > { %v5295_v58 = vpop.f32.mrf.mxu1 }
0x26d7   : > { %v5296_v12 = vadd.f32 %v7364_v57, %v5295_v58  ;;  %v8712_v57 = vld [vmem:[%s10770_s9 + $0x158] sm:$0x3f]   ;;  %v8713_v58 = vld [vmem:[%s10770_s9 + $0x150] sm:$0xff]  }
0x26d8   : > { %v8362_v63 = vpop.f32.mrf.mxu1  ;;  %v5683_v27 = vsel %vm857_vm6, %v8712_v57, 0 }
0x26d9   : > { %v5371_v2 = vpack.c.bf16 %v5296_v12, %v5293_v59  ;;  %v8714_v59 = vld [vmem:[%s10770_s9 + $0x148] sm:$0xff]   ;;  %v8715_v12 = vld [vmem:[%s10770_s9 + $0x140] sm:$0xff]  }
0x26da   : > { %v8716_v63 = vld [vmem:[%s10772_s11 + $0x48] sm:$0x1f]  }
0x2779   : > { %v5038_v7 = vpop.f32.mrf.mxu0 }
0x277a   : > { %v10325_v9 = vadd.f32 %v5038_v7, %v4614_v6  ;;  %v8717_v7 = vld [vmem:[%s10819_s7 + $0x158] sm:$0x3f]  }
0x277b   : > { %v8325_v10 = vpop.f32.mrf.mxu0 }
0x277d   : > { %v5041_v14 = vpop.f32.mrf.mxu0 }
0x277e   : > { %v10329_v15 = vadd.f32 %v5041_v14, %v4617_v13 }
0x277f   : > { %v8326_v36 = vpop.f32.mrf.mxu0 }
0x2780   : > { %v5599_v36 = vsel %vm857_vm6, %v8717_v7, 0 }
0x2789   : > { %v5208_v42 = vpop.f32.mrf.mxu0 }
0x278a   : > { %v5209_v23 = vadd.f32 %v7349_v16, %v5208_v42 }
0x278b   : > { %v8349_v17 = vpop.f32.mrf.mxu0 }
0x278c   : > { %v8719_v17 = vld [vmem:[%s10819_s7 + $0x148] sm:$0xff]  }
0x278d   : > { %v5211_v18 = vpop.f32.mrf.mxu0 }
0x278e   : > { %v5212_v5 = vadd.f32 %v7349_v16, %v5211_v18  ;;  %v8718_v16 = vld [vmem:[%s10819_s7 + $0x150] sm:$0xff]  }
0x278f   : > { %v8350_v31 = vpop.f32.mrf.mxu0 }
0x2790   : > { %v5300_v24 = vpack.c.bf16 %v5212_v5, %v5209_v23  ;;  %v8720_v23 = vld [vmem:[%s10819_s7 + $0x140] sm:$0xff]   ;;  %v7385_v5 = vld [vmem:[%s10823_s6 + $0xa] ss:$0 sm:$0xff] }
0x2792   : > { %v5305_v26 = vsel %vm1068_vm7, %v5300_v24, 0 }
0x2793   : > { %8364 = vmatpush3.bf16.xpose.msra.mxu0 %v5305_v26 }
0x2794   : > { %8369 = vmatprep.subr.bf16.mxu0 %v8941_v1 }
0x279a   : > { %8366 = vmatmul.mubr.msk.bf16.vlgmr.msra.gmra.mxu0 %vm1068_vm7, %v5299_v55  ;;  %v8710_v55 = vld [vmem:[%s10818_s29 + $0x148] sm:$0xff]  }
0x279b   : > { %8370 = vmatpush3.bf16.msra.mxu0 %v5371_v2  ;;  %8371 = vmatprep.mubr.msk.bf16.mxu0 %vm8942_vm1, %v8941_v1  ;;  %v5429_v2 = vsel %vm1569_vm11, %v8716_v63, 0 }
0x279c   : > { %8381 = vmatprep.subr.bf16.mxu0 %v8941_v1  ;;  %8376 = vmatpush3.bf16.msra.mxu1 %v5429_v2 }
0x279d   : > { %8393 = vmatprep.subr.bf16.mxu1 %v8941_v1 }
0x285a   : > { %v5341_v8 = vpop.f32.mrf.mxu0 }
0x285b   : > { %v5342_v32 = vadd.f32 %v5341_v8, %v9299_v50 }
0x285c   : > { %v8367_v3 = vpop.f32.mrf.mxu0 }
0x285d   : > { %v5348_v20 = vsel %vm1116_vm10, %v5342_v32, -inf }
0x285e   : > { %5349 = vmax.xlane.f32.xlu1 %v5348_v20  ;;  %v5344_v29 = vpop.f32.mrf.mxu0 }
0x285f   : > { %v5345_v30 = vadd.f32 %v5344_v29, %v9303_v53  ;;  %v7415_v29 = vld [vmem:[%s10771_s10 + $0xa] ss:$0 sm:$0xff] }
0x2860   : > { %v8368_v25 = vpop.f32.mrf.mxu0 }
0x2861   : > { %v5351_v33 = vsel %vm1116_vm10, %v5345_v30, -inf }
0x2862   : > { %5352 = vmax.xlane.f32.xlu0 %v5351_v33 }
0x28e7   : > { %v5350_v34 = vpop.xlane.xlu1 %5349 }
0x28e8   : > { %v5354_v35 = vsub.f32 %v5342_v32, %v5350_v34 }
0x28ea   : > { %v5356_v37 = vmul.f32 1.442695, %v5354_v35 }
0x28eb   : > { %v5353_v39 = vpop.xlane.xlu0 %5352 }
0x28ec   : > { %8850 = vpow2.f32 %v5356_v37  ;;  %v5355_v40 = vsub.f32 %v5345_v30, %v5353_v39 }
0x28ee   : > { %v5358_v61 = vmul.f32 1.442695, %v5355_v40 }
0x28f0   : > { %8852 = vpow2.f32 %v5358_v61 }
0x28f9   : > { %v8851_v4 = vpop.eup %8850 }
0x28fa   : > { %v5360_v43 = vsel %vm1116_vm10, %v8851_v4, 0.0 }
0x28fb   : > { %5361 = vadd.xlane.f32.xlu1 %v5360_v43 }
0x28fd   : > { %v8853_v44 = vpop.eup %8852 }
0x28fe   : > { %v5363_v46 = vsel %vm1116_vm10, %v8853_v44, 0.0 }
0x28ff   : > { %5364 = vadd.xlane.f32.xlu0 %v5363_v46 }
0x2984   : > { %v5362_v48 = vpop.xlane.xlu1 %5361 }
0x2985   : > { %8854 = vrcp.f32 %v5362_v48  ;;  %v7400_v48 = vld [vmem:[%s10769_s8 + $0xa] ss:$0 sm:$0xff] }
0x2988   : > { %v5365_v49 = vpop.xlane.xlu0 %5364 }
0x2989   : > { %8856 = vrcp.f32 %v5365_v49 }
0x2992   : > { %v8855_v38 = vpop.eup %8854 }
0x2993   : > { %v5368_v41 = vmul.f32 %v8855_v38, %v8851_v4 }
0x2996   : > { %v8857_v52 = vpop.eup %8856 }
0x2997   : > { %v5369_v62 = vmul.f32 %v8857_v52, %v8853_v44 }
0x2999   : > { %v5370_v21 = vpack.c.bf16 %v5369_v62, %v5368_v41 }
0x299b   : > { %8372 = vmatmul.mubr.msk.bf16.vlgmr.msra.gmra.mxu0 %vm1116_vm10, %v5370_v21 }
0x299c   : > { %8382 = vmatpush3.bf16.msra.mxu0 %v5515_v54  ;;  %8389 = vmatprep.mubr.msk.bf16.mxu0 %vm8942_vm1, %v8941_v1 }
0x299d   : > { %8383 = vmatprep.subr.bf16.mxu0 %v8941_v1 }
0x29a0   : > { %8384 = vmatpush3.bf16.msra.mxu0 %v8709_v11 }
0x29a1   : > { %8385 = vmatprep.subr.bf16.mxu0 %v8941_v1 }
0x29a4   : > { %8386 = vmatpush3.bf16.msra.mxu0 %v8710_v55 }
0x29a5   : > { %8387 = vmatprep.subr.bf16.mxu0 %v8941_v1 }
0x29a8   : > { %8388 = vmatpush3.bf16.msra.mxu0 %v8711_v56 }
0x29a9   : > { %8405 = vmatprep.subr.bf16.mxu0 %v8941_v1 }
0x29ab   : > { %8390 = vmatmul.mubr.msk.bf16.vlgmr.msra.gmra.mxu0 %vm771_vm5, %v9970_v28 }
0x29ac   : > { %8406 = vmatpush3.bf16.msra.mxu0 %v5683_v27  ;;  %8413 = vmatprep.mubr.msk.bf16.mxu0 %vm8942_vm1, %v8941_v1 }
0x29ad   : > { %8407 = vmatprep.subr.bf16.mxu0 %v8941_v1 }
0x29b0   : > { %8408 = vmatpush3.bf16.msra.mxu0 %v8713_v58 }
0x29b1   : > { %8409 = vmatprep.subr.bf16.mxu0 %v8941_v1 }
0x29b4   : > { %8410 = vmatpush3.bf16.msra.mxu0 %v8714_v59 }
0x29b5   : > { %8411 = vmatprep.subr.bf16.mxu0 %v8941_v1 }
0x29b8   : > { %8412 = vmatpush3.bf16.msra.mxu0 %v8715_v12 }
0x29b9   : > { %8429 = vmatprep.subr.bf16.mxu0 %v8941_v1 }
0x29bb   : > { %8414 = vmatmul.mubr.msk.bf16.vlgmr.msra.gmra.mxu0 %vm771_vm5, %v9970_v28 }
0x29bc   : > { %8431 = vmatprep.mubr.msk.bf16.mxu0 %vm8942_vm1, %v8941_v1 }
0x2a5b   : > { %v5409_v6 = vpop.f32.mrf.mxu0 }
0x2a5d   : > { %v8373_v10 = vpop.f32.mrf.mxu0 }
0x2a5f   : > { %v5412_v13 = vpop.f32.mrf.mxu0 }
0x2a60   : > { %v5416_v14 = vpack.c.bf16 %v5412_v13, %v5409_v6 }
0x2a61   : > { %v8374_v42 = vpop.f32.mrf.mxu0 }
0x2a62   : > { %8378 = vmatmul.mubr.msk.bf16.vlgmr.msra.gmra.mxu1 %vm1068_vm7, %v5416_v14 }
0x2a63   : > { %8394 = vmatpush3.bf16.msra.mxu1 %v5599_v36  ;;  %8401 = vmatprep.mubr.msk.bf16.mxu1 %vm8942_vm1, %v8941_v1 }
0x2a64   : > { %8395 = vmatprep.subr.bf16.mxu1 %v8941_v1 }
0x2a67   : > { %8396 = vmatpush3.bf16.msra.mxu1 %v8718_v16 }
0x2a68   : > { %8397 = vmatprep.subr.bf16.mxu1 %v8941_v1 }
0x2a6b   : > { %v5551_v18 = vpop.f32.mrf.mxu0  ;;  %8398 = vmatpush3.bf16.msra.mxu1 %v8719_v17  ;;  %v8721_v17 = vld [vmem:[%s10818_s29 + $0x178] sm:$0x3f]  }
0x2a6c   : > { %8399 = vmatprep.subr.bf16.mxu1 %v8941_v1  ;;  %v5552_v26 = vadd.f32 %v7385_v5, %v5551_v18 }
0x2a6d   : > { %v8391_v31 = vpop.f32.mrf.mxu0 }
0x2a6f   : > { %v5554_v24 = vpop.f32.mrf.mxu0  ;;  %8400 = vmatpush3.bf16.msra.mxu1 %v8720_v23 }
0x2a70   : > { %v5555_v8 = vadd.f32 %v7385_v5, %v5554_v24  ;;  %8417 = vmatprep.subr.bf16.mxu1 %v8941_v1  ;;  %v5942_v24 = vsel %vm857_vm6, %v8721_v17, 0 }
0x2a71   : > { %v8392_v32 = vpop.f32.mrf.mxu0 }
0x2a72   : > { %v5726_v3 = vpack.c.bf16 %v5555_v8, %v5552_v26  ;;  %8402 = vmatmul.mubr.msk.bf16.vlgmr.msra.gmra.mxu1 %vm771_vm5, %v9970_v28  ;;  %v8722_v26 = vld [vmem:[%s10818_s29 + $0x170] sm:$0xff]   ;;  %v8723_v8 = vld [vmem:[%s10818_s29 + $0x168] sm:$0xff]   ;;  %v8724_v32 = vld [vmem:[%s10818_s29 + $0x160] sm:$0xff]  }
0x2a73   : > { %8419 = vmatprep.mubr.msk.bf16.mxu1 %vm8942_vm1, %v8941_v1 }
0x2a7b   : > { %v5719_v20 = vpop.f32.mrf.mxu0 }
0x2a7c   : > { %v5720_v33 = vadd.f32 %v7415_v29, %v5719_v20 }
0x2a7d   : > { %v8415_v30 = vpop.f32.mrf.mxu0 }
0x2a7e   : > { %v8727_v30 = vld [vmem:[%s10770_s9 + $0x168] sm:$0xff]  }
0x2a7f   : > { %v5722_v25 = vpop.f32.mrf.mxu0 }
0x2a80   : > { %v5723_v34 = vadd.f32 %v7415_v29, %v5722_v25  ;;  %v8726_v29 = vld [vmem:[%s10770_s9 + $0x170] sm:$0xff]   ;;  %v8728_v25 = vld [vmem:[%s10770_s9 + $0x160] sm:$0xff]  }
0x2a81   : > { %v8416_v35 = vpop.f32.mrf.mxu0 }
0x2a82   : > { %v5798_v37 = vpack.c.bf16 %v5723_v34, %v5720_v33  ;;  %v8729_v33 = vld [vmem:[%s10772_s11 + $0x50] sm:$0x1f]  }
0x2a83   : > { %v5856_v34 = vsel %vm1569_vm11, %v8729_v33, 0 }
0x2a84   : > { %8430 = vmatpush3.bf16.msra.mxu0 %v5856_v34 }
0x2a85   : > { %8447 = vmatprep.subr.bf16.mxu0 %v8941_v1 }
0x2b22   : > { %v5465_v39 = vpop.f32.mrf.mxu1 }
0x2b23   : > { %v10427_v40 = vadd.f32 %v5465_v39, %v10325_v9 }
0x2b24   : > { %v8379_v61 = vpop.f32.mrf.mxu1 }
0x2b26   : > { %v5468_v4 = vpop.f32.mrf.mxu1 }
0x2b27   : > { %v10430_v43 = vadd.f32 %v5468_v4, %v10329_v15 }
0x2b28   : > { %v8380_v44 = vpop.f32.mrf.mxu1 }
0x2b32   : > { %v5635_v46 = vpop.f32.mrf.mxu1 }
0x2b33   : > { %v5636_v51 = vadd.f32 %v7400_v48, %v5635_v46 }
0x2b34   : > { %v8403_v49 = vpop.f32.mrf.mxu1 }
0x2b35   : > { %v8732_v49 = vld [vmem:[%s10819_s7 + $0x168] sm:$0xff]  }
0x2b36   : > { %v5638_v38 = vpop.f32.mrf.mxu1 }
0x2b37   : > { %v5639_v52 = vadd.f32 %v7400_v48, %v5638_v38  ;;  %v8731_v48 = vld [vmem:[%s10819_s7 + $0x170] sm:$0xff]  }
0x2b38   : > { %v8404_v41 = vpop.f32.mrf.mxu1 }
0x2b39   : > { %v5727_v62 = vpack.c.bf16 %v5639_v52, %v5636_v51  ;;  %v8733_v51 = vld [vmem:[%s10819_s7 + $0x160] sm:$0xff]   ;;  %v7436_v52 = vld [vmem:[%s10823_s6 + $0xb] ss:$0 sm:$0xff]  ;;  %s8884_s6 = scalar_lea.vmem %s8883_s1, 512 }
0x2b3a   : > { %p8886_p1 = scmp.lt.s32.totalorder %s8884_s6, %s8878_s23 }
0x2b3b   : > { %v5732_v9 = vsel %vm1068_vm7, %v5727_v62, 0 }
0x2b3c   : > { %8418 = vmatpush3.bf16.xpose.msra.mxu1 %v5732_v9  ;;  %p8887_p2 = por %p8886_p1, %p8885_p0 }
0x2b3d   : > { %8423 = vmatprep.subr.bf16.mxu1 %v8941_v1 }
0x2b3e   : > { %p8888_p3 = pnand %p8887_p2, %p8881_p13 }
0x2b43   : > { %8420 = vmatmul.mubr.msk.bf16.vlgmr.msra.gmra.mxu1 %vm1068_vm7, %v5726_v3  ;;  %v8725_v3 = vld [vmem:[%s10770_s9 + $0x178] sm:$0x3f]  }
0x2b44   : > { %8424 = vmatpush3.bf16.msra.mxu1 %v5798_v37  ;;  %8425 = vmatprep.mubr.msk.bf16.mxu1 %vm8942_vm1, %v8941_v1  ;;  %v6110_v20 = vsel %vm857_vm6, %v8725_v3, 0  ;;  %v8730_v37 = vld [vmem:[%s10819_s7 + $0x178] sm:$0x3f]  }
0x2b45   : > { %8435 = vmatprep.subr.bf16.mxu1 %v8941_v1  ;;  %v6026_v44 = vsel %vm857_vm6, %v8730_v37, 0 }
0x2c03   : > { %v5768_v15 = vpop.f32.mrf.mxu1 }
0x2c04   : > { %v5769_v21 = vadd.f32 %v5768_v15, %v9299_v50 }
0x2c05   : > { %v8421_v54 = vpop.f32.mrf.mxu1 }
0x2c06   : > { %v5775_v11 = vsel %vm1116_vm10, %v5769_v21, -inf }
0x2c07   : > { %5776 = vmax.xlane.f32.xlu1 %v5775_v11  ;;  %v5771_v55 = vpop.f32.mrf.mxu1 }
0x2c08   : > { %v5772_v56 = vadd.f32 %v5771_v55, %v9303_v53  ;;  %v7466_v55 = vld [vmem:[%s10771_s10 + $0xb] ss:$0 sm:$0xff] }
0x2c09   : > { %v8422_v57 = vpop.f32.mrf.mxu1 }
0x2c0a   : > { %v5778_v27 = vsel %vm1116_vm10, %v5772_v56, -inf }
0x2c0b   : > { %5779 = vmax.xlane.f32.xlu0 %v5778_v27 }
0x2c90   : > { %v5777_v58 = vpop.xlane.xlu1 %5776 }
0x2c91   : > { %v5781_v59 = vsub.f32 %v5769_v21, %v5777_v58 }
0x2c93   : > { %v5783_v12 = vmul.f32 1.442695, %v5781_v59 }
0x2c94   : > { %v5780_v63 = vpop.xlane.xlu0 %5779 }
0x2c95   : > { %8858 = vpow2.f32 %v5783_v12  ;;  %v5782_v2 = vsub.f32 %v5772_v56, %v5780_v63 }
0x2c97   : > { %v5785_v6 = vmul.f32 1.442695, %v5782_v2 }
0x2c99   : > { %8860 = vpow2.f32 %v5785_v6 }
0x2ca2   : > { %v8859_v7 = vpop.eup %8858 }
0x2ca3   : > { %v5787_v10 = vsel %vm1116_vm10, %v8859_v7, 0.0 }
0x2ca4   : > { %5788 = vadd.xlane.f32.xlu1 %v5787_v10 }
0x2ca6   : > { %v8861_v13 = vpop.eup %8860 }
0x2ca7   : > { %v5790_v14 = vsel %vm1116_vm10, %v8861_v13, 0.0 }
0x2ca8   : > { %5791 = vadd.xlane.f32.xlu0 %v5790_v14  ;;  %v7451_v14 = vld [vmem:[%s10769_s8 + $0xb] ss:$0 sm:$0xff] }
0x2d2d   : > { %v5789_v36 = vpop.xlane.xlu1 %5788 }
0x2d2e   : > { %8862 = vrcp.f32 %v5789_v36 }
0x2d31   : > { %v5792_v42 = vpop.xlane.xlu0 %5791 }
0x2d32   : > { %8864 = vrcp.f32 %v5792_v42 }
0x2d3b   : > { %v8863_v16 = vpop.eup %8862 }
0x2d3c   : > { %v5795_v23 = vmul.f32 %v8863_v16, %v8859_v7 }
0x2d3f   : > { %v8865_v18 = vpop.eup %8864 }
0x2d40   : > { %v5796_v5 = vmul.f32 %v8865_v18, %v8861_v13 }
0x2d42   : > { %v5797_v31 = vpack.c.bf16 %v5796_v5, %v5795_v23 }
0x2d44   : > { %8426 = vmatmul.mubr.msk.bf16.vlgmr.msra.gmra.mxu1 %vm1116_vm10, %v5797_v31 }
0x2d45   : > { %8436 = vmatpush3.bf16.msra.mxu1 %v5942_v24  ;;  %8443 = vmatprep.mubr.msk.bf16.mxu1 %vm8942_vm1, %v8941_v1 }
0x2d46   : > { %8437 = vmatprep.subr.bf16.mxu1 %v8941_v1 }
0x2d49   : > { %8438 = vmatpush3.bf16.msra.mxu1 %v8722_v26 }
0x2d4a   : > { %8439 = vmatprep.subr.bf16.mxu1 %v8941_v1 }
0x2d4d   : > { %8440 = vmatpush3.bf16.msra.mxu1 %v8723_v8 }
0x2d4e   : > { %8441 = vmatprep.subr.bf16.mxu1 %v8941_v1 }
0x2d51   : > { %8442 = vmatpush3.bf16.msra.mxu1 %v8724_v32 }
0x2d52   : > { %8459 = vmatprep.subr.bf16.mxu1 %v8941_v1 }
0x2d54   : > { %8444 = vmatmul.mubr.msk.bf16.vlgmr.msra.gmra.mxu1 %vm771_vm5, %v9970_v28 }
0x2d55   : > { %8460 = vmatpush3.bf16.msra.mxu1 %v6110_v20  ;;  %8467 = vmatprep.mubr.msk.bf16.mxu1 %vm8942_vm1, %v8941_v1 }
0x2d56   : > { %8461 = vmatprep.subr.bf16.mxu1 %v8941_v1 }
0x2d59   : > { %8462 = vmatpush3.bf16.msra.mxu1 %v8726_v29 }
0x2d5a   : > { %8463 = vmatprep.subr.bf16.mxu1 %v8941_v1 }
0x2d5d   : > { %8464 = vmatpush3.bf16.msra.mxu1 %v8727_v30 }
0x2d5e   : > { %8465 = vmatprep.subr.bf16.mxu1 %v8941_v1 }
0x2d61   : > { %8466 = vmatpush3.bf16.msra.mxu1 %v8728_v25 }
0x2d62   : > { %8483 = vmatprep.subr.bf16.mxu1 %v8941_v1 }
0x2d64   : > { %8468 = vmatmul.mubr.msk.bf16.vlgmr.msra.gmra.mxu1 %vm771_vm5, %v9970_v28 }
0x2d65   : > { %8485 = vmatprep.mubr.msk.bf16.mxu1 %vm8942_vm1, %v8941_v1 }
0x2e04   : > { %v5836_v35 = vpop.f32.mrf.mxu1 }
0x2e06   : > { %v8427_v39 = vpop.f32.mrf.mxu1 }
0x2e08   : > { %v5839_v61 = vpop.f32.mrf.mxu1 }
0x2e09   : > { %v5843_v4 = vpack.c.bf16 %v5839_v61, %v5836_v35 }
0x2e0a   : > { %v8428_v46 = vpop.f32.mrf.mxu1 }
0x2e0b   : > { %8432 = vmatmul.mubr.msk.bf16.vlgmr.msra.gmra.mxu0 %vm1068_vm7, %v5843_v4 }
0x2e0c   : > { %8448 = vmatpush3.bf16.msra.mxu0 %v6026_v44  ;;  %8455 = vmatprep.mubr.msk.bf16.mxu0 %vm8942_vm1, %v8941_v1 }
0x2e0d   : > { %8449 = vmatprep.subr.bf16.mxu0 %v8941_v1 }
0x2e10   : > { %8450 = vmatpush3.bf16.msra.mxu0 %v8731_v48 }
0x2e11   : > { %8451 = vmatprep.subr.bf16.mxu0 %v8941_v1 }
0x2e14   : > { %v5978_v38 = vpop.f32.mrf.mxu1  ;;  %8452 = vmatpush3.bf16.msra.mxu0 %v8732_v49 }
0x2e15   : > { %8453 = vmatprep.subr.bf16.mxu0 %v8941_v1  ;;  %v5979_v9 = vadd.f32 %v7436_v52, %v5978_v38  ;;  %v8734_v38 = vld [vmem:[%s10772_s11 + $0x58] sm:$0x1f]  }
0x2e16   : > { %v8445_v41 = vpop.f32.mrf.mxu1 }
0x2e18   : > { %v5981_v62 = vpop.f32.mrf.mxu1  ;;  %8454 = vmatpush3.bf16.msra.mxu0 %v8733_v51  ;;  %v6283_v51 = vsel %vm1569_vm11, %v8734_v38, 0  ;;  %v7482_v38 = vld [vmem:[%s10774_s13 + $0x1] ss:$0 sm:$0xff] }
0x2e19   : > { %v5982_v15 = vadd.f32 %v7436_v52, %v5981_v62  ;;  %8471 = vmatprep.subr.bf16.mxu0 %v8941_v1  ;;  %8484 = vmatpush3.bf16.msra.mxu1 %v6283_v51 }
0x2e1a   : > { %v8446_v21 = vpop.f32.mrf.mxu1  ;;  %6637 = vmatprep.subr.bf16.mxu1 %v8940_v0 }
0x2e1b   : > { %v6153_v54 = vpack.c.bf16 %v5982_v15, %v5979_v9  ;;  %8456 = vmatmul.mubr.msk.bf16.vlgmr.msra.gmra.mxu0 %vm771_vm5, %v9970_v28 }
0x2e1c   : > { %8473 = vmatprep.mubr.msk.bf16.mxu0 %vm8942_vm1, %v8941_v1 }
0x2e24   : > { %v6146_v11 = vpop.f32.mrf.mxu1 }
0x2e25   : > { %v6147_v27 = vadd.f32 %v7466_v55, %v6146_v11  ;;  %v7479_v11 = vld [vmem:[%s10773_s12 + $0x1] ss:$0 sm:$0xff] }
0x2e26   : > { %v8469_v56 = vpop.f32.mrf.mxu1 }
0x2e28   : > { %v6149_v57 = vpop.f32.mrf.mxu1 }
0x2e29   : > { %v6150_v58 = vadd.f32 %v7466_v55, %v6149_v57 }
0x2e2a   : > { %v8470_v59 = vpop.f32.mrf.mxu1 }
0x2e2b   : > { %v6225_v12 = vpack.c.bf16 %v6150_v58, %v6147_v27 }
0x2ecb   : > { %v5892_v63 = vpop.f32.mrf.mxu0 }
0x2ecc   : > { %v10528_v2 = vadd.f32 %v5892_v63, %v10427_v40 }
0x2ecd   : > { %v8433_v6 = vpop.f32.mrf.mxu0 }
0x2ecf   : > { %v5895_v28 = vpop.f32.mrf.mxu0 }
0x2ed0   : > { %v10531_v7 = vadd.f32 %v5895_v28, %v10430_v43 }
0x2ed1   : > { %v8434_v10 = vpop.f32.mrf.mxu0 }
0x2edb   : > { %v6062_v13 = vpop.f32.mrf.mxu0 }
0x2edc   : > { %v6063_v16 = vadd.f32 %v7451_v14, %v6062_v13 }
0x2edd   : > { %v8457_v36 = vpop.f32.mrf.mxu0 }
0x2edf   : > { %v6065_v42 = vpop.f32.mrf.mxu0 }
0x2ee0   : > { %v6066_v17 = vadd.f32 %v7451_v14, %v6065_v42 }
0x2ee1   : > { %v8458_v18 = vpop.f32.mrf.mxu0 }
0x2ee2   : > { %v6154_v23 = vpack.c.bf16 %v6066_v17, %v6063_v16  ;;  %v8735_v17 = vld [vmem:[%s10776_s15 + $0x74] ss:$8 sps:$4 sm:$0x3f]   ;;  %v8737_v18 = vld [vmem:[%s10776_s15 + $0x70] ss:$8 sps:$4 sm:$0x3f]  }
0x2ee4   : > { %v6159_v40 = vsel %vm1068_vm7, %v6154_v23, 0  ;;  %v6451_v23 = vsel %vm857_vm6, %v8737_v18, 0 }
0x2ee5   : > { %8472 = vmatpush3.bf16.xpose.msra.mxu0 %v6159_v40  ;;  %v8740_v40 = vld [vmem:[%s10776_s15 + $0x64] ss:$8 sps:$4 sm:$0xff]  }
0x2ee6   : > { %8477 = vmatprep.subr.bf16.mxu0 %v8941_v1 }
0x2eec   : > { %8474 = vmatmul.mubr.msk.bf16.vlgmr.msra.gmra.mxu0 %vm1068_vm7, %v6153_v54 }
0x2eed   : > { %8478 = vmatpush3.bf16.msra.mxu0 %v6225_v12  ;;  %8479 = vmatprep.mubr.msk.bf16.mxu0 %vm8942_vm1, %v8941_v1 }
0x2eee   : > { %7501 = vmatprep.subr.msk.bf16.mxu0 %vm857_vm6, %v8735_v17 }
0x2fac   : > { %v6195_v43 = vpop.f32.mrf.mxu0 }
0x2fad   : > { %v6196_v5 = vadd.f32 %v6195_v43, %v9299_v50  ;;  %v8738_v43 = vld [vmem:[%s10776_s15 + $0x60] ss:$8 sps:$4 sm:$0xff]  }
0x2fae   : > { %v8475_v31 = vpop.f32.mrf.mxu0 }
0x2faf   : > { %v6202_v24 = vsel %vm1116_vm10, %v6196_v5, -inf  ;;  %v8741_v31 = vld [vmem:[%s10776_s15 + $0x50] ss:$8 sps:$4 sm:$0xff]  }
0x2fb0   : > { %6203 = vmax.xlane.f32.xlu1 %v6202_v24  ;;  %v6198_v26 = vpop.f32.mrf.mxu0  ;;  %v8746_v24 = vld [vmem:[%s10776_s15 + $0x44] ss:$8 sps:$4 sm:$0xff]  }
0x2fb1   : > { %v6199_v8 = vadd.f32 %v6198_v26, %v9303_v53  ;;  %v8744_v26 = vld [vmem:[%s10776_s15 + $0x40] ss:$8 sps:$4 sm:$0xff]  }
0x2fb2   : > { %v8476_v32 = vpop.f32.mrf.mxu0 }
0x2fb3   : > { %v6205_v3 = vsel %vm1116_vm10, %v6199_v8, -inf  ;;  %v8748_v32 = vld [vmem:[%s10778_s17 + $0xa8] sm:$0xff]  }
0x2fb4   : > { %6206 = vmax.xlane.f32.xlu0 %v6205_v3  ;;  %v8749_v3 = vld [vmem:[%s10778_s17 + $0xa0] sm:$0xff]  }
0x3039   : > { %v6204_v20 = vpop.xlane.xlu1 %6203 }
0x303a   : > { %v6208_v29 = vsub.f32 %v6196_v5, %v6204_v20  ;;  %v8743_v5 = vld [vmem:[%s10776_s15 + $0x54] ss:$8 sps:$4 sm:$0xff]  }
0x303b   : > { %v8750_v20 = vld [vmem:[%s10778_s17 + $0x98] sm:$0xff]  }
0x303c   : > { %v6210_v30 = vmul.f32 1.442695, %v6208_v29  ;;  %v8751_v29 = vld [vmem:[%s10778_s17 + $0x90] sm:$0xff]  }
0x303d   : > { %v6207_v25 = vpop.xlane.xlu0 %6206 }
0x303e   : > { %8866 = vpow2.f32 %v6210_v30  ;;  %v6209_v33 = vsub.f32 %v6199_v8, %v6207_v25  ;;  %v8747_v8 = vld [vmem:[%s10778_s17 + $0xb0] sm:$0xff]   ;;  %v8752_v30 = vld [vmem:[%s10778_s17 + $0x88] sm:$0xff]   ;;  %v8753_v25 = vld [vmem:[%s10778_s17 + $0x80] sm:$0xff]  }
0x3040   : > { %v6212_v34 = vmul.f32 1.442695, %v6209_v33  ;;  %v8754_v33 = vld [vmem:[%s10778_s17 + $0x78] sm:$0xff]  }
0x3042   : > { %8868 = vpow2.f32 %v6212_v34  ;;  %v8755_v34 = vld [vmem:[%s10778_s17 + $0xe8] sm:$0xff]  }
0x304b   : > { %v8867_v50 = vpop.eup %8866 }
0x304c   : > { %v6214_v35 = vsel %vm1116_vm10, %v8867_v50, 0.0 }
0x304d   : > { %6215 = vadd.xlane.f32.xlu1 %v6214_v35  ;;  %v8757_v35 = vld [vmem:[%s10778_s17 + $0xd8] sm:$0xff]  }
0x304f   : > { %v8869_v37 = vpop.eup %8868 }
0x3050   : > { %v6217_v39 = vsel %vm1116_vm10, %v8869_v37, 0.0 }
0x3051   : > { %6218 = vadd.xlane.f32.xlu0 %v6217_v39 }
0x30d6   : > { %v6216_v53 = vpop.xlane.xlu1 %6215 }
0x30d7   : > { %8870 = vrcp.f32 %v6216_v53 }
0x30da   : > { %v6219_v61 = vpop.xlane.xlu0 %6218 }
0x30db   : > { %8872 = vrcp.f32 %v6219_v61 }
0x30e4   : > { %v8871_v4 = vpop.eup %8870 }
0x30e5   : > { %v6222_v46 = vmul.f32 %v8871_v4, %v8867_v50  ;;  %v8756_v50 = vld [vmem:[%s10778_s17 + $0xe0] sm:$0xff]  }
0x30e8   : > { %v8873_v44 = vpop.eup %8872 }
0x30e9   : > { %v6223_v48 = vmul.f32 %v8873_v44, %v8869_v37  ;;  %v8758_v37 = vld [vmem:[%s10778_s17 + $0xd0] sm:$0xff]  }
0x30eb   : > { %v6224_v49 = vpack.c.bf16 %v6223_v48, %v6222_v46 }
0x30ed   : > { %8480 = vmatmul.mubr.msk.bf16.vlgmr.msra.gmra.mxu0 %vm1116_vm10, %v6224_v49 }
0x30ee   : > { %6488 = vmatprep.mubr.bf16.mxu0 %v8940_v0  ;;  %6465 = vmatpush1.bf16.msra.mxu0 %v6451_v23  ;;  %v7534_v23 = vld [vmem:[%s10779_s18 + $0x1] ss:$0 sm:$0xff] }
0x30ef   : > { %6466 = vmatprep.subr.bf16.mxu0 %v8740_v40 }
0x30f2   : > { %6467 = vmatpush1.bf16.msra.mxu0 %v8738_v43 }
0x30f3   : > { %6468 = vmatprep.subr.bf16.mxu0 %v8743_v5 }
0x30f6   : > { %6469 = vmatpush1.bf16.msra.mxu0 %v8741_v31 }
0x30f7   : > { %6470 = vmatprep.subr.bf16.mxu0 %v8746_v24 }
0x30fa   : > { %6471 = vmatpush1.bf16.msra.mxu0 %v8744_v26 }
0x30fb   : > { %8489 = vmatprep.subr.bf16.mxu0 %v8941_v1 }
0x31ad   : > { %v6263_v52 = vpop.f32.mrf.mxu0 }
0x31af   : > { %v8481_v41 = vpop.f32.mrf.mxu0 }
0x31b1   : > { %v6266_v62 = vpop.f32.mrf.mxu0 }
0x31b2   : > { %v6270_v9 = vpack.c.bf16 %v6266_v62, %v6263_v52  ;;  %v7483_v62 = vld [vmem:[%s10775_s14 + $0x1] ss:$0 sm:$0xff] }
0x31b3   : > { %v8482_v15 = vpop.f32.mrf.mxu0 }
0x31b4   : > { %8486 = vmatmul.mubr.msk.bf16.vlgmr.msra.gmra.mxu1 %vm1068_vm7, %v6270_v9 }
0x31b5   : > { %6638 = vmatpush1.bf16.msra.mxu1 %v8747_v8 }
0x31b6   : > { %6639 = vmatprep.subr.bf16.mxu1 %v8940_v0 }
0x31b9   : > { %6640 = vmatpush1.bf16.msra.mxu1 %v8748_v32 }
0x31ba   : > { %6641 = vmatprep.subr.bf16.mxu1 %v8940_v0 }
0x31bd   : > { %6642 = vmatpush1.bf16.msra.mxu1 %v8749_v3  ;;  %v7551_v3 = vld [vmem:[%s10781_s20] ss:$0 sm:$0xff] }
0x31be   : > { %6643 = vmatprep.subr.bf16.mxu1 %v8940_v0 }
0x31c1   : > { %6644 = vmatpush1.bf16.msra.mxu1 %v8750_v20 }
0x31c2   : > { %6645 = vmatprep.subr.bf16.mxu1 %v8940_v0 }
0x31c5   : > { %6646 = vmatpush1.bf16.msra.mxu1 %v8751_v29 }
0x31c6   : > { %6647 = vmatprep.subr.bf16.mxu1 %v8940_v0 }
0x31c9   : > { %6648 = vmatpush1.bf16.msra.mxu1 %v8752_v30 }
0x31ca   : > { %6649 = vmatprep.subr.bf16.mxu1 %v8940_v0 }
0x31cd   : > { %6650 = vmatpush1.bf16.msra.mxu1 %v8753_v25 }
0x31ce   : > { %6651 = vmatprep.subr.bf16.mxu1 %v8940_v0 }
0x31d1   : > { %6652 = vmatpush1.bf16.msra.mxu1 %v8754_v33 }
0x31d2   : > { %6655 = vmatprep.subr.bf16.mxu1 %v8940_v0 }
0x31d5   : > { %6656 = vmatpush2.bf16.msra.mxu1 %v8755_v34 }
0x31d6   : > { %6657 = vmatprep.subr.bf16.mxu1 %v8940_v0 }
0x31d9   : > { %6658 = vmatpush2.bf16.msra.mxu1 %v8756_v50 }
0x31da   : > { %6659 = vmatprep.subr.bf16.mxu1 %v8940_v0 }
0x31dd   : > { %6660 = vmatpush2.bf16.msra.mxu1 %v8757_v35 }
0x31de   : > { %6661 = vmatprep.subr.bf16.mxu1 %v8940_v0 }
0x31e1   : > { %6662 = vmatpush2.bf16.msra.mxu1 %v8758_v37 }
0x31e2   : > { %6663 = vmatprep.subr.bf16.mxu1 %v8940_v0 }
0x3274   : > { %v6319_v21 = vpop.f32.mrf.mxu1 }
0x3275   : > { %v6326_v54 = vadd.f32 %v6319_v21, %v10528_v2 }
0x3276   : > { %v8487_v55 = vpop.f32.mrf.mxu1 }
0x3277   : > { %v6328_v56 = vadd.f32 %v6326_v54, %v9931_v45  ;;  %v8760_v55 = vld [vmem:[%s10778_s17 + $0xc0] sm:$0xff]  }
0x3278   : > { %v6322_v57 = vpop.f32.mrf.mxu1 }
0x3279   : > { %v10560_v27 = vadd.f32 %v7479_v11, %v6328_v56  ;;  %v6327_v58 = vadd.f32 %v6322_v57, %v10531_v7  ;;  %v8761_v56 = vld [vmem:[%s10778_s17 + $0xb8] sm:$0xff]  }
0x327a   : > { %v8488_v59 = vpop.f32.mrf.mxu1  ;;  %v8762_v57 = vld [vmem:[%s10780_s19 + $0x18] sm:$0x3f]  }
0x327b   : > { %v6329_v12 = vadd.f32 %v6327_v58, %v9936_v60  ;;  %v6344_v63 = vsel %vm771_vm5, %v10560_v27, 0.0  ;;  %v6723_v58 = vsel %vm857_vm6, %v8762_v57, 0  ;;  %v7492_v59 = vld [vmem:[%s10777_s16 + $0x2] sm:$0x3] }
0x327c   : > { %6345 = vadd.xlane.f32.xlu1 %v6344_v63  ;;  %v6402_v63 = vrot.slane %v7492_v59, %v3442_v22  ;;  %v8765_v22 = vld [vmem:[%s10780_s19] sm:$0xff]  }
0x327d   : > { %v10566_v2 = vadd.f32 %v7479_v11, %v6329_v12  ;;  %v8759_v11 = vld [vmem:[%s10778_s17 + $0xc8] sm:$0xff]  }
0x327e   : > { %6664 = vmatpush2.bf16.msra.mxu1 %v8759_v11 }
0x327f   : > { %v6347_v6 = vsel %vm771_vm5, %v10566_v2, 0.0  ;;  %6665 = vmatprep.subr.bf16.mxu1 %v8940_v0 }
0x3280   : > { %6348 = vadd.xlane.f32.xlu0 %v6347_v6 }
0x3282   : > { %6666 = vmatpush2.bf16.msra.mxu1 %v8760_v55 }
0x3283   : > { %6667 = vmatprep.subr.bf16.mxu1 %v8940_v0  ;;  %v6406_v0 = vrot.slane %v7492_v59, %v3446_v19  ;;  %v8764_v19 = vld [vmem:[%s10780_s19 + $0x8] sm:$0xff]  }
0x3286   : > { %6668 = vmatpush2.bf16.msra.mxu1 %v8761_v56 }
0x3305   : > { %v6346_v28 = vpop.xlane.xlu1 %6345 }
0x3306   : > { %v6350_v45 = vmul.f32 0.016666668, %v6346_v28 }
0x3308   : > { %v10571_v10 = vsub.f32 %v10560_v27, %v6350_v45 }
0x3309   : > { %v6349_v13 = vpop.xlane.xlu0 %6348 }
0x330a   : > { %v6351_v7 = vmul.f32 0.016666668, %v6349_v13  ;;  %v6354_v60 = vmul.f32 %v10571_v10, %v10571_v10 }
0x330c   : > { %v10576_v14 = vsub.f32 %v10566_v2, %v6351_v7  ;;  %v6356_v36 = vsel %vm771_vm5, %v6354_v60, 0.0 }
0x330d   : > { %6357 = vadd.xlane.f32.xlu1 %v6356_v36 }
0x330e   : > { %v6355_v42 = vmul.f32 %v10576_v14, %v10576_v14 }
0x3310   : > { %v6359_v16 = vsel %vm771_vm5, %v6355_v42, 0.0 }
0x3311   : > { %6360 = vadd.xlane.f32.xlu0 %v6359_v16 }
0x3396   : > { %v6358_v39 = vpop.xlane.xlu1 %6357 }
0x3397   : > { %v6362_v53 = vmul.f32 0.016666668, %v6358_v39 }
0x3399   : > { %v6364_v61 = vadd.f32 1e-05, %v6362_v53 }
0x339a   : > { %v6361_v4 = vpop.xlane.xlu0 %6360 }
0x339b   : > { %8874 = vrsqrt.f32 %v6364_v61  ;;  %v6363_v44 = vmul.f32 0.016666668, %v6361_v4 }
0x339d   : > { %v6365_v46 = vadd.f32 1e-05, %v6363_v44 }
0x339f   : > { %8876 = vrsqrt.f32 %v6365_v46 }
0x33a8   : > { %v8875_v48 = vpop.eup %8874 }
0x33a9   : > { %v6368_v49 = vmul.f32 %v8875_v48, %v10571_v10 }
0x33ab   : > { %v6376_v52 = vmul.f32 %v7482_v38, %v6368_v49 }
0x33ac   : > { %v8877_v51 = vpop.eup %8876 }
0x33ad   : > { %v6369_v41 = vmul.f32 %v8877_v51, %v10576_v14  ;;  %v6384_v15 = vadd.f32 %v7483_v62, %v6376_v52 }
0x33af   : > { %v6377_v9 = vmul.f32 %v7482_v38, %v6369_v41 }
0x33b1   : > { %v6385_v21 = vadd.f32 %v7483_v62, %v6377_v9 }
0x33b3   : > { %v6386_v54 = vpack.c.bf16 %v6385_v21, %v6384_v15 }
0x33b5   : > { %7502 = vmatmul.mubr.msk.bf16.vlgmr.msra.gmra.mxu0 %vm771_vm5, %v6386_v54 }
0x33b6   : > { %8497 = vmatprep.mubr.msk.bf16.mxu0 %vm8942_vm1, %v8941_v1  ;;  %8490 = vmatpush3.bf16.msra.mxu0 %v6723_v58 }
0x33b7   : > { %8491 = vmatprep.subr.bf16.mxu0 %v8941_v1 }
0x33ba   : > { %8492 = vmatpush3.bf16.msra.mxu0 %v8763_v47 }
0x33bb   : > { %8493 = vmatprep.subr.bf16.mxu0 %v8941_v1 }
0x33be   : > { %8494 = vmatpush3.bf16.msra.mxu0 %v8764_v19 }
0x33bf   : > { %8495 = vmatprep.subr.bf16.mxu0 %v8941_v1 }
0x33c2   : > { %8496 = vmatpush3.bf16.msra.mxu0 %v8765_v22 }
0x3475   : > { %v6490_v12 = vpop.f32.mrf.mxu0 }
0x3476   : > { %v6491_v13 = vadd.f32 %v6490_v12, %v6402_v63 }
0x3477   : > { %v6492_v6 = vpop.f32.mrf.mxu0 }
0x3478   : > { %v6493_v45 = vadd.f32 %v6492_v6, %v6406_v0  ;;  %v6499_v16 = vmax.f32 %v6491_v13, 0.0 }
0x3479   : > { %v6494_v28 = vpop.f32.mrf.mxu0 }
0x347a   : > { %v6495_v10 = vadd.f32 %v6494_v28, %v6402_v63  ;;  %v6500_v36 = vmax.f32 %v6493_v45, 0.0 }
0x347b   : > { %v6496_v7 = vpop.f32.mrf.mxu0 }
0x347c   : > { %v6497_v60 = vadd.f32 %v6496_v7, %v6406_v0  ;;  %v6501_v14 = vmax.f32 %v6495_v10, 0.0 }
0x347e   : > { %v6502_v42 = vmax.f32 %v6497_v60, 0.0  ;;  %v6503_v18 = vpack.c.bf16 %v6501_v14, %v6499_v16 }
0x3480   : > { %v6504_v17 = vpack.c.bf16 %v6502_v42, %v6500_v36 }
0x3482   : > { %7550 = vmatprep.mubr.msk.bf16.mxu1 %vm3673_vm12, %v6504_v17 }
0x3483   : > { %6670 = vmatmul.mubr.bf16.vlgmr.msra.gmra.mxu1 %v6503_v18 }
0x3543   : > { %v6671_v40 = vpop.f32.mrf.mxu1 }
0x3544   : > { %v6672_v5 = vadd.f32 %v7534_v23, %v6671_v40 }
0x3545   : > { %v6673_v43 = vpop.f32.mrf.mxu1 }
0x3546   : > { %v6678_v8 = vadd.f32 %v6672_v5, %v10560_v27 }
0x3547   : > { %v6674_v31 = vpop.f32.mrf.mxu1 }
0x3548   : > { %v6675_v24 = vadd.f32 %v7534_v23, %v6674_v31 }
0x3549   : > { %v6676_v26 = vpop.f32.mrf.mxu1 }
0x354a   : > { %v6679_v1 = vadd.f32 %v6675_v24, %v10566_v2 }
0x354c   : > { %v6680_v32 = vpack.c.bf16 %v6679_v1, %v6678_v8 }
0x354e   : > { %8498 = vmatmul.mubr.msk.bf16.vlgmr.msra.gmra.mxu0 %vm771_vm5, %v6680_v32 }
0x360e   : > { %v6759_v20 = vpop.f32.mrf.mxu0 }
0x360f   : > { %v6760_v29 = vadd.f32 %v7551_v3, %v6759_v20 }
0x3610   : > { %v8499_v30 = vpop.f32.mrf.mxu0 }
0x3611   : > { %6766 = vst [vmem:[%s649_s26] sm:$0xff] %v6760_v29 }
0x3612   : > { %v6762_v27 = vpop.f32.mrf.mxu0 }
0x3613   : > { %v6763_v2 = vadd.f32 %v7551_v3, %v6762_v27 }
0x3614   : > { %v8500_v25 = vpop.f32.mrf.mxu0 }
0x3615   : > { %6767 = vst [vmem:[%s649_s26 + $0x8] sm:$0xff] %v6763_v2 }
0x3616   : > { %8891 = shalt.err (!%p8888_p3)
}
0x3617   : > { %s8892_s28 = scalar_lea.hbm %s10719_s4, 256  ;;  %s8896_s27 = scalar_lea.hbm %s10824_s22, 512 }
0x3618   : > { %p8893_p4 = scmp.ne.s32.totalorder %s10719_s4, %s8892_s28  ;;  %p8897_p9 = scmp.lt.s32.totalorder %s10719_s4, %s10824_s22 }
0x3619   : > { %p8898_p10 = scmp.lt.s32.totalorder %s8896_s27, %s8892_s28 }
0x361a   : > { %p8894_p7 = pnand %p8893_p4, %p9095_p5 }
0x361b   : > { %p8899_p11 = por %p8898_p10, %p8897_p9 }
0x361c   : > { %p8895_p8 = pneg %p8894_p7 }
0x361e   : > { %p8900_p12 = pnand %p8899_p11, %p8895_p8 }
0x3620   : > { %8903 = shalt.err (!%p8900_p12)
}
0x3621   : > { %s8945_s6 = smov 128   ;;  %s8946_s23 = smov 8  }
0x3622   : > { %8501 = dma.vmem_to_hbm [thread:$0]  (%p9095_p5), %s10714_s0, 256, %s10719_s4, %s10721_s24, %s8945_s6, %s8945_s6, %s8946_s23  }
0x3623 PF: > { %s10825_s1 = sld [smem:[#allocation7_spill]] }
0x3624   : > { %s10826_s26 = sld [smem:[#allocation5_spill]] }
0x3629   : > { %p8507_p13 = scmp.ge.s32.totalorder %s10825_s1, 2 }
0x362a   : > { %s6797_s7 = sand.u32 1, %s10826_s26  }
0x362b   : > { %p8504_p0 = pnand %p8507_p13, %p9099_p6  ;;  %s6798_s28 = scalar_lea.sflag [#allocation3], %s6797_s7 }
0x362d   : > { %p8505_p1 = pneg %p8504_p0 }
0x362f   : > { %8921 = dma.done.wait (%p8505_p1), %s6798_s28, 256  }
0x3630   : > { %8923 = vsyncadd (%p8505_p1), %s6798_s28, 4294967040  ;;  %s10828_s27 = sld [smem:[#allocation8_spill]]  ;;  %s10831_s2 = smov %s8930_s25 }
0x3631   : > { %s10829_s3 = sld [smem:[#allocation6_spill]] }
0x3632   : > { %s10830_s26 = sld [smem:[#allocation9_spill]] }
0x3636   : > { %p31_p2 = scmp.ge.s32.totalorder %s10828_s27, 4  }
0x3637   : > { %s10832_s25 = smov %s10829_s3 }
0x3638   :  { %33 = sbr.rel (!%p31_p2) target bundleno = 13 (0xd), region = 225 }
0x363d   :  { %6803 = vsyncpa [#allocation3], 1 }
0x363e   :  { %6805 = vsyncpa [#allocation3 + $0x1], 1 }

</bundles_post_ra>
